<compile_context>
chip_gen: v5e
topology: v5e:2x2
jax: 0.10.0
libtpu: 0.0.40
codegen_flags: <defaults>
</compile_context>

<pallas_src>
import functools

import numpy as np
import jax
import jax.numpy as jnp
from jax import lax
from jax.experimental import pallas as pl
from jax.experimental.pallas import tpu as pltpu

# Whole-array-resident specs (grid-less call).
_VMEM = pl.BlockSpec(memory_space=pltpu.MemorySpace.VMEM)
_SMEM = pl.BlockSpec(memory_space=pltpu.MemorySpace.SMEM)


# --------------------------------------------------------------------------
# Single fused kernel: feature extractor + encoder(x2B) + inverse head +
# forward head + cross-entropy + MSE losses.
# --------------------------------------------------------------------------
def _icm_fused_kernel(act_ref, x_ref,
                      cw_ref, cb_ref,
                      ew1_ref, eb1_ref, ew2_ref, eb2_ref,
                      iw1a_ref, iw1b_ref, ib1_ref, iw2_ref, ib2_ref,
                      fw1a_ref, fw1b_ref, fb1_ref, fw2_ref, fb2_ref,
                      losses_ref, packed_ref,
                      *, batch, n_actions, embed_dim):
    f32, bf16 = jnp.float32, jnp.bfloat16

    # ---- Feature extractor: conv+flatten folded into one dense GEMM + ReLU.
    x = x_ref[...].astype(bf16)                                        # (2B, C*H*W)
    feat = jnp.maximum(
        jnp.dot(x, cw_ref[...], preferred_element_type=f32) + cb_ref[...], 0.0)

    # ---- Shared encoder: both states in ONE (2B, feat_dim) GEMM chain.
    h1 = jnp.maximum(
        jnp.dot(feat.astype(bf16), ew1_ref[...], preferred_element_type=f32)
        + eb1_ref[...], 0.0)
    phi2 = jnp.maximum(
        jnp.dot(h1.astype(bf16), ew2_ref[...], preferred_element_type=f32)
        + eb2_ref[...], 0.0)                                           # (2B, E) f32
    phi, phi_next = phi2[:batch], phi2[batch:]
    phi_b, phin_b = phi.astype(bf16), phi_next.astype(bf16)

    # ---- Inverse head: cat([phi, phi_next], 1) folded into split weights.
    hi = jnp.maximum(
        jnp.dot(phi_b, iw1a_ref[...], preferred_element_type=f32)
        + jnp.dot(phin_b, iw1b_ref[...], preferred_element_type=f32)
        + ib1_ref[...], 0.0)                                           # (B, 512)
    logits = (jnp.dot(hi.astype(bf16), iw2_ref[...], preferred_element_type=f32)
              + ib2_ref[...])                                          # (B, A)

    # ---- Forward head: onehot @ W replaced by a row gather of fwd_w1b.
    fw1b_rows = jnp.concatenate(
        [fw1b_ref[pl.ds(act_ref[b], 1), :] for b in range(batch)], axis=0)
    hf = jnp.maximum(
        jnp.dot(phi_b, fw1a_ref[...], preferred_element_type=f32)
        + fw1b_rows + fb1_ref[...], 0.0)                               # (B, 512)
    pred = (jnp.dot(hf.astype(bf16), fw2_ref[...], preferred_element_type=f32)
            + fb2_ref[...])                                            # (B, E)

    # ---- Cross-entropy(logits, action), mean over batch (f32, stable LSE).
    lane_a = lax.broadcasted_iota(jnp.int32, (1, n_actions), 1)
    onehot = jnp.concatenate(
        [(lane_a == act_ref[b]).astype(f32) for b in range(batch)], axis=0)
    m = jnp.max(logits, axis=-1, keepdims=True)
    lse = m + jnp.log(jnp.sum(jnp.exp(logits - m), axis=-1, keepdims=True))
    tgt = jnp.sum(onehot * logits, axis=-1, keepdims=True)
    inv_loss = jnp.sum(lse - tgt, axis=0, keepdims=True) / batch       # (1, 1)

    # ---- MSE(pred, phi_next), mean over all elements (f32).
    d = pred - phi_next
    fwd_loss = (jnp.sum(jnp.sum(d * d, axis=-1, keepdims=True),
                        axis=0, keepdims=True) / (batch * embed_dim))  # (1, 1)

    # ---- Lane-dense outputs: (1,128) losses slab + (B,128) packed slab.
    lane = lax.broadcasted_iota(jnp.int32, (1, 128), 1)
    losses_ref[...] = (
        jnp.broadcast_to(inv_loss, (1, 128)) * (lane == 0).astype(f32)
        + jnp.broadcast_to(fwd_loss, (1, 128)) * (lane == 1).astype(f32))
    pad = jnp.zeros((batch, 128 - 2 * embed_dim), f32)
    packed_ref[...] = jnp.concatenate([pred, phi_next, pad], axis=1)


def pallas_icm_fused(action, x2b, kp):
    two_b, in_dim = x2b.shape
    batch = two_b // 2
    feat_dim = kp["conv_wmat"].shape[1]
    embed_dim = kp["enc_w2"].shape[1]
    hdim = kp["inv_w1a"].shape[1]
    n_actions = kp["inv_w2"].shape[1]
    assert 2 * embed_dim <= 128, "packed output slab assumes 2*embed_dim <= 128"

    inputs = (action, x2b,
              kp["conv_wmat"], kp["conv_b"],
              kp["enc_w1"], kp["enc_b1"], kp["enc_w2"], kp["enc_b2"],
              kp["inv_w1a"], kp["inv_w1b"], kp["inv_b1"],
              kp["inv_w2"], kp["inv_b2"],
              kp["fwd_w1a"], kp["fwd_w1b"], kp["fwd_b1"],
              kp["fwd_w2"], kp["fwd_b2"])

    flops = 2 * (two_b * in_dim * feat_dim          # feature extractor GEMM
                 + two_b * feat_dim * embed_dim     # encoder L1 (fused 2B)
                 + two_b * embed_dim * embed_dim    # encoder L2 (fused 2B)
                 + 2 * batch * embed_dim * hdim     # inverse L1 (split weights)
                 + batch * hdim * n_actions         # inverse L2
                 + batch * embed_dim * hdim         # forward L1 (phi path)
                 + batch * hdim * embed_dim)        # forward L2
    bytes_accessed = int(sum(int(a.size) * a.dtype.itemsize for a in inputs)
                         + 4 * (128 + batch * 128))

    kernel = functools.partial(_icm_fused_kernel, batch=batch,
                               n_actions=n_actions, embed_dim=embed_dim)
    return pl.pallas_call(
        kernel,
        out_shape=(jax.ShapeDtypeStruct((1, 128), jnp.float32),
                   jax.ShapeDtypeStruct((batch, 128), jnp.float32)),
        in_specs=[_SMEM] + [_VMEM] * (len(inputs) - 1),
        out_specs=(_VMEM, _VMEM),
        compiler_params=pltpu.CompilerParams(vmem_limit_bytes=32 * 1024 * 1024),
        cost_estimate=pl.CostEstimate(
            flops=int(flops),
            transcendentals=int(batch * (n_actions + 1)),
            bytes_accessed=bytes_accessed),
    )(*inputs)


# --------------------------------------------------------------------------
# ICM forward: one pallas_call total.
# --------------------------------------------------------------------------
def icm_forward(kp, state, next_state, action):
    B = state.shape[0]
    E = kp["enc_w2"].shape[1]
    # Raw flattened states, both stacked along the batch dim: (2B, C*H*W).
    x = jnp.concatenate([state.reshape(B, -1), next_state.reshape(B, -1)],
                        axis=0)
    losses, packed = pallas_icm_fused(action.reshape(B).astype(jnp.int32),
                                      x, kp)
    pred_phi_next = packed[:, :E]
    phi_next = packed[:, E:2 * E]
    return losses[0, 0], losses[0, 1], pred_phi_next, phi_next


# --------------------------------------------------------------------------
# Parameter init (PyTorch-style uniform(-1/sqrt(fan_in), +)) and the one-time
# repack into kernel layout.
# --------------------------------------------------------------------------
def _init_linear(key, fan_in, fan_out):
    kw, kb = jax.random.split(key)
    bound = 1.0 / (fan_in ** 0.5)
    w = jax.random.uniform(kw, (fan_in, fan_out), jnp.float32, -bound, bound)
    b = jax.random.uniform(kb, (1, fan_out), jnp.float32, -bound, bound)
    return w, b


def init_params(key, in_ch, feat_ch, feat_dim, embed_dim, n_actions):
    keys = jax.random.split(key, 8)
    bound_c = 1.0 / ((in_ch * 9) ** 0.5)
    conv_w = jax.random.uniform(keys[0], (feat_ch, in_ch, 3, 3), jnp.float32,
                                -bound_c, bound_c)
    conv_b = jax.random.uniform(keys[1], (feat_ch,), jnp.float32, -bound_c, bound_c)
    enc_w1, enc_b1 = _init_linear(keys[2], feat_dim, embed_dim)
    enc_w2, enc_b2 = _init_linear(keys[3], embed_dim, embed_dim)
    inv_w1, inv_b1 = _init_linear(keys[4], embed_dim * 2, 512)
    inv_w2, inv_b2 = _init_linear(keys[5], 512, n_actions)
    fwd_w1, fwd_b1 = _init_linear(keys[6], embed_dim + n_actions, 512)
    fwd_w2, fwd_b2 = _init_linear(keys[7], 512, embed_dim)
    return dict(conv_w=conv_w, conv_b=conv_b,
                enc_w1=enc_w1, enc_b1=enc_b1, enc_w2=enc_w2, enc_b2=enc_b2,
                inv_w1=inv_w1, inv_b1=inv_b1, inv_w2=inv_w2, inv_b2=inv_b2,
                fwd_w1=fwd_w1, fwd_b1=fwd_b1, fwd_w2=fwd_w2, fwd_b2=fwd_b2)


def _conv_to_dense(conv_w, H, W):
    """Fold Conv2d(C,F,3,stride=2,pad=1) followed by the NCHW flatten into one
    dense (C*H*W, F*OH*OW) matrix (built once on host at init time).
    Column order f*OH*OW + ph*OW + pw matches PyTorch's .view(B, -1)."""
    conv_w = np.asarray(conv_w)                          # (F, C, 3, 3)
    F_out, C, KH, KW = conv_w.shape
    OH, OW = H // 2, W // 2
    dense = np.zeros((C, H, W, F_out, OH, OW), np.float32)
    for kh in range(KH):
        for kw in range(KW):
            for ph in range(OH):
                h_in = 2 * ph + kh - 1                   # pad=1, stride=2
                if not 0 <= h_in < H:
                    continue
                for pw in range(OW):
                    w_in = 2 * pw + kw - 1
                    if not 0 <= w_in < W:
                        continue
                    dense[:, h_in, w_in, :, ph, pw] = conv_w[:, :, kh, kw].T
    return dense.reshape(C * H * W, F_out * OH * OW)


def prepare_params(params, *, H, W, embed_dim):
    """One-time repack: conv folded into a dense GEMM matrix, concat-Linear
    weights split into row blocks, GEMM weights cast to bf16 (biases and the
    gathered fwd_w1b rows stay f32)."""
    E = embed_dim
    bf16 = jnp.bfloat16
    F_out = params["conv_w"].shape[0]
    OH, OW = H // 2, W // 2
    conv_wmat = jnp.asarray(_conv_to_dense(params["conv_w"], H, W), bf16)
    conv_b = jnp.repeat(params["conv_b"], OH * OW).reshape(1, F_out * OH * OW)
    return dict(
        conv_wmat=conv_wmat, conv_b=conv_b,
        enc_w1=params["enc_w1"].astype(bf16), enc_b1=params["enc_b1"],
        enc_w2=params["enc_w2"].astype(bf16), enc_b2=params["enc_b2"],
        inv_w1a=params["inv_w1"][:E].astype(bf16),
        inv_w1b=params["inv_w1"][E:].astype(bf16),
        inv_b1=params["inv_b1"],
        inv_w2=params["inv_w2"].astype(bf16), inv_b2=params["inv_b2"],
        fwd_w1a=params["fwd_w1"][:E].astype(bf16),
        fwd_w1b=params["fwd_w1"][E:],              # f32: row-gathered, no MXU
        fwd_b1=params["fwd_b1"],
        fwd_w2=params["fwd_w2"].astype(bf16), fwd_b2=params["fwd_b2"],
    )


# --------------------------------------------------------------------------
if __name__ == "__main__":
    B, C, H, W = 2, 4, 16, 16
    FEAT_CH = 8
    OH, OW = H // 2, W // 2
    FEAT_DIM = FEAT_CH * OH * OW          # 512
    EMBED_DIM = 32
    N_ACTIONS = 6

    key = jax.random.PRNGKey(0)
    k_params, k_s, k_ns, k_a = jax.random.split(key, 4)

    params = init_params(k_params, C, FEAT_CH, FEAT_DIM, EMBED_DIM, N_ACTIONS)
    kparams = prepare_params(params, H=H, W=W, embed_dim=EMBED_DIM)
    kparams = jax.device_put(kparams)

    state = jax.random.normal(k_s, (B, C, H, W), jnp.float32)
    next_state = jax.random.normal(k_ns, (B, C, H, W), jnp.float32)
    action = jax.random.randint(k_a, (B,), 0, N_ACTIONS, jnp.int32)

    fwd = jax.jit(icm_forward)
    inv_loss, fwd_loss, pred_phi_next, phi_next = fwd(kparams, state,
                                                      next_state, action)
    jax.block_until_ready((inv_loss, fwd_loss, pred_phi_next, phi_next))

    assert pred_phi_next.shape == (B, EMBED_DIM)
    assert phi_next.shape == (B, EMBED_DIM)
    assert bool(jnp.isfinite(inv_loss)) and bool(jnp.isfinite(fwd_loss))
    print("KERNEL_OK")
</pallas_src>

<mosaic_0001>
module attributes {stable_mosaic.version = 11 : i64} {
  func.func @_icm_fused_kernel(%arg0: memref<2xi32, #tpu.memory_space<smem>>, %arg1: memref<4x1024xf32, #tpu.memory_space<vmem>>, %arg2: memref<1024x512xbf16, #tpu.memory_space<vmem>>, %arg3: memref<1x512xf32, #tpu.memory_space<vmem>>, %arg4: memref<512x32xbf16, #tpu.memory_space<vmem>>, %arg5: memref<1x32xf32, #tpu.memory_space<vmem>>, %arg6: memref<32x32xbf16, #tpu.memory_space<vmem>>, %arg7: memref<1x32xf32, #tpu.memory_space<vmem>>, %arg8: memref<32x512xbf16, #tpu.memory_space<vmem>>, %arg9: memref<32x512xbf16, #tpu.memory_space<vmem>>, %arg10: memref<1x512xf32, #tpu.memory_space<vmem>>, %arg11: memref<512x6xbf16, #tpu.memory_space<vmem>>, %arg12: memref<1x6xf32, #tpu.memory_space<vmem>>, %arg13: memref<32x512xbf16, #tpu.memory_space<vmem>>, %arg14: memref<6x512xf32, #tpu.memory_space<vmem>>, %arg15: memref<1x512xf32, #tpu.memory_space<vmem>>, %arg16: memref<512x32xbf16, #tpu.memory_space<vmem>>, %arg17: memref<1x32xf32, #tpu.memory_space<vmem>>, %arg18: memref<1x128xf32, #tpu.memory_space<vmem>>, %arg19: memref<2x128xf32, #tpu.memory_space<vmem>>) attributes {dimension_semantics = [], scalar_prefetch = 0 : i64, scratch_operands = 0 : i64, tpu.core_type = #tpu.core_type<tc>} {
    %c0 = arith.constant 0 : index
    %c0_0 = arith.constant 0 : index
    %0 = vector.load %arg1[%c0, %c0_0] : memref<4x1024xf32, #tpu.memory_space<vmem>>, vector<4x1024xf32>
    %1 = arith.truncf %0 : vector<4x1024xf32> to vector<4x1024xbf16>
    %c0_1 = arith.constant 0 : index
    %c0_2 = arith.constant 0 : index
    %2 = vector.load %arg2[%c0_1, %c0_2] : memref<1024x512xbf16, #tpu.memory_space<vmem>>, vector<1024x512xbf16>
    %cst = arith.constant dense<0.000000e+00> : vector<4x512xf32>
    %3 = tpu.matmul %1, %2, %cst {dimension_numbers = #tpu.dot_dimension_numbers<[1], [0], [0], [1], [0, 0, 1, 1], [], []>} : vector<4x1024xbf16>, vector<1024x512xbf16>, vector<4x512xf32> -> vector<4x512xf32>
    %c0_3 = arith.constant 0 : index
    %c0_4 = arith.constant 0 : index
    %4 = vector.load %arg3[%c0_3, %c0_4] : memref<1x512xf32, #tpu.memory_space<vmem>>, vector<1x512xf32>
    %5 = vector.broadcast %4 : vector<1x512xf32> to vector<4x512xf32>
    %6 = arith.addf %3, %5 : vector<4x512xf32>
    %cst_5 = arith.constant 0.000000e+00 : f32
    %7 = vector.broadcast %cst_5 : f32 to vector<4x512xf32>
    %8 = arith.maximumf %6, %7 : vector<4x512xf32>
    %9 = arith.truncf %8 : vector<4x512xf32> to vector<4x512xbf16>
    %c0_6 = arith.constant 0 : index
    %c0_7 = arith.constant 0 : index
    %10 = vector.load %arg4[%c0_6, %c0_7] : memref<512x32xbf16, #tpu.memory_space<vmem>>, vector<512x32xbf16>
    %cst_8 = arith.constant dense<0.000000e+00> : vector<4x32xf32>
    %11 = tpu.matmul %9, %10, %cst_8 {dimension_numbers = #tpu.dot_dimension_numbers<[1], [0], [0], [1], [0, 0, 1, 1], [], []>} : vector<4x512xbf16>, vector<512x32xbf16>, vector<4x32xf32> -> vector<4x32xf32>
    %c0_9 = arith.constant 0 : index
    %c0_10 = arith.constant 0 : index
    %12 = vector.load %arg5[%c0_9, %c0_10] : memref<1x32xf32, #tpu.memory_space<vmem>>, vector<1x32xf32>
    %13 = vector.broadcast %12 : vector<1x32xf32> to vector<4x32xf32>
    %14 = arith.addf %11, %13 : vector<4x32xf32>
    %cst_11 = arith.constant 0.000000e+00 : f32
    %15 = vector.broadcast %cst_11 : f32 to vector<4x32xf32>
    %16 = arith.maximumf %14, %15 : vector<4x32xf32>
    %17 = arith.truncf %16 : vector<4x32xf32> to vector<4x32xbf16>
    %c0_12 = arith.constant 0 : index
    %c0_13 = arith.constant 0 : index
    %18 = vector.load %arg6[%c0_12, %c0_13] : memref<32x32xbf16, #tpu.memory_space<vmem>>, vector<32x32xbf16>
    %cst_14 = arith.constant dense<0.000000e+00> : vector<4x32xf32>
    %19 = tpu.matmul %17, %18, %cst_14 {dimension_numbers = #tpu.dot_dimension_numbers<[1], [0], [0], [1], [0, 0, 1, 1], [], []>} : vector<4x32xbf16>, vector<32x32xbf16>, vector<4x32xf32> -> vector<4x32xf32>
    %c0_15 = arith.constant 0 : index
    %c0_16 = arith.constant 0 : index
    %20 = vector.load %arg7[%c0_15, %c0_16] : memref<1x32xf32, #tpu.memory_space<vmem>>, vector<1x32xf32>
    %21 = vector.broadcast %20 : vector<1x32xf32> to vector<4x32xf32>
    %22 = arith.addf %19, %21 : vector<4x32xf32>
    %cst_17 = arith.constant 0.000000e+00 : f32
    %23 = vector.broadcast %cst_17 : f32 to vector<4x32xf32>
    %24 = arith.maximumf %22, %23 : vector<4x32xf32>
    %25 = vector.extract_strided_slice %24 {offsets = [0, 0], sizes = [2, 32], strides = [1, 1]} : vector<4x32xf32> to vector<2x32xf32>
    %26 = vector.extract_strided_slice %24 {offsets = [2, 0], sizes = [2, 32], strides = [1, 1]} : vector<4x32xf32> to vector<2x32xf32>
    %27 = arith.truncf %25 : vector<2x32xf32> to vector<2x32xbf16>
    %28 = arith.truncf %26 : vector<2x32xf32> to vector<2x32xbf16>
    %c0_18 = arith.constant 0 : index
    %c0_19 = arith.constant 0 : index
    %29 = vector.load %arg8[%c0_18, %c0_19] : memref<32x512xbf16, #tpu.memory_space<vmem>>, vector<32x512xbf16>
    %cst_20 = arith.constant dense<0.000000e+00> : vector<2x512xf32>
    %30 = tpu.matmul %27, %29, %cst_20 {dimension_numbers = #tpu.dot_dimension_numbers<[1], [0], [0], [1], [0, 0, 1, 1], [], []>} : vector<2x32xbf16>, vector<32x512xbf16>, vector<2x512xf32> -> vector<2x512xf32>
    %c0_21 = arith.constant 0 : index
    %c0_22 = arith.constant 0 : index
    %31 = vector.load %arg9[%c0_21, %c0_22] : memref<32x512xbf16, #tpu.memory_space<vmem>>, vector<32x512xbf16>
    %cst_23 = arith.constant dense<0.000000e+00> : vector<2x512xf32>
    %32 = tpu.matmul %28, %31, %cst_23 {dimension_numbers = #tpu.dot_dimension_numbers<[1], [0], [0], [1], [0, 0, 1, 1], [], []>} : vector<2x32xbf16>, vector<32x512xbf16>, vector<2x512xf32> -> vector<2x512xf32>
    %33 = arith.addf %30, %32 : vector<2x512xf32>
    %c0_24 = arith.constant 0 : index
    %c0_25 = arith.constant 0 : index
    %34 = vector.load %arg10[%c0_24, %c0_25] : memref<1x512xf32, #tpu.memory_space<vmem>>, vector<1x512xf32>
    %35 = vector.broadcast %34 : vector<1x512xf32> to vector<2x512xf32>
    %36 = arith.addf %33, %35 : vector<2x512xf32>
    %cst_26 = arith.constant 0.000000e+00 : f32
    %37 = vector.broadcast %cst_26 : f32 to vector<2x512xf32>
    %38 = arith.maximumf %36, %37 : vector<2x512xf32>
    %39 = arith.truncf %38 : vector<2x512xf32> to vector<2x512xbf16>
    %c0_27 = arith.constant 0 : index
    %c0_28 = arith.constant 0 : index
    %40 = vector.load %arg11[%c0_27, %c0_28] : memref<512x6xbf16, #tpu.memory_space<vmem>>, vector<512x6xbf16>
    %cst_29 = arith.constant dense<0.000000e+00> : vector<2x6xf32>
    %41 = tpu.matmul %39, %40, %cst_29 {dimension_numbers = #tpu.dot_dimension_numbers<[1], [0], [0], [1], [0, 0, 1, 1], [], []>} : vector<2x512xbf16>, vector<512x6xbf16>, vector<2x6xf32> -> vector<2x6xf32>
    %c0_30 = arith.constant 0 : index
    %c0_31 = arith.constant 0 : index
    %42 = vector.load %arg12[%c0_30, %c0_31] : memref<1x6xf32, #tpu.memory_space<vmem>>, vector<1x6xf32>
    %43 = vector.broadcast %42 : vector<1x6xf32> to vector<2x6xf32>
    %44 = arith.addf %41, %43 : vector<2x6xf32>
    %c0_32 = arith.constant 0 : index
    %45 = memref.load %arg0[%c0_32] : memref<2xi32, #tpu.memory_space<smem>>
    %46 = arith.index_cast %45 : i32 to index
    %c0_33 = arith.constant 0 : index
    %47 = vector.load %arg14[%46, %c0_33] : memref<6x512xf32, #tpu.memory_space<vmem>>, vector<1x512xf32>
    %c1 = arith.constant 1 : index
    %48 = memref.load %arg0[%c1] : memref<2xi32, #tpu.memory_space<smem>>
    %49 = arith.index_cast %48 : i32 to index
    %c0_34 = arith.constant 0 : index
    %50 = vector.load %arg14[%49, %c0_34] : memref<6x512xf32, #tpu.memory_space<vmem>>, vector<1x512xf32>
    %51 = tpu.concatenate %47, %50 in 0 : vector<1x512xf32>, vector<1x512xf32> -> vector<2x512xf32>
    %c0_35 = arith.constant 0 : index
    %c0_36 = arith.constant 0 : index
    %52 = vector.load %arg13[%c0_35, %c0_36] : memref<32x512xbf16, #tpu.memory_space<vmem>>, vector<32x512xbf16>
    %cst_37 = arith.constant dense<0.000000e+00> : vector<2x512xf32>
    %53 = tpu.matmul %27, %52, %cst_37 {dimension_numbers = #tpu.dot_dimension_numbers<[1], [0], [0], [1], [0, 0, 1, 1], [], []>} : vector<2x32xbf16>, vector<32x512xbf16>, vector<2x512xf32> -> vector<2x512xf32>
    %54 = arith.addf %53, %51 : vector<2x512xf32>
    %c0_38 = arith.constant 0 : index
    %c0_39 = arith.constant 0 : index
    %55 = vector.load %arg15[%c0_38, %c0_39] : memref<1x512xf32, #tpu.memory_space<vmem>>, vector<1x512xf32>
    %56 = vector.broadcast %55 : vector<1x512xf32> to vector<2x512xf32>
    %57 = arith.addf %54, %56 : vector<2x512xf32>
    %cst_40 = arith.constant 0.000000e+00 : f32
    %58 = vector.broadcast %cst_40 : f32 to vector<2x512xf32>
    %59 = arith.maximumf %57, %58 : vector<2x512xf32>
    %60 = arith.truncf %59 : vector<2x512xf32> to vector<2x512xbf16>
    %c0_41 = arith.constant 0 : index
    %c0_42 = arith.constant 0 : index
    %61 = vector.load %arg16[%c0_41, %c0_42] : memref<512x32xbf16, #tpu.memory_space<vmem>>, vector<512x32xbf16>
    %cst_43 = arith.constant dense<0.000000e+00> : vector<2x32xf32>
    %62 = tpu.matmul %60, %61, %cst_43 {dimension_numbers = #tpu.dot_dimension_numbers<[1], [0], [0], [1], [0, 0, 1, 1], [], []>} : vector<2x512xbf16>, vector<512x32xbf16>, vector<2x32xf32> -> vector<2x32xf32>
    %c0_44 = arith.constant 0 : index
    %c0_45 = arith.constant 0 : index
    %63 = vector.load %arg17[%c0_44, %c0_45] : memref<1x32xf32, #tpu.memory_space<vmem>>, vector<1x32xf32>
    %64 = vector.broadcast %63 : vector<1x32xf32> to vector<2x32xf32>
    %65 = arith.addf %62, %64 : vector<2x32xf32>
    %66 = tpu.iota {dimensions = array<i32: 1>} : vector<1x6xi32>
    %c0_46 = arith.constant 0 : index
    %67 = memref.load %arg0[%c0_46] : memref<2xi32, #tpu.memory_space<smem>>
    %68 = vector.broadcast %67 : i32 to vector<1x6xi32>
    %69 = arith.cmpi eq, %66, %68 : vector<1x6xi32>
    %70 = arith.extui %69 : vector<1x6xi1> to vector<1x6xi32>
    %71 = arith.sitofp %70 : vector<1x6xi32> to vector<1x6xf32>
    %c1_47 = arith.constant 1 : index
    %72 = memref.load %arg0[%c1_47] : memref<2xi32, #tpu.memory_space<smem>>
    %73 = vector.broadcast %72 : i32 to vector<1x6xi32>
    %74 = arith.cmpi eq, %66, %73 : vector<1x6xi32>
    %75 = arith.extui %74 : vector<1x6xi1> to vector<1x6xi32>
    %76 = arith.sitofp %75 : vector<1x6xi32> to vector<1x6xf32>
    %77 = tpu.concatenate %71, %76 in 0 : vector<1x6xf32>, vector<1x6xf32> -> vector<2x6xf32>
    %cst_48 = arith.constant dense<0xFF800000> : vector<2xf32>
    %78 = vector.multi_reduction <maximumf>, %44, %cst_48 [1] : vector<2x6xf32> to vector<2xf32>
    %79 = vector.shape_cast %78 : vector<2xf32> to vector<2x1xf32>
    %80 = vector.broadcast %79 : vector<2x1xf32> to vector<2x6xf32>
    %81 = arith.subf %44, %80 : vector<2x6xf32>
    %82 = math.exp %81 : vector<2x6xf32>
    %cst_49 = arith.constant dense<0.000000e+00> : vector<2xf32>
    %83 = vector.multi_reduction <add>, %82, %cst_49 [1] : vector<2x6xf32> to vector<2xf32>
    %84 = vector.shape_cast %83 : vector<2xf32> to vector<2x1xf32>
    %85 = math.log %84 : vector<2x1xf32>
    %86 = arith.addf %79, %85 : vector<2x1xf32>
    %87 = arith.mulf %77, %44 : vector<2x6xf32>
    %cst_50 = arith.constant dense<0.000000e+00> : vector<2xf32>
    %88 = vector.multi_reduction <add>, %87, %cst_50 [1] : vector<2x6xf32> to vector<2xf32>
    %89 = vector.shape_cast %88 : vector<2xf32> to vector<2x1xf32>
    %90 = arith.subf %86, %89 : vector<2x1xf32>
    %cst_51 = arith.constant dense<0.000000e+00> : vector<1xf32>
    %91 = vector.multi_reduction <add>, %90, %cst_51 [0] : vector<2x1xf32> to vector<1xf32>
    %92 = vector.shape_cast %91 : vector<1xf32> to vector<1x1xf32>
    %cst_52 = arith.constant 2.000000e+00 : f32
    %93 = vector.broadcast %cst_52 : f32 to vector<1x1xf32>
    %94 = arith.divf %92, %93 : vector<1x1xf32>
    %95 = arith.subf %65, %26 : vector<2x32xf32>
    %96 = arith.mulf %95, %95 : vector<2x32xf32>
    %cst_53 = arith.constant dense<0.000000e+00> : vector<2xf32>
    %97 = vector.multi_reduction <add>, %96, %cst_53 [1] : vector<2x32xf32> to vector<2xf32>
    %98 = vector.shape_cast %97 : vector<2xf32> to vector<2x1xf32>
    %cst_54 = arith.constant dense<0.000000e+00> : vector<1xf32>
    %99 = vector.multi_reduction <add>, %98, %cst_54 [0] : vector<2x1xf32> to vector<1xf32>
    %100 = vector.shape_cast %99 : vector<1xf32> to vector<1x1xf32>
    %cst_55 = arith.constant 6.400000e+01 : f32
    %101 = vector.broadcast %cst_55 : f32 to vector<1x1xf32>
    %102 = arith.divf %100, %101 : vector<1x1xf32>
    %103 = tpu.iota {dimensions = array<i32: 1>} : vector<1x128xi32>
    %104 = vector.shape_cast %94 : vector<1x1xf32> to vector<1x1xf32>
    %105 = vector.broadcast %104 : vector<1x1xf32> to vector<1x128xf32>
    %c0_i32 = arith.constant 0 : i32
    %106 = vector.broadcast %c0_i32 : i32 to vector<1x128xi32>
    %107 = arith.cmpi eq, %103, %106 : vector<1x128xi32>
    %108 = arith.extui %107 : vector<1x128xi1> to vector<1x128xi32>
    %109 = arith.sitofp %108 : vector<1x128xi32> to vector<1x128xf32>
    %110 = arith.mulf %105, %109 : vector<1x128xf32>
    %111 = vector.shape_cast %102 : vector<1x1xf32> to vector<1x1xf32>
    %112 = vector.broadcast %111 : vector<1x1xf32> to vector<1x128xf32>
    %c1_i32 = arith.constant 1 : i32
    %113 = vector.broadcast %c1_i32 : i32 to vector<1x128xi32>
    %114 = arith.cmpi eq, %103, %113 : vector<1x128xi32>
    %115 = arith.extui %114 : vector<1x128xi1> to vector<1x128xi32>
    %116 = arith.sitofp %115 : vector<1x128xi32> to vector<1x128xf32>
    %117 = arith.mulf %112, %116 : vector<1x128xf32>
    %118 = arith.addf %110, %117 : vector<1x128xf32>
    %c0_56 = arith.constant 0 : index
    %c0_57 = arith.constant 0 : index
    %119 = vector.load %arg18[%c0_56, %c0_57] : memref<1x128xf32, #tpu.memory_space<vmem>>, vector<1x128xf32>
    tpu.vector_store %arg18[%c0_56, %c0_57], %118 {strides = array<i32>} : memref<1x128xf32, #tpu.memory_space<vmem>>, vector<1x128xf32>,
    %cst_58 = arith.constant 0.000000e+00 : f32
    %120 = vector.broadcast %cst_58 : f32 to vector<2x64xf32>
    %121 = tpu.concatenate %65, %26, %120 in 1 : vector<2x32xf32>, vector<2x32xf32>, vector<2x64xf32> -> vector<2x128xf32>
    %c0_59 = arith.constant 0 : index
    %c0_60 = arith.constant 0 : index
    %122 = vector.load %arg19[%c0_59, %c0_60] : memref<2x128xf32, #tpu.memory_space<vmem>>, vector<2x128xf32>
    tpu.vector_store %arg19[%c0_59, %c0_60], %121 {strides = array<i32>} : memref<2x128xf32, #tpu.memory_space<vmem>>, vector<2x128xf32>,
    return
  }
}

</mosaic_0001>

<bundles_post_ra>
// kernel: icm_forward.1
= control target key start
LH: loop header
LB: loop body
LE: loop exit
PB: predicated region body
PF: predicated region fallthrough
CT: control target
= control target key end

     0   :  { %s6278_s0 = inlined_call_operand.vmem [shape: s32[2], index: 0, kind: input, shape index: {}]   ;;  %s6279_s1 = inlined_call_operand.vmem [shape: f32[4,1024], index: 1, kind: input, shape index: {}]   ;;  %s6280_s2 = inlined_call_operand.hbm [shape: bf16[1024,512], index: 2, kind: input, shape index: {}]   ;;  %s6281_s3 = inlined_call_operand.vmem [shape: f32[1,512], index: 3, kind: input, shape index: {}]   ;;  %s6282_s4 = inlined_call_operand.vmem [shape: bf16[512,32], index: 4, kind: input, shape index: {}]   ;;  %s6283_s5 = inlined_call_operand.vmem [shape: f32[1,32], index: 5, kind: input, shape index: {}]   ;;  %s6284_s6 = inlined_call_operand.vmem [shape: bf16[32,32], index: 6, kind: input, shape index: {}]   ;;  %s6285_s7 = inlined_call_operand.vmem [shape: f32[1,32], index: 7, kind: input, shape index: {}]   ;;  %s6286_s8 = inlined_call_operand.vmem [shape: bf16[32,512], index: 8, kind: input, shape index: {}]   ;;  %s6287_s9 = inlined_call_operand.vmem [shape: bf16[32,512], index: 9, kind: input, shape index: {}]   ;;  %s6288_s10 = inlined_call_operand.vmem [shape: f32[1,512], index: 10, kind: input, shape index: {}]   ;;  %s6289_s11 = inlined_call_operand.vmem [shape: bf16[512,6], index: 11, kind: input, shape index: {}]   ;;  %s6290_s12 = inlined_call_operand.vmem [shape: f32[1,6], index: 12, kind: input, shape index: {}]   ;;  %s6291_s13 = inlined_call_operand.vmem [shape: bf16[32,512], index: 13, kind: input, shape index: {}]   ;;  %s6292_s14 = inlined_call_operand.vmem [shape: f32[6,512], index: 14, kind: input, shape index: {}]   ;;  %s6293_s15 = inlined_call_operand.vmem [shape: f32[1,512], index: 15, kind: input, shape index: {}]   ;;  %s6294_s16 = inlined_call_operand.vmem [shape: bf16[512,32], index: 16, kind: input, shape index: {}]   ;;  %s6295_s17 = inlined_call_operand.vmem [shape: f32[1,32], index: 17, kind: input, shape index: {}]   ;;  %s6296_s18 = inlined_call_operand.vmem [shape: f32[1,128], index: 18, kind: output, shape index: {0}]   ;;  %s6297_s19 = inlined_call_operand.vmem [shape: f32[2,128], index: 19, kind: output, shape index: {1}]  }
   0x1   :  { %6299 = sst [smem:[#allocation8_spill]] %s6278_s0 }
   0x2   :  { %6300 = sst [smem:[#allocation9_spill]] %s6279_s1 }
   0x3   :  { %6301 = sst [smem:[#allocation10_spill]] %s6280_s2 }
   0x4   :  { %6302 = sst [smem:[#allocation11_spill]] %s6281_s3 }
   0x5   :  { %25 = vsyncpa [#allocation4], 0  ;;  %s6303_s20 = sld [smem:[#allocation8_spill]] }
   0xb   :  { %s32_s21 = sshll.u32 %s6303_s20, 4  ;;  %s33_s21 = int_to_ptr.vmem [resolvable:$true] %s32_s21 }
   0xc   :  { %26 = vsyncpa [#allocation3], 0  ;;  %s6304_s2 = sld [smem:[#allocation10_spill]]  ;;  %s5548_s24 = smov [#allocation2]  }
   0xd   :  { %35 = dma.vmem_to_smem %s33_s21, 16, %s5548_s24, [#allocation4]  }
   0xe   :  { %s5549_s25 = smov [#allocation5]   ;;  %s5550_s26 = smov 256  }
   0xf   :  { %s44_s3 = sshll.u32 %s5549_s25, 4  ;;  %s5551_s27 = smov 16   ;;  %s45_s3 = int_to_ptr.vmem [resolvable:$true] %s44_s3 }
  0x12   :  { %s42_s23 = sshll.u32 %s6304_s2, 4  ;;  %s43_s23 = int_to_ptr.hbm [resolvable:$true] %s42_s23 }
  0x13   :  { %50 = dma.hbm_to_vmem [thread:$0]  %s43_s23, 32768, %s45_s3, [#allocation3], %s5550_s26, %s5550_s26, %s5551_s27  }
  0x14   :  { %5544 = dma.done.wait [#allocation4], 16  }
  0x15   :  { %5545 = vsyncadd [#allocation4], 4294967280 }
  0x16   :  { %5546 = dma.done.wait [#allocation3], 32768  }
  0x17   :  { %5547 = vsyncadd [#allocation3], 4294934528 }
  0x18   :  { %89 = sfence }
  0x19   :  { %v3688_v0 = vld [vmem:[#allocation5 + $0xe0] sm:$0xf]  ;;  %v5138_v1 = vld [vmem:[#allocation5 + $0xec] sm:$0xf0]  ;;  %s6305_s0 = sld [smem:[#allocation9_spill]]  ;;  %vm2434_vm0 = vcmask 261120  }
  0x1a   :  { %v3816_v2 = vld [vmem:[#allocation5 + $0x1e0] sm:$0xf]  ;;  %v3689_v3 = vor.u32 %v5138_v1, %v3688_v0  ;;  %v5170_v4 = vld [vmem:[#allocation5 + $0x1ec] sm:$0xf0]  ;;  %s6306_s25 = sld [smem:[#allocation11_spill]]  ;;  %vm3033_vm3 = vcmask 1040384  }
  0x1b   :  { %v3944_v5 = vld [vmem:[#allocation5 + $0x2e0] sm:$0xf]  ;;  %v5202_v6 = vld [vmem:[#allocation5 + $0x2ec] sm:$0xf0]  ;;  %v3817_v7 = vor.u32 %v5170_v4, %v3816_v2  ;;  %s6196_s1 = sld [smem:[#allocation2 + $0x1]]  ;;  %vm3483_vm4 = vcmask 41984  }
  0x1c   :  { %v3945_v8 = vor.u32 %v5202_v6, %v3944_v5  ;;  %v4072_v9 = vld [vmem:[#allocation5 + $0x3e0] sm:$0xf]  ;;  %v5234_v10 = vld [vmem:[#allocation5 + $0x3ec] sm:$0xf0]  ;;  %1676 = vmatpush.bf16.msra.mxu0 %v3689_v3  ;;  %vm3555_vm5 = vcmask 523264   ;;  %vm3522_vm6 = vcmask 254976  }
  0x1d   :  { %v3672_v11 = vld [vmem:[#allocation5 + $0xc0] sm:$0xf]  ;;  %v4073_v12 = vor.u32 %v5234_v10, %v4072_v9  ;;  %v5134_v13 = vld [vmem:[#allocation5 + $0xcc] sm:$0xf0]  ;;  %1689 = vmatpush.bf16.msra.mxu1 %v3817_v7  ;;  %vm3501_vm7 = vcmask 1041408  }
  0x1e   :  { %v3800_v14 = vld [vmem:[#allocation5 + $0x1c0] sm:$0xf]  ;;  %v5166_v15 = vld [vmem:[#allocation5 + $0x1cc] sm:$0xf0]  ;;  %1702 = vmatpush.bf16.msra.mxu2 %v3945_v8  ;;  %v3673_v16 = vor.u32 %v5134_v13, %v3672_v11 }
  0x1f   :  { %v3801_v17 = vor.u32 %v5166_v15, %v3800_v14  ;;  %v3928_v18 = vld [vmem:[#allocation5 + $0x2c0] sm:$0xf]  ;;  %v5198_v19 = vld [vmem:[#allocation5 + $0x2cc] sm:$0xf0]  ;;  %1715 = vmatpush.bf16.msra.mxu3 %v4073_v12 }
  0x20   :  { %v4056_v20 = vld [vmem:[#allocation5 + $0x3c0] sm:$0xf]  ;;  %v3929_v21 = vor.u32 %v5198_v19, %v3928_v18  ;;  %v5230_v22 = vld [vmem:[#allocation5 + $0x3cc] sm:$0xf0]  ;;  %1677 = vmatpush.bf16.msra.mxu0 %v3673_v16 }
  0x21   :  { %v3656_v23 = vld [vmem:[#allocation5 + $0xa0] sm:$0xf]  ;;  %v5130_v24 = vld [vmem:[#allocation5 + $0xac] sm:$0xf0]  ;;  %v4057_v25 = vor.u32 %v5230_v22, %v4056_v20  ;;  %1690 = vmatpush.bf16.msra.mxu1 %v3801_v17  ;;  %s3009_s21 = sand.u32 7, %s6196_s1 }
  0x22   :  { %v3784_v26 = vld [vmem:[#allocation5 + $0x1a0] sm:$0xf]  ;;  %v5162_v27 = vld [vmem:[#allocation5 + $0x1ac] sm:$0xf0]  ;;  %v3657_v29 = vor.u32 %v5130_v24, %v3656_v23  ;;  %1703 = vmatpush.bf16.msra.mxu2 %v3929_v21 }
  0x23   :  { %v3912_v28 = vld [vmem:[#allocation5 + $0x2a0] sm:$0xf]  ;;  %v5194_v30 = vld [vmem:[#allocation5 + $0x2ac] sm:$0xf0]  ;;  %v3785_v33 = vor.u32 %v5162_v27, %v3784_v26  ;;  %1716 = vmatpush.bf16.msra.mxu3 %v4057_v25 }
  0x24   :  { %v4040_v31 = vld [vmem:[#allocation5 + $0x3a0] sm:$0xf]  ;;  %v5226_v32 = vld [vmem:[#allocation5 + $0x3ac] sm:$0xf0]  ;;  %v3913_v34 = vor.u32 %v5194_v30, %v3912_v28  ;;  %1678 = vmatpush.bf16.msra.mxu0 %v3657_v29 }
  0x25   :  { %v3640_v35 = vld [vmem:[#allocation5 + $0x80] sm:$0xf]  ;;  %v5126_v36 = vld [vmem:[#allocation5 + $0x8c] sm:$0xf0]  ;;  %v4041_v38 = vor.u32 %v5226_v32, %v4040_v31  ;;  %1691 = vmatpush.bf16.msra.mxu1 %v3785_v33 }
  0x26   :  { %v3768_v37 = vld [vmem:[#allocation5 + $0x180] sm:$0xf]  ;;  %v5158_v39 = vld [vmem:[#allocation5 + $0x18c] sm:$0xf0]  ;;  %v3641_v44 = vor.u32 %v5126_v36, %v3640_v35  ;;  %1704 = vmatpush.bf16.msra.mxu2 %v3913_v34 }
  0x27   :  { %v3896_v40 = vld [vmem:[#allocation5 + $0x280] sm:$0xf]  ;;  %v5190_v41 = vld [vmem:[#allocation5 + $0x28c] sm:$0xf0]  ;;  %v3769_v45 = vor.u32 %v5158_v39, %v3768_v37  ;;  %1717 = vmatpush.bf16.msra.mxu3 %v4041_v38 }
  0x28   :  { %v4024_v42 = vld [vmem:[#allocation5 + $0x380] sm:$0xf]  ;;  %v5222_v43 = vld [vmem:[#allocation5 + $0x38c] sm:$0xf0]  ;;  %v3897_v46 = vor.u32 %v5190_v41, %v3896_v40  ;;  %1679 = vmatpush.bf16.msra.mxu0 %v3641_v44 }
  0x29   :  { %v3624_v47 = vld [vmem:[#allocation5 + $0x60] sm:$0xf]  ;;  %v5122_v48 = vld [vmem:[#allocation5 + $0x6c] sm:$0xf0]  ;;  %v4025_v50 = vor.u32 %v5222_v43, %v4024_v42  ;;  %1692 = vmatpush.bf16.msra.mxu1 %v3769_v45 }
  0x2a   :  { %v3752_v49 = vld [vmem:[#allocation5 + $0x160] sm:$0xf]  ;;  %v5154_v51 = vld [vmem:[#allocation5 + $0x16c] sm:$0xf0]  ;;  %v3625_v56 = vor.u32 %v5122_v48, %v3624_v47  ;;  %1705 = vmatpush.bf16.msra.mxu2 %v3897_v46 }
  0x2b   :  { %v3880_v52 = vld [vmem:[#allocation5 + $0x260] sm:$0xf]  ;;  %v5186_v53 = vld [vmem:[#allocation5 + $0x26c] sm:$0xf0]  ;;  %v3753_v57 = vor.u32 %v5154_v51, %v3752_v49  ;;  %1718 = vmatpush.bf16.msra.mxu3 %v4025_v50 }
  0x2c   :  { %v4008_v54 = vld [vmem:[#allocation5 + $0x360] sm:$0xf]  ;;  %v5218_v55 = vld [vmem:[#allocation5 + $0x36c] sm:$0xf0]  ;;  %v3881_v58 = vor.u32 %v5186_v53, %v3880_v52  ;;  %1680 = vmatpush.bf16.msra.mxu0 %v3625_v56 }
  0x2d   :  { %v3608_v59 = vld [vmem:[#allocation5 + $0x40] sm:$0xf]  ;;  %v5118_v60 = vld [vmem:[#allocation5 + $0x4c] sm:$0xf0]  ;;  %v4009_v62 = vor.u32 %v5218_v55, %v4008_v54  ;;  %1693 = vmatpush.bf16.msra.mxu1 %v3753_v57 }
  0x2e   :  { %v3736_v61 = vld [vmem:[#allocation5 + $0x140] sm:$0xf]  ;;  %v5150_v63 = vld [vmem:[#allocation5 + $0x14c] sm:$0xf0]  ;;  %v3609_v4 = vor.u32 %v5118_v60, %v3608_v59  ;;  %1706 = vmatpush.bf16.msra.mxu2 %v3881_v58 }
  0x2f   :  { %v3864_v0 = vld [vmem:[#allocation5 + $0x240] sm:$0xf]  ;;  %v5182_v1 = vld [vmem:[#allocation5 + $0x24c] sm:$0xf0]  ;;  %v3737_v5 = vor.u32 %v5150_v63, %v3736_v61  ;;  %1719 = vmatpush.bf16.msra.mxu3 %v4009_v62 }
  0x30   :  { %v3992_v2 = vld [vmem:[#allocation5 + $0x340] sm:$0xf]  ;;  %v5214_v3 = vld [vmem:[#allocation5 + $0x34c] sm:$0xf0]  ;;  %v3865_v6 = vor.u32 %v5182_v1, %v3864_v0  ;;  %1681 = vmatpush.bf16.msra.mxu0 %v3609_v4  ;;  %v91_v4 = vld [vmem:[%s6305_s0] sm:$0xff] }
  0x31   :  { %v3592_v7 = vld [vmem:[#allocation5 + $0x20] sm:$0xf]  ;;  %v5114_v8 = vld [vmem:[#allocation5 + $0x2c] sm:$0xf0]  ;;  %v3993_v10 = vor.u32 %v5214_v3, %v3992_v2  ;;  %1694 = vmatpush.bf16.msra.mxu1 %v3737_v5  ;;  %99 = vst [vmem:[#allocation1] ss:$2 sm:$0xff] %v91_v4 }
  0x32   :  { %v3720_v9 = vld [vmem:[#allocation5 + $0x120] sm:$0xf]  ;;  %v5146_v11 = vld [vmem:[#allocation5 + $0x12c] sm:$0xf0]  ;;  %v3593_v16 = vor.u32 %v5114_v8, %v3592_v7  ;;  %1707 = vmatpush.bf16.msra.mxu2 %v3865_v6 }
  0x33   :  { %v3848_v12 = vld [vmem:[#allocation5 + $0x220] sm:$0xf]  ;;  %v5178_v13 = vld [vmem:[#allocation5 + $0x22c] sm:$0xf0]  ;;  %v3721_v19 = vor.u32 %v5146_v11, %v3720_v9  ;;  %1720 = vmatpush.bf16.msra.mxu3 %v3993_v10 }
  0x34   :  { %v3976_v14 = vld [vmem:[#allocation5 + $0x320] sm:$0xf]  ;;  %v5210_v15 = vld [vmem:[#allocation5 + $0x32c] sm:$0xf0]  ;;  %v3849_v20 = vor.u32 %v5178_v13, %v3848_v12  ;;  %1682 = vmatpush.bf16.msra.mxu0 %v3593_v16 }
  0x35   :  { %v3576_v17 = vld [vmem:[#allocation5] sm:$0xf]  ;;  %v5110_v18 = vld [vmem:[#allocation5 + $0xc] sm:$0xf0]  ;;  %v3977_v24 = vor.u32 %v5210_v15, %v3976_v14  ;;  %1695 = vmatpush.bf16.msra.mxu1 %v3721_v19 }
  0x36   :  { %v3704_v21 = vld [vmem:[#allocation5 + $0x100] sm:$0xf]  ;;  %v5142_v22 = vld [vmem:[#allocation5 + $0x10c] sm:$0xf0]  ;;  %v3577_v31 = vor.u32 %v5110_v18, %v3576_v17  ;;  %1708 = vmatpush.bf16.msra.mxu2 %v3849_v20 }
  0x37   :  { %v3832_v23 = vld [vmem:[#allocation5 + $0x200] sm:$0xf]  ;;  %v5174_v25 = vld [vmem:[#allocation5 + $0x20c] sm:$0xf0]  ;;  %v3705_v35 = vor.u32 %v5142_v22, %v3704_v21  ;;  %1721 = vmatpush.bf16.msra.mxu3 %v3977_v24 }
  0x38   :  { %v3960_v26 = vld [vmem:[#allocation5 + $0x300] sm:$0xf]  ;;  %v5206_v27 = vld [vmem:[#allocation5 + $0x30c] sm:$0xf0]  ;;  %v3833_v36 = vor.u32 %v5174_v25, %v3832_v23  ;;  %1683 = vmatpush.bf16.msra.mxu0 %v3577_v31 }
  0x39   :  { %v4200_v28 = vld [vmem:[#allocation5 + $0x4e0] sm:$0xf]  ;;  %v5266_v29 = vld [vmem:[#allocation5 + $0x4ec] sm:$0xf0]  ;;  %v3961_v39 = vor.u32 %v5206_v27, %v3960_v26  ;;  %1696 = vmatpush.bf16.msra.mxu1 %v3705_v35 }
  0x3a   :  { %v4328_v30 = vld [vmem:[#allocation5 + $0x5e0] sm:$0xf]  ;;  %v5298_v32 = vld [vmem:[#allocation5 + $0x5ec] sm:$0xf0]  ;;  %v4201_v40 = vor.u32 %v5266_v29, %v4200_v28  ;;  %1709 = vmatpush.bf16.msra.mxu2 %v3833_v36 }
  0x3b   :  { %v4456_v33 = vld [vmem:[#allocation5 + $0x6e0] sm:$0xf]  ;;  %v5330_v34 = vld [vmem:[#allocation5 + $0x6ec] sm:$0xf0]  ;;  %v4329_v41 = vor.u32 %v5298_v32, %v4328_v30  ;;  %1722 = vmatpush.bf16.msra.mxu3 %v3961_v39 }
  0x3c   :  { %v4584_v37 = vld [vmem:[#allocation5 + $0x7e0] sm:$0xf]  ;;  %v5362_v38 = vld [vmem:[#allocation5 + $0x7ec] sm:$0xf0]  ;;  %v4457_v42 = vor.u32 %v5330_v34, %v4456_v33  ;;  %1728 = vmatpush.bf16.msrb.mxu0 %v4201_v40 }
  0x3d   :  { %v4184_v43 = vld [vmem:[#allocation5 + $0x4c0] sm:$0xf]  ;;  %v5262_v44 = vld [vmem:[#allocation5 + $0x4cc] sm:$0xf0]  ;;  %v4585_v46 = vor.u32 %v5362_v38, %v4584_v37  ;;  %1741 = vmatpush.bf16.msrb.mxu1 %v4329_v41 }
  0x3e   :  { %v4312_v45 = vld [vmem:[#allocation5 + $0x5c0] sm:$0xf]  ;;  %v5294_v47 = vld [vmem:[#allocation5 + $0x5cc] sm:$0xf0]  ;;  %v4185_v52 = vor.u32 %v5262_v44, %v4184_v43  ;;  %1754 = vmatpush.bf16.msrb.mxu2 %v4457_v42 }
  0x3f   :  { %v4440_v48 = vld [vmem:[#allocation5 + $0x6c0] sm:$0xf]  ;;  %v5326_v49 = vld [vmem:[#allocation5 + $0x6cc] sm:$0xf0]  ;;  %v4313_v53 = vor.u32 %v5294_v47, %v4312_v45  ;;  %1767 = vmatpush.bf16.msrb.mxu3 %v4585_v46 }
  0x40   :  { %v4568_v50 = vld [vmem:[#allocation5 + $0x7c0] sm:$0xf]  ;;  %v5358_v51 = vld [vmem:[#allocation5 + $0x7cc] sm:$0xf0]  ;;  %v4441_v54 = vor.u32 %v5326_v49, %v4440_v48  ;;  %1729 = vmatpush.bf16.msrb.mxu0 %v4185_v52 }
  0x41   :  { %v4168_v55 = vld [vmem:[#allocation5 + $0x4a0] sm:$0xf]  ;;  %v5258_v56 = vld [vmem:[#allocation5 + $0x4ac] sm:$0xf0]  ;;  %v4569_v58 = vor.u32 %v5358_v51, %v4568_v50  ;;  %1742 = vmatpush.bf16.msrb.mxu1 %v4313_v53 }
  0x42   :  { %v4296_v57 = vld [vmem:[#allocation5 + $0x5a0] sm:$0xf]  ;;  %v5290_v59 = vld [vmem:[#allocation5 + $0x5ac] sm:$0xf0]  ;;  %v4169_v1 = vor.u32 %v5258_v56, %v4168_v55  ;;  %1755 = vmatpush.bf16.msrb.mxu2 %v4441_v54 }
  0x43   :  { %v4424_v60 = vld [vmem:[#allocation5 + $0x6a0] sm:$0xf]  ;;  %v5322_v61 = vld [vmem:[#allocation5 + $0x6ac] sm:$0xf0]  ;;  %v4297_v5 = vor.u32 %v5290_v59, %v4296_v57  ;;  %1768 = vmatpush.bf16.msrb.mxu3 %v4569_v58 }
  0x44   :  { %v4552_v62 = vld [vmem:[#allocation5 + $0x7a0] sm:$0xf]  ;;  %v5354_v63 = vld [vmem:[#allocation5 + $0x7ac] sm:$0xf0]  ;;  %v4425_v6 = vor.u32 %v5322_v61, %v4424_v60  ;;  %1730 = vmatpush.bf16.msrb.mxu0 %v4169_v1 }
  0x45   :  { %v4152_v0 = vld [vmem:[#allocation5 + $0x480] sm:$0xf]  ;;  %v5254_v2 = vld [vmem:[#allocation5 + $0x48c] sm:$0xf0]  ;;  %v4553_v9 = vor.u32 %v5354_v63, %v4552_v62  ;;  %1743 = vmatpush.bf16.msrb.mxu1 %v4297_v5  ;;  %v93_v5 = vld [vmem:[%s6305_s0 + $0x10] sm:$0xff] }
  0x46   :  { %v92_v3 = vld [vmem:[%s6305_s0 + $0x8] sm:$0xff]  ;;  %v5286_v8 = vld [vmem:[#allocation5 + $0x58c] sm:$0xf0]  ;;  %v4153_v14 = vor.u32 %v5254_v2, %v4152_v0  ;;  %1756 = vmatpush.bf16.msrb.mxu2 %v4425_v6  ;;  %v106_v35 = vld.sshfl [vmem:[#allocation1] sm:$0xff pattern:$0x75316420] }
  0x47   :  { %v4280_v7 = vld [vmem:[#allocation5 + $0x580] sm:$0xf]  ;;  %101 = vst [vmem:[#allocation1 + $0x10] ss:$2 sm:$0xff] %v92_v3  ;;  %v5318_v11 = vld [vmem:[#allocation5 + $0x68c] sm:$0xf0]  ;;  %1769 = vmatpush.bf16.msrb.mxu3 %v4553_v9  ;;  %v5672_v42 = vpack.c.bf16 %v106_v35, %v106_v35 }
  0x48   :  { %v4408_v10 = vld [vmem:[#allocation5 + $0x680] sm:$0xf]  ;;  %v5350_v13 = vld [vmem:[#allocation5 + $0x78c] sm:$0xf0]  ;;  %v4281_v16 = vor.u32 %v5286_v8, %v4280_v7  ;;  %1731 = vmatpush.bf16.msrb.mxu0 %v4153_v14  ;;  %v5136_v8 = vld [vmem:[#allocation5 + $0xe4] sm:$0xf] }
  0x49   :  { %v4536_v12 = vld [vmem:[#allocation5 + $0x780] sm:$0xf]  ;;  %v4409_v17 = vor.u32 %v5318_v11, %v4408_v10  ;;  %v5250_v18 = vld [vmem:[#allocation5 + $0x46c] sm:$0xf0]  ;;  %1684 = vmatmul.bf16.vlgmr.msra.gmra.mxu0 %v5672_v42  ;;  %103 = vst [vmem:[#allocation1 + $0x20] ss:$2 sm:$0xff] %v93_v5 }
  0x4a   :  { %v4136_v15 = vld [vmem:[#allocation5 + $0x460] sm:$0xf]  ;;  %v5282_v20 = vld [vmem:[#allocation5 + $0x56c] sm:$0xf0]  ;;  %v4537_v21 = vor.u32 %v5350_v13, %v4536_v12  ;;  %1744 = vmatpush.bf16.msrb.mxu1 %v4281_v16  ;;  %v3690_v9 = vld [vmem:[#allocation5 + $0xf0] sm:$0xf0] }
  0x4b   :  { %v4264_v19 = vld [vmem:[#allocation5 + $0x560] sm:$0xf]  ;;  %v5314_v23 = vld [vmem:[#allocation5 + $0x66c] sm:$0xf0]  ;;  %v4137_v28 = vor.u32 %v5250_v18, %v4136_v15  ;;  %1757 = vmatpush.bf16.msrb.mxu2 %v4409_v17  ;;  %v5168_v10 = vld [vmem:[#allocation5 + $0x1e4] sm:$0xf] }
  0x4c   :  { %v4392_v22 = vld [vmem:[#allocation5 + $0x660] sm:$0xf]  ;;  %v5346_v25 = vld [vmem:[#allocation5 + $0x76c] sm:$0xf0]  ;;  %v4265_v29 = vor.u32 %v5282_v20, %v4264_v19  ;;  %1770 = vmatpush.bf16.msrb.mxu3 %v4537_v21  ;;  %v3818_v11 = vld [vmem:[#allocation5 + $0x1f0] sm:$0xf0] }
  0x4d   :  { %v4520_v24 = vld [vmem:[#allocation5 + $0x760] sm:$0xf]  ;;  %v5246_v27 = vld [vmem:[#allocation5 + $0x44c] sm:$0xf0]  ;;  %v4393_v33 = vor.u32 %v5314_v23, %v4392_v22  ;;  %1732 = vmatpush.bf16.msrb.mxu0 %v4137_v28  ;;  %v5200_v13 = vld [vmem:[#allocation5 + $0x2e4] sm:$0xf]  ;;  %v3693_v22 = vor.u32 %v5136_v8, %v3690_v9 }
  0x4e   :  { %v4120_v26 = vld [vmem:[#allocation5 + $0x440] sm:$0xf]  ;;  %v108_v31 = vld.sshfl [vmem:[#allocation1 + $0x10] sm:$0xff pattern:$0x75316420]  ;;  %v4521_v38 = vor.u32 %v5346_v25, %v4520_v24  ;;  %1745 = vmatpush.bf16.msrb.mxu1 %v4265_v29  ;;  %v94_v58 = vld [vmem:[%s6305_s0 + $0x18] sm:$0xff]  ;;  %v3821_v25 = vor.u32 %v5168_v10, %v3818_v11 }
  0x4f   :  { %v4248_v30 = vld [vmem:[#allocation5 + $0x540] sm:$0xf]  ;;  %v109_v32 = vld.sshfl [vmem:[#allocation1 + $0x18] sm:$0xff pattern:$0x75316420]  ;;  %v5668_v34 = vpack.c.bf16 %v108_v31, %v108_v31  ;;  %v4121_v46 = vor.u32 %v5246_v27, %v4120_v26  ;;  %1758 = vmatpush.bf16.msrb.mxu2 %v4393_v33  ;;  %s6188_s0 = sld [smem:[#allocation2]] }
  0x50   :  { %v5670_v36 = vpack.c.bf16 %v109_v32, %v109_v32  ;;  %v107_v37 = vld.sshfl [vmem:[#allocation1 + $0x8] sm:$0xff pattern:$0x75316420]  ;;  %v5278_v39 = vld [vmem:[#allocation5 + $0x54c] sm:$0xf0]  ;;  %1771 = vmatpush.bf16.msrb.mxu3 %v4521_v38 }
  0x51   :  { %v4376_v40 = vld [vmem:[#allocation5 + $0x640] sm:$0xf]  ;;  %v5310_v41 = vld [vmem:[#allocation5 + $0x64c] sm:$0xf0]  ;;  %v5674_v43 = vpack.c.bf16 %v107_v37, %v107_v37  ;;  %1710 = vmatmul.bf16.vlgmr.msra.gmra.mxu2 %v5668_v34  ;;  %v4249_v50 = vor.u32 %v5278_v39, %v4248_v30  ;;  %105 = vst [vmem:[#allocation1 + $0x30] ss:$2 sm:$0xff] %v94_v58  ;;  %1733 = vmatpush.bf16.msrb.mxu0 %v4121_v46 }
  0x52   :  { %v4504_v44 = vld [vmem:[#allocation5 + $0x740] sm:$0xf]  ;;  %v5342_v45 = vld [vmem:[#allocation5 + $0x74c] sm:$0xf0]  ;;  %1723 = vmatmul.bf16.vlgmr.msra.gmra.mxu3 %v5670_v36  ;;  %v4377_v51 = vor.u32 %v5310_v41, %v4376_v40  ;;  %v3946_v14 = vld [vmem:[#allocation5 + $0x2f0] sm:$0xf0] }
  0x53   :  { %v4104_v47 = vld [vmem:[#allocation5 + $0x420] sm:$0xf]  ;;  %v5242_v48 = vld [vmem:[#allocation5 + $0x42c] sm:$0xf0]  ;;  %1697 = vmatmul.bf16.vlgmr.msra.gmra.mxu1 %v5674_v43  ;;  %v4505_v55 = vor.u32 %v5342_v45, %v4504_v44  ;;  %v5232_v15 = vld [vmem:[#allocation5 + $0x3e4] sm:$0xf]  ;;  %v3949_v26 = vor.u32 %v5200_v13, %v3946_v14 }
  0x54   :  { %v4232_v49 = vld [vmem:[#allocation5 + $0x520] sm:$0xf]  ;;  %v5274_v52 = vld [vmem:[#allocation5 + $0x52c] sm:$0xf0]  ;;  %v4105_v61 = vor.u32 %v5242_v48, %v4104_v47  ;;  %1746 = vmatpush.bf16.msrb.mxu1 %v4249_v50  ;;  %1759 = vmatpush.bf16.msrb.mxu2 %v4377_v51  ;;  %v4074_v18 = vld [vmem:[#allocation5 + $0x3f0] sm:$0xf0] }
  0x55   :  { %v4360_v53 = vld [vmem:[#allocation5 + $0x620] sm:$0xf]  ;;  %v5306_v54 = vld [vmem:[#allocation5 + $0x62c] sm:$0xf0]  ;;  %v4233_v1 = vor.u32 %v5274_v52, %v4232_v49  ;;  %1772 = vmatpush.bf16.msrb.mxu3 %v4505_v55  ;;  %v5132_v19 = vld [vmem:[#allocation5 + $0xc4] sm:$0xf]  ;;  %v4077_v30 = vor.u32 %v5232_v15, %v4074_v18 }
  0x56   :  { %v4488_v56 = vld [vmem:[#allocation5 + $0x720] sm:$0xf]  ;;  %v5338_v57 = vld [vmem:[#allocation5 + $0x72c] sm:$0xf0]  ;;  %v4361_v2 = vor.u32 %v5306_v54, %v4360_v53  ;;  %1734 = vmatpush.bf16.msrb.mxu0 %v4105_v61  ;;  %v3674_v20 = vld [vmem:[#allocation5 + $0xd0] sm:$0xf0] }
  0x57   :  { %v4088_v59 = vld [vmem:[#allocation5 + $0x400] sm:$0xf]  ;;  %v5238_v60 = vld [vmem:[#allocation5 + $0x40c] sm:$0xf0]  ;;  %v4489_v6 = vor.u32 %v5338_v57, %v4488_v56  ;;  %v5164_v27 = vld [vmem:[#allocation5 + $0x1c4] sm:$0xf]  ;;  %v3677_v40 = vor.u32 %v5132_v19, %v3674_v20 }
  0x58   :  { %v4216_v62 = vld [vmem:[#allocation5 + $0x500] sm:$0xf]  ;;  %v5270_v63 = vld [vmem:[#allocation5 + $0x50c] sm:$0xf0]  ;;  %v4089_v12 = vor.u32 %v5238_v60, %v4088_v59  ;;  %1747 = vmatpush.bf16.msrb.mxu1 %v4233_v1  ;;  %1760 = vmatpush.bf16.msrb.mxu2 %v4361_v2  ;;  %v3802_v28 = vld [vmem:[#allocation5 + $0x1d0] sm:$0xf0] }
  0x59   :  { %v4344_v0 = vld [vmem:[#allocation5 + $0x600] sm:$0xf]  ;;  %v5302_v3 = vld [vmem:[#allocation5 + $0x60c] sm:$0xf0]  ;;  %v4217_v16 = vor.u32 %v5270_v63, %v4216_v62  ;;  %1773 = vmatpush.bf16.msrb.mxu3 %v4489_v6  ;;  %v5196_v29 = vld [vmem:[#allocation5 + $0x2c4] sm:$0xf]  ;;  %v3805_v44 = vor.u32 %v5164_v27, %v3802_v28 }
  0x5a   :  { %v4472_v4 = vld [vmem:[#allocation5 + $0x700] sm:$0xf]  ;;  %v5334_v7 = vld [vmem:[#allocation5 + $0x70c] sm:$0xf0]  ;;  %v4345_v17 = vor.u32 %v5302_v3, %v4344_v0  ;;  %1735 = vmatpush.bf16.msrb.mxu0 %v4089_v12  ;;  %v3930_v31 = vld [vmem:[#allocation5 + $0x2d0] sm:$0xf0] }
  0x5b   :  { %v4473_v21 = vor.u32 %v5334_v7, %v4472_v4  ;;  %v112_v23 = vld.sshfl [vmem:[#allocation1 + $0x30] sm:$0xff pattern:$0x75316420]  ;;  %v113_v24 = vld.sshfl [vmem:[#allocation1 + $0x38] sm:$0xff pattern:$0x75316420]  ;;  %v3933_v45 = vor.u32 %v5196_v29, %v3930_v31 }
  0x5c   :  { %v5228_v32 = vld [vmem:[#allocation5 + $0x3c4] sm:$0xf]  ;;  %v4058_v33 = vld [vmem:[#allocation5 + $0x3d0] sm:$0xf0]  ;;  %v5686_v35 = vpack.c.bf16 %v112_v23, %v112_v23  ;;  %1748 = vmatpush.bf16.msrb.mxu1 %v4217_v16  ;;  %1761 = vmatpush.bf16.msrb.mxu2 %v4345_v17  ;;  %v5688_v38 = vpack.c.bf16 %v113_v24, %v113_v24  ;;  %s2999_s27 = sand.u32 7, %s6188_s0 }
  0x5d   :  { %v110_v37 = vld.sshfl [vmem:[#allocation1 + $0x20] sm:$0xff pattern:$0x75316420]  ;;  %v111_v39 = vld.sshfl [vmem:[#allocation1 + $0x28] sm:$0xff pattern:$0x75316420]  ;;  %1774 = vmatpush.bf16.msrb.mxu3 %v4473_v21  ;;  %v4061_v49 = vor.u32 %v5228_v32, %v4058_v33 }
  0x5e   :  { %1780 = vmatpush.bf16.msra.mxu0 %v3693_v22  ;;  %v5690_v41 = vpack.c.bf16 %v111_v39, %v111_v39  ;;  %v5128_v46 = vld [vmem:[#allocation5 + $0xa4] sm:$0xf]  ;;  %v3658_v47 = vld [vmem:[#allocation5 + $0xb0] sm:$0xf0]  ;;  %v5693_v53 = vpack.c.bf16 %v110_v37, %v110_v37 }
  0x5f   :  { %v5160_v48 = vld [vmem:[#allocation5 + $0x1a4] sm:$0xf]  ;;  %v3786_v50 = vld [vmem:[#allocation5 + $0x1b0] sm:$0xf0]  ;;  %v3661_v56 = vor.u32 %v5128_v46, %v3658_v47 }
  0x60   :  { %1793 = vmatpush.bf16.msra.mxu1 %v3821_v25  ;;  %1806 = vmatpush.bf16.msra.mxu2 %v3949_v26  ;;  %v5192_v51 = vld [vmem:[#allocation5 + $0x2a4] sm:$0xf]  ;;  %v3914_v52 = vld [vmem:[#allocation5 + $0x2b0] sm:$0xf0]  ;;  %v3789_v57 = vor.u32 %v5160_v48, %v3786_v50 }
  0x61   :  { %1819 = vmatpush.bf16.msra.mxu3 %v4077_v30  ;;  %1762 = vmatmul.bf16.vlgmr.msrb.gmra.mxu2 %v5686_v35  ;;  %v5224_v54 = vld [vmem:[#allocation5 + $0x3a4] sm:$0xf]  ;;  %v4042_v55 = vld [vmem:[#allocation5 + $0x3b0] sm:$0xf0]  ;;  %v3917_v58 = vor.u32 %v5192_v51, %v3914_v52 }
  0x62   :  { %1775 = vmatmul.bf16.vlgmr.msrb.gmra.mxu3 %v5688_v38  ;;  %1781 = vmatpush.bf16.msra.mxu0 %v3677_v40  ;;  %v5124_v59 = vld [vmem:[#allocation5 + $0x84] sm:$0xf]  ;;  %v3642_v60 = vld [vmem:[#allocation5 + $0x90] sm:$0xf0]  ;;  %v4045_v62 = vor.u32 %v5224_v54, %v4042_v55 }
  0x63   :  { %1749 = vmatmul.bf16.vlgmr.msrb.gmra.mxu1 %v5690_v41  ;;  %v5156_v61 = vld [vmem:[#allocation5 + $0x184] sm:$0xf]  ;;  %1736 = vmatmul.bf16.vlgmr.msrb.gmra.mxu0 %v5693_v53  ;;  %v3770_v63 = vld [vmem:[#allocation5 + $0x190] sm:$0xf0]  ;;  %v3645_v4 = vor.u32 %v5124_v59, %v3642_v60 }
  0x64   :  { %1794 = vmatpush.bf16.msra.mxu1 %v3805_v44  ;;  %1807 = vmatpush.bf16.msra.mxu2 %v3933_v45  ;;  %v5188_v0 = vld [vmem:[#allocation5 + $0x284] sm:$0xf]  ;;  %v3898_v1 = vld [vmem:[#allocation5 + $0x290] sm:$0xf0]  ;;  %v3773_v5 = vor.u32 %v5156_v61, %v3770_v63 }
  0x65   :  { %1820 = vmatpush.bf16.msra.mxu3 %v4061_v49  ;;  %v5220_v2 = vld [vmem:[#allocation5 + $0x384] sm:$0xf]  ;;  %v4026_v3 = vld [vmem:[#allocation5 + $0x390] sm:$0xf0]  ;;  %v3901_v6 = vor.u32 %v5188_v0, %v3898_v1 }
  0x66   :  { %1782 = vmatpush.bf16.msra.mxu0 %v3661_v56  ;;  %v5120_v7 = vld [vmem:[#allocation5 + $0x64] sm:$0xf]  ;;  %v3626_v8 = vld [vmem:[#allocation5 + $0x70] sm:$0xf0]  ;;  %v4029_v10 = vor.u32 %v5220_v2, %v4026_v3 }
  0x67   :  { %v5152_v9 = vld [vmem:[#allocation5 + $0x164] sm:$0xf]  ;;  %v3754_v11 = vld [vmem:[#allocation5 + $0x170] sm:$0xf0]  ;;  %v3629_v16 = vor.u32 %v5120_v7, %v3626_v8 }
  0x68   :  { %1795 = vmatpush.bf16.msra.mxu1 %v3789_v57  ;;  %1808 = vmatpush.bf16.msra.mxu2 %v3917_v58  ;;  %v5184_v12 = vld [vmem:[#allocation5 + $0x264] sm:$0xf]  ;;  %v3882_v13 = vld [vmem:[#allocation5 + $0x270] sm:$0xf0]  ;;  %v3757_v17 = vor.u32 %v5152_v9, %v3754_v11 }
  0x69   :  { %1821 = vmatpush.bf16.msra.mxu3 %v4045_v62  ;;  %v5216_v14 = vld [vmem:[#allocation5 + $0x364] sm:$0xf]  ;;  %v4010_v15 = vld [vmem:[#allocation5 + $0x370] sm:$0xf0]  ;;  %v3885_v18 = vor.u32 %v5184_v12, %v3882_v13 }
  0x6a   :  { %1783 = vmatpush.bf16.msra.mxu0 %v3645_v4  ;;  %v5116_v19 = vld [vmem:[#allocation5 + $0x44] sm:$0xf]  ;;  %v3610_v20 = vld [vmem:[#allocation5 + $0x50] sm:$0xf0]  ;;  %v4013_v22 = vor.u32 %v5216_v14, %v4010_v15 }
  0x6b   :  { %v5148_v21 = vld [vmem:[#allocation5 + $0x144] sm:$0xf]  ;;  %v3738_v23 = vld [vmem:[#allocation5 + $0x150] sm:$0xf0]  ;;  %v3613_v28 = vor.u32 %v5116_v19, %v3610_v20 }
  0x6c   :  { %1796 = vmatpush.bf16.msra.mxu1 %v3773_v5  ;;  %1809 = vmatpush.bf16.msra.mxu2 %v3901_v6  ;;  %v5180_v24 = vld [vmem:[#allocation5 + $0x244] sm:$0xf]  ;;  %v3866_v25 = vld [vmem:[#allocation5 + $0x250] sm:$0xf0]  ;;  %v3741_v29 = vor.u32 %v5148_v21, %v3738_v23 }
  0x6d   :  { %1822 = vmatpush.bf16.msra.mxu3 %v4029_v10  ;;  %v5212_v26 = vld [vmem:[#allocation5 + $0x344] sm:$0xf]  ;;  %v3994_v27 = vld [vmem:[#allocation5 + $0x350] sm:$0xf0]  ;;  %v3869_v30 = vor.u32 %v5180_v24, %v3866_v25 }
  0x6e   :  { %1784 = vmatpush.bf16.msra.mxu0 %v3629_v16  ;;  %v5112_v31 = vld [vmem:[#allocation5 + $0x24] sm:$0xf]  ;;  %v3594_v32 = vld [vmem:[#allocation5 + $0x30] sm:$0xf0]  ;;  %v3997_v37 = vor.u32 %v5212_v26, %v3994_v27 }
  0x6f   :  { %v5144_v33 = vld [vmem:[#allocation5 + $0x124] sm:$0xf]  ;;  %v3722_v39 = vld [vmem:[#allocation5 + $0x130] sm:$0xf0]  ;;  %v3597_v47 = vor.u32 %v5112_v31, %v3594_v32 }
  0x70   :  { %1797 = vmatpush.bf16.msra.mxu1 %v3757_v17  ;;  %1810 = vmatpush.bf16.msra.mxu2 %v3885_v18  ;;  %v5176_v40 = vld [vmem:[#allocation5 + $0x224] sm:$0xf]  ;;  %v3850_v44 = vld [vmem:[#allocation5 + $0x230] sm:$0xf0]  ;;  %v3725_v50 = vor.u32 %v5144_v33, %v3722_v39 }
  0x71   :  { %1823 = vmatpush.bf16.msra.mxu3 %v4013_v22  ;;  %v5208_v45 = vld [vmem:[#allocation5 + $0x324] sm:$0xf]  ;;  %v3978_v46 = vld [vmem:[#allocation5 + $0x330] sm:$0xf0]  ;;  %v3853_v51 = vor.u32 %v5176_v40, %v3850_v44 }
  0x72   :  { %1785 = vmatpush.bf16.msra.mxu0 %v3613_v28  ;;  %v5108_v48 = vld [vmem:[#allocation5 + $0x4] sm:$0xf]  ;;  %v3578_v49 = vld [vmem:[#allocation5 + $0x10] sm:$0xf0]  ;;  %v3981_v56 = vor.u32 %v5208_v45, %v3978_v46 }
  0x73   :  { %v5140_v52 = vld [vmem:[#allocation5 + $0x104] sm:$0xf]  ;;  %v3706_v54 = vld [vmem:[#allocation5 + $0x110] sm:$0xf0]  ;;  %v3581_v63 = vor.u32 %v5108_v48, %v3578_v49 }
  0x74   :  { %1798 = vmatpush.bf16.msra.mxu1 %v3741_v29  ;;  %1811 = vmatpush.bf16.msra.mxu2 %v3869_v30  ;;  %v5172_v55 = vld [vmem:[#allocation5 + $0x204] sm:$0xf]  ;;  %v3834_v57 = vld [vmem:[#allocation5 + $0x210] sm:$0xf0]  ;;  %v3709_v3 = vor.u32 %v5140_v52, %v3706_v54 }
  0x75   :  { %1824 = vmatpush.bf16.msra.mxu3 %v3997_v37  ;;  %v5204_v58 = vld [vmem:[#allocation5 + $0x304] sm:$0xf]  ;;  %v3962_v59 = vld [vmem:[#allocation5 + $0x310] sm:$0xf0]  ;;  %v3837_v4 = vor.u32 %v5172_v55, %v3834_v57 }
  0x76   :  { %v5264_v60 = vld [vmem:[#allocation5 + $0x4e4] sm:$0xf]  ;;  %v4202_v61 = vld [vmem:[#allocation5 + $0x4f0] sm:$0xf0]  ;;  %1786 = vmatpush.bf16.msra.mxu0 %v3597_v47  ;;  %v3965_v7 = vor.u32 %v5204_v58, %v3962_v59 }
  0x77   :  { %v5296_v62 = vld [vmem:[#allocation5 + $0x5e4] sm:$0xf]  ;;  %v4330_v0 = vld [vmem:[#allocation5 + $0x5f0] sm:$0xf0]  ;;  %v4205_v8 = vor.u32 %v5264_v60, %v4202_v61 }
  0x78   :  { %v5328_v1 = vld [vmem:[#allocation5 + $0x6e4] sm:$0xf]  ;;  %v4458_v2 = vld [vmem:[#allocation5 + $0x6f0] sm:$0xf0]  ;;  %1799 = vmatpush.bf16.msra.mxu1 %v3725_v50  ;;  %1812 = vmatpush.bf16.msra.mxu2 %v3853_v51  ;;  %v4333_v9 = vor.u32 %v5296_v62, %v4330_v0 }
  0x79   :  { %v5360_v5 = vld [vmem:[#allocation5 + $0x7e4] sm:$0xf]  ;;  %v4586_v6 = vld [vmem:[#allocation5 + $0x7f0] sm:$0xf0]  ;;  %1825 = vmatpush.bf16.msra.mxu3 %v3981_v56  ;;  %v4461_v10 = vor.u32 %v5328_v1, %v4458_v2 }
  0x7a   :  { %v5260_v11 = vld [vmem:[#allocation5 + $0x4c4] sm:$0xf]  ;;  %v4186_v12 = vld [vmem:[#allocation5 + $0x4d0] sm:$0xf0]  ;;  %1787 = vmatpush.bf16.msra.mxu0 %v3581_v63  ;;  %v4589_v14 = vor.u32 %v5360_v5, %v4586_v6 }
  0x7b   :  { %v5292_v13 = vld [vmem:[#allocation5 + $0x5c4] sm:$0xf]  ;;  %v4314_v15 = vld [vmem:[#allocation5 + $0x5d0] sm:$0xf0]  ;;  %v4189_v20 = vor.u32 %v5260_v11, %v4186_v12 }
  0x7c   :  { %v5324_v16 = vld [vmem:[#allocation5 + $0x6c4] sm:$0xf]  ;;  %v4442_v17 = vld [vmem:[#allocation5 + $0x6d0] sm:$0xf0]  ;;  %1800 = vmatpush.bf16.msra.mxu1 %v3709_v3  ;;  %1813 = vmatpush.bf16.msra.mxu2 %v3837_v4  ;;  %v4317_v21 = vor.u32 %v5292_v13, %v4314_v15 }
  0x7d   :  { %v5356_v18 = vld [vmem:[#allocation5 + $0x7c4] sm:$0xf]  ;;  %v4570_v19 = vld [vmem:[#allocation5 + $0x7d0] sm:$0xf0]  ;;  %1826 = vmatpush.bf16.msra.mxu3 %v3965_v7  ;;  %v4445_v22 = vor.u32 %v5324_v16, %v4442_v17  ;;  %1788 = vmatmul.bf16.vlgmr.msra.gmra.mxu0 %v5672_v42 }
  0x7e   :  { %1832 = vmatpush.bf16.msrb.mxu0 %v4205_v8  ;;  %v5256_v23 = vld [vmem:[#allocation5 + $0x4a4] sm:$0xf]  ;;  %v4170_v24 = vld [vmem:[#allocation5 + $0x4b0] sm:$0xf0]  ;;  %v4573_v26 = vor.u32 %v5356_v18, %v4570_v19 }
  0x7f   :  { %v5288_v25 = vld [vmem:[#allocation5 + $0x5a4] sm:$0xf]  ;;  %v4298_v27 = vld [vmem:[#allocation5 + $0x5b0] sm:$0xf0]  ;;  %1814 = vmatmul.bf16.vlgmr.msra.gmra.mxu2 %v5668_v34  ;;  %v4173_v32 = vor.u32 %v5256_v23, %v4170_v24  ;;  %1801 = vmatmul.bf16.vlgmr.msra.gmra.mxu1 %v5674_v43 }
  0x80   :  { %1845 = vmatpush.bf16.msrb.mxu1 %v4333_v9  ;;  %1858 = vmatpush.bf16.msrb.mxu2 %v4461_v10  ;;  %v5320_v28 = vld [vmem:[#allocation5 + $0x6a4] sm:$0xf]  ;;  %v4426_v29 = vld [vmem:[#allocation5 + $0x6b0] sm:$0xf0]  ;;  %v4301_v39 = vor.u32 %v5288_v25, %v4298_v27 }
  0x81   :  { %1871 = vmatpush.bf16.msrb.mxu3 %v4589_v14  ;;  %v5352_v30 = vld [vmem:[#allocation5 + $0x7a4] sm:$0xf]  ;;  %v4554_v31 = vld [vmem:[#allocation5 + $0x7b0] sm:$0xf0]  ;;  %v4429_v40 = vor.u32 %v5320_v28, %v4426_v29 }
  0x82   :  { %1827 = vmatmul.bf16.vlgmr.msra.gmra.mxu3 %v5670_v36  ;;  %1833 = vmatpush.bf16.msrb.mxu0 %v4189_v20  ;;  %v5252_v33 = vld [vmem:[#allocation5 + $0x484] sm:$0xf]  ;;  %v4154_v37 = vld [vmem:[#allocation5 + $0x490] sm:$0xf0]  ;;  %v4557_v47 = vor.u32 %v5352_v30, %v4554_v31 }
  0x83   :  { %v5284_v44 = vld [vmem:[#allocation5 + $0x584] sm:$0xf]  ;;  %v4282_v45 = vld [vmem:[#allocation5 + $0x590] sm:$0xf0]  ;;  %v4157_v51 = vor.u32 %v5252_v33, %v4154_v37 }
  0x84   :  { %1846 = vmatpush.bf16.msrb.mxu1 %v4317_v21  ;;  %1859 = vmatpush.bf16.msrb.mxu2 %v4445_v22  ;;  %v5316_v46 = vld [vmem:[#allocation5 + $0x684] sm:$0xf]  ;;  %v4410_v48 = vld [vmem:[#allocation5 + $0x690] sm:$0xf0]  ;;  %v4285_v52 = vor.u32 %v5284_v44, %v4282_v45  ;;  %v5139_v44 = vld [vmem:[#allocation5 + $0xf4] sm:$0xf0] }
  0x85   :  { %1872 = vmatpush.bf16.msrb.mxu3 %v4573_v26  ;;  %v5348_v49 = vld [vmem:[#allocation5 + $0x784] sm:$0xf]  ;;  %v4538_v50 = vld [vmem:[#allocation5 + $0x790] sm:$0xf0]  ;;  %v4413_v54 = vor.u32 %v5316_v46, %v4410_v48  ;;  %v3824_v45 = vld [vmem:[#allocation5 + $0x1e8] sm:$0xf] }
  0x86   :  { %1834 = vmatpush.bf16.msrb.mxu0 %v4173_v32  ;;  %v5248_v55 = vld [vmem:[#allocation5 + $0x464] sm:$0xf]  ;;  %v4138_v56 = vld [vmem:[#allocation5 + $0x470] sm:$0xf0]  ;;  %v4541_v58 = vor.u32 %v5348_v49, %v4538_v50  ;;  %v3952_v48 = vld [vmem:[#allocation5 + $0x2e8] sm:$0xf] }
  0x87   :  { %v5280_v57 = vld [vmem:[#allocation5 + $0x564] sm:$0xf]  ;;  %v4266_v59 = vld [vmem:[#allocation5 + $0x570] sm:$0xf0]  ;;  %v4141_v0 = vor.u32 %v5248_v55, %v4138_v56  ;;  %v5203_v49 = vld [vmem:[#allocation5 + $0x2f4] sm:$0xf0] }
  0x88   :  { %1847 = vmatpush.bf16.msrb.mxu1 %v4301_v39  ;;  %1860 = vmatpush.bf16.msrb.mxu2 %v4429_v40  ;;  %v5312_v60 = vld [vmem:[#allocation5 + $0x664] sm:$0xf]  ;;  %v4394_v61 = vld [vmem:[#allocation5 + $0x670] sm:$0xf0]  ;;  %v4269_v1 = vor.u32 %v5280_v57, %v4266_v59  ;;  %v3696_v40 = vld [vmem:[#allocation5 + $0xe8] sm:$0xf] }
  0x89   :  { %1873 = vmatpush.bf16.msrb.mxu3 %v4557_v47  ;;  %v5344_v62 = vld [vmem:[#allocation5 + $0x764] sm:$0xf]  ;;  %v4522_v63 = vld [vmem:[#allocation5 + $0x770] sm:$0xf0]  ;;  %v4397_v2 = vor.u32 %v5312_v60, %v4394_v61  ;;  %v5171_v47 = vld [vmem:[#allocation5 + $0x1f4] sm:$0xf0]  ;;  %v3697_v56 = vor.u32 %v5139_v44, %v3696_v40 }
  0x8a   :  { %1835 = vmatpush.bf16.msrb.mxu0 %v4157_v51  ;;  %v5244_v3 = vld [vmem:[#allocation5 + $0x444] sm:$0xf]  ;;  %v4122_v4 = vld [vmem:[#allocation5 + $0x450] sm:$0xf0]  ;;  %v4525_v6 = vor.u32 %v5344_v62, %v4522_v63  ;;  %v3825_v57 = vor.u32 %v5171_v47, %v3824_v45  ;;  %v3680_v59 = vld [vmem:[#allocation5 + $0xc8] sm:$0xf] }
  0x8b   :  { %v5276_v5 = vld [vmem:[#allocation5 + $0x544] sm:$0xf]  ;;  %v4250_v7 = vld [vmem:[#allocation5 + $0x550] sm:$0xf0]  ;;  %v4125_v12 = vor.u32 %v5244_v3, %v4122_v4  ;;  %v5135_v60 = vld [vmem:[#allocation5 + $0xd4] sm:$0xf0] }
  0x8c   :  { %1848 = vmatpush.bf16.msrb.mxu1 %v4285_v52  ;;  %1861 = vmatpush.bf16.msrb.mxu2 %v4413_v54  ;;  %v5308_v8 = vld [vmem:[#allocation5 + $0x644] sm:$0xf]  ;;  %v4378_v9 = vld [vmem:[#allocation5 + $0x650] sm:$0xf0]  ;;  %v4253_v13 = vor.u32 %v5276_v5, %v4250_v7  ;;  %v4080_v52 = vld [vmem:[#allocation5 + $0x3e8] sm:$0xf]  ;;  %v3681_v4 = vor.u32 %v5135_v60, %v3680_v59 }
  0x8d   :  { %1874 = vmatpush.bf16.msrb.mxu3 %v4541_v58  ;;  %v5340_v10 = vld [vmem:[#allocation5 + $0x744] sm:$0xf]  ;;  %v4506_v11 = vld [vmem:[#allocation5 + $0x750] sm:$0xf0]  ;;  %v4381_v14 = vor.u32 %v5308_v8, %v4378_v9  ;;  %v5235_v54 = vld [vmem:[#allocation5 + $0x3f4] sm:$0xf0]  ;;  %v3953_v58 = vor.u32 %v5203_v49, %v3952_v48 }
  0x8e   :  { %1836 = vmatpush.bf16.msrb.mxu0 %v4141_v0  ;;  %v5240_v15 = vld [vmem:[#allocation5 + $0x424] sm:$0xf]  ;;  %v4106_v16 = vld [vmem:[#allocation5 + $0x430] sm:$0xf0]  ;;  %v4509_v18 = vor.u32 %v5340_v10, %v4506_v11  ;;  %v3808_v61 = vld [vmem:[#allocation5 + $0x1c8] sm:$0xf]  ;;  %v4081_v62 = vor.u32 %v5235_v54, %v4080_v52 }
  0x8f   :  { %v5272_v17 = vld [vmem:[#allocation5 + $0x524] sm:$0xf]  ;;  %v4234_v19 = vld [vmem:[#allocation5 + $0x530] sm:$0xf0]  ;;  %v4109_v24 = vor.u32 %v5240_v15, %v4106_v16  ;;  %v5167_v63 = vld [vmem:[#allocation5 + $0x1d4] sm:$0xf0] }
  0x90   :  { %1849 = vmatpush.bf16.msrb.mxu1 %v4269_v1  ;;  %1862 = vmatpush.bf16.msrb.mxu2 %v4397_v2  ;;  %v5304_v20 = vld [vmem:[#allocation5 + $0x624] sm:$0xf]  ;;  %v4362_v21 = vld [vmem:[#allocation5 + $0x630] sm:$0xf0]  ;;  %v4237_v27 = vor.u32 %v5272_v17, %v4234_v19  ;;  %v3936_v0 = vld [vmem:[#allocation5 + $0x2c8] sm:$0xf]  ;;  %v3809_v5 = vor.u32 %v5167_v63, %v3808_v61 }
  0x91   :  { %1875 = vmatpush.bf16.msrb.mxu3 %v4525_v6  ;;  %v5336_v22 = vld [vmem:[#allocation5 + $0x724] sm:$0xf]  ;;  %v4490_v23 = vld [vmem:[#allocation5 + $0x730] sm:$0xf0]  ;;  %v4365_v28 = vor.u32 %v5304_v20, %v4362_v21  ;;  %v5199_v1 = vld [vmem:[#allocation5 + $0x2d4] sm:$0xf0] }
  0x92   :  { %1837 = vmatpush.bf16.msrb.mxu0 %v4125_v12  ;;  %v5236_v25 = vld [vmem:[#allocation5 + $0x404] sm:$0xf]  ;;  %v4090_v26 = vld [vmem:[#allocation5 + $0x410] sm:$0xf0]  ;;  %v4493_v32 = vor.u32 %v5336_v22, %v4490_v23  ;;  %v4064_v2 = vld [vmem:[#allocation5 + $0x3c8] sm:$0xf]  ;;  %v3937_v6 = vor.u32 %v5199_v1, %v3936_v0 }
  0x93   :  { %v5268_v29 = vld [vmem:[#allocation5 + $0x504] sm:$0xf]  ;;  %v4218_v30 = vld [vmem:[#allocation5 + $0x510] sm:$0xf0]  ;;  %v4093_v46 = vor.u32 %v5236_v25, %v4090_v26  ;;  %v5231_v3 = vld [vmem:[#allocation5 + $0x3d4] sm:$0xf0] }
  0x94   :  { %1850 = vmatpush.bf16.msrb.mxu1 %v4253_v13  ;;  %1863 = vmatpush.bf16.msrb.mxu2 %v4381_v14  ;;  %v5300_v31 = vld [vmem:[#allocation5 + $0x604] sm:$0xf]  ;;  %v4346_v33 = vld [vmem:[#allocation5 + $0x610] sm:$0xf0]  ;;  %v4221_v50 = vor.u32 %v5268_v29, %v4218_v30  ;;  %v3664_v7 = vld [vmem:[#allocation5 + $0xa8] sm:$0xf]  ;;  %v4065_v10 = vor.u32 %v5231_v3, %v4064_v2 }
  0x95   :  { %1876 = vmatpush.bf16.msrb.mxu3 %v4509_v18  ;;  %v5332_v37 = vld [vmem:[#allocation5 + $0x704] sm:$0xf]  ;;  %v4474_v39 = vld [vmem:[#allocation5 + $0x710] sm:$0xf0]  ;;  %v4349_v51 = vor.u32 %v5300_v31, %v4346_v33  ;;  %v5131_v8 = vld [vmem:[#allocation5 + $0xb4] sm:$0xf0] }
  0x96   :  { %1838 = vmatpush.bf16.msrb.mxu0 %v4109_v24  ;;  %v4477_v55 = vor.u32 %v5332_v37, %v4474_v39  ;;  %v3792_v9 = vld [vmem:[#allocation5 + $0x1a8] sm:$0xf]  ;;  %v5163_v11 = vld [vmem:[#allocation5 + $0x1b4] sm:$0xf0]  ;;  %v3665_v16 = vor.u32 %v5131_v8, %v3664_v7 }
  0x97   :  { %v3920_v12 = vld [vmem:[#allocation5 + $0x2a8] sm:$0xf]  ;;  %v5195_v13 = vld [vmem:[#allocation5 + $0x2b4] sm:$0xf0]  ;;  %v3793_v17 = vor.u32 %v5163_v11, %v3792_v9 }
  0x98   :  { %1851 = vmatpush.bf16.msrb.mxu1 %v4237_v27  ;;  %1864 = vmatpush.bf16.msrb.mxu2 %v4365_v28  ;;  %v4048_v14 = vld [vmem:[#allocation5 + $0x3a8] sm:$0xf]  ;;  %v5227_v15 = vld [vmem:[#allocation5 + $0x3b4] sm:$0xf0]  ;;  %v3921_v18 = vor.u32 %v5195_v13, %v3920_v12 }
  0x99   :  { %1877 = vmatpush.bf16.msrb.mxu3 %v4493_v32  ;;  %v3648_v19 = vld [vmem:[#allocation5 + $0x88] sm:$0xf]  ;;  %v5127_v20 = vld [vmem:[#allocation5 + $0x94] sm:$0xf0]  ;;  %v4049_v22 = vor.u32 %v5227_v15, %v4048_v14 }
  0x9a   :  { %1839 = vmatpush.bf16.msrb.mxu0 %v4093_v46  ;;  %v3776_v21 = vld [vmem:[#allocation5 + $0x188] sm:$0xf]  ;;  %v5159_v23 = vld [vmem:[#allocation5 + $0x194] sm:$0xf0]  ;;  %v3649_v28 = vor.u32 %v5127_v20, %v3648_v19 }
  0x9b   :  { %v3904_v24 = vld [vmem:[#allocation5 + $0x288] sm:$0xf]  ;;  %v5191_v25 = vld [vmem:[#allocation5 + $0x294] sm:$0xf0]  ;;  %v3777_v29 = vor.u32 %v5159_v23, %v3776_v21 }
  0x9c   :  { %1852 = vmatpush.bf16.msrb.mxu1 %v4221_v50  ;;  %1865 = vmatpush.bf16.msrb.mxu2 %v4349_v51  ;;  %v4032_v26 = vld [vmem:[#allocation5 + $0x388] sm:$0xf]  ;;  %v5223_v27 = vld [vmem:[#allocation5 + $0x394] sm:$0xf0]  ;;  %v3905_v30 = vor.u32 %v5191_v25, %v3904_v24 }
  0x9d   :  { %1878 = vmatpush.bf16.msrb.mxu3 %v4477_v55  ;;  %1840 = vmatmul.bf16.vlgmr.msrb.gmra.mxu0 %v5693_v53  ;;  %v3632_v31 = vld [vmem:[#allocation5 + $0x68] sm:$0xf]  ;;  %v5123_v32 = vld [vmem:[#allocation5 + $0x74] sm:$0xf0]  ;;  %v4033_v37 = vor.u32 %v5223_v27, %v4032_v26 }
  0x9e   :  { %1884 = vmatpush.bf16.msra.mxu0 %v3697_v56  ;;  %v3760_v33 = vld [vmem:[#allocation5 + $0x168] sm:$0xf]  ;;  %v5155_v39 = vld [vmem:[#allocation5 + $0x174] sm:$0xf0]  ;;  %v3633_v47 = vor.u32 %v5123_v32, %v3632_v31 }
  0x9f   :  { %1866 = vmatmul.bf16.vlgmr.msrb.gmra.mxu2 %v5686_v35  ;;  %1853 = vmatmul.bf16.vlgmr.msrb.gmra.mxu1 %v5690_v41  ;;  %v3888_v40 = vld [vmem:[#allocation5 + $0x268] sm:$0xf]  ;;  %v5187_v44 = vld [vmem:[#allocation5 + $0x274] sm:$0xf0]  ;;  %v3761_v48 = vor.u32 %v5155_v39, %v3760_v33 }
  0xa0   :  { %1897 = vmatpush.bf16.msra.mxu1 %v3825_v57  ;;  %1910 = vmatpush.bf16.msra.mxu2 %v3953_v58  ;;  %v4016_v45 = vld [vmem:[#allocation5 + $0x368] sm:$0xf]  ;;  %v5219_v46 = vld [vmem:[#allocation5 + $0x374] sm:$0xf0]  ;;  %v3889_v49 = vor.u32 %v5187_v44, %v3888_v40 }
  0xa1   :  { %1923 = vmatpush.bf16.msra.mxu3 %v4081_v62  ;;  %v3616_v50 = vld [vmem:[#allocation5 + $0x48] sm:$0xf]  ;;  %v5119_v51 = vld [vmem:[#allocation5 + $0x54] sm:$0xf0]  ;;  %v4017_v54 = vor.u32 %v5219_v46, %v4016_v45 }
  0xa2   :  { %1879 = vmatmul.bf16.vlgmr.msrb.gmra.mxu3 %v5688_v38  ;;  %1885 = vmatpush.bf16.msra.mxu0 %v3681_v4  ;;  %v3744_v52 = vld [vmem:[#allocation5 + $0x148] sm:$0xf]  ;;  %v5151_v55 = vld [vmem:[#allocation5 + $0x154] sm:$0xf0]  ;;  %v3617_v60 = vor.u32 %v5119_v51, %v3616_v50 }
  0xa3   :  { %v3872_v56 = vld [vmem:[#allocation5 + $0x248] sm:$0xf]  ;;  %v5183_v57 = vld [vmem:[#allocation5 + $0x254] sm:$0xf0]  ;;  %v3745_v61 = vor.u32 %v5151_v55, %v3744_v52 }
  0xa4   :  { %1898 = vmatpush.bf16.msra.mxu1 %v3809_v5  ;;  %1911 = vmatpush.bf16.msra.mxu2 %v3937_v6  ;;  %v4000_v58 = vld [vmem:[#allocation5 + $0x348] sm:$0xf]  ;;  %v5215_v59 = vld [vmem:[#allocation5 + $0x354] sm:$0xf0]  ;;  %v3873_v62 = vor.u32 %v5183_v57, %v3872_v56 }
  0xa5   :  { %1924 = vmatpush.bf16.msra.mxu3 %v4065_v10  ;;  %v3600_v63 = vld [vmem:[#allocation5 + $0x28] sm:$0xf]  ;;  %v5115_v0 = vld [vmem:[#allocation5 + $0x34] sm:$0xf0]  ;;  %v4001_v2 = vor.u32 %v5215_v59, %v4000_v58 }
  0xa6   :  { %1886 = vmatpush.bf16.msra.mxu0 %v3665_v16  ;;  %v3728_v1 = vld [vmem:[#allocation5 + $0x128] sm:$0xf]  ;;  %v5147_v3 = vld [vmem:[#allocation5 + $0x134] sm:$0xf0]  ;;  %v3601_v8 = vor.u32 %v5115_v0, %v3600_v63 }
  0xa7   :  { %v3856_v4 = vld [vmem:[#allocation5 + $0x228] sm:$0xf]  ;;  %v5179_v5 = vld [vmem:[#allocation5 + $0x234] sm:$0xf0]  ;;  %v3729_v11 = vor.u32 %v5147_v3, %v3728_v1 }
  0xa8   :  { %1899 = vmatpush.bf16.msra.mxu1 %v3793_v17  ;;  %1912 = vmatpush.bf16.msra.mxu2 %v3921_v18  ;;  %v3984_v6 = vld [vmem:[#allocation5 + $0x328] sm:$0xf]  ;;  %v5211_v7 = vld [vmem:[#allocation5 + $0x334] sm:$0xf0]  ;;  %v3857_v12 = vor.u32 %v5179_v5, %v3856_v4 }
  0xa9   :  { %1925 = vmatpush.bf16.msra.mxu3 %v4049_v22  ;;  %v3584_v9 = vld [vmem:[#allocation5 + $0x8] sm:$0xf]  ;;  %v5111_v10 = vld [vmem:[#allocation5 + $0x14] sm:$0xf0]  ;;  %v3985_v16 = vor.u32 %v5211_v7, %v3984_v6 }
  0xaa   :  { %1887 = vmatpush.bf16.msra.mxu0 %v3649_v28  ;;  %v3712_v13 = vld [vmem:[#allocation5 + $0x108] sm:$0xf]  ;;  %v5143_v14 = vld [vmem:[#allocation5 + $0x114] sm:$0xf0]  ;;  %v3585_v23 = vor.u32 %v5111_v10, %v3584_v9 }
  0xab   :  { %v3840_v15 = vld [vmem:[#allocation5 + $0x208] sm:$0xf]  ;;  %v5175_v17 = vld [vmem:[#allocation5 + $0x214] sm:$0xf0]  ;;  %v3713_v27 = vor.u32 %v5143_v14, %v3712_v13 }
  0xac   :  { %1900 = vmatpush.bf16.msra.mxu1 %v3777_v29  ;;  %1913 = vmatpush.bf16.msra.mxu2 %v3905_v30  ;;  %v3968_v18 = vld [vmem:[#allocation5 + $0x308] sm:$0xf]  ;;  %v5207_v19 = vld [vmem:[#allocation5 + $0x314] sm:$0xf0]  ;;  %v3841_v28 = vor.u32 %v5175_v17, %v3840_v15 }
  0xad   :  { %1926 = vmatpush.bf16.msra.mxu3 %v4033_v37  ;;  %v4208_v20 = vld [vmem:[#allocation5 + $0x4e8] sm:$0xf]  ;;  %v5267_v21 = vld [vmem:[#allocation5 + $0x4f4] sm:$0xf0]  ;;  %v3969_v31 = vor.u32 %v5207_v19, %v3968_v18 }
  0xae   :  { %1888 = vmatpush.bf16.msra.mxu0 %v3633_v47  ;;  %v4336_v22 = vld [vmem:[#allocation5 + $0x5e8] sm:$0xf]  ;;  %v5299_v24 = vld [vmem:[#allocation5 + $0x5f4] sm:$0xf0]  ;;  %v4209_v32 = vor.u32 %v5267_v21, %v4208_v20 }
  0xaf   :  { %v4464_v25 = vld [vmem:[#allocation5 + $0x6e8] sm:$0xf]  ;;  %v5331_v26 = vld [vmem:[#allocation5 + $0x6f4] sm:$0xf0]  ;;  %v4337_v33 = vor.u32 %v5299_v24, %v4336_v22 }
  0xb0   :  { %1901 = vmatpush.bf16.msra.mxu1 %v3761_v48  ;;  %1914 = vmatpush.bf16.msra.mxu2 %v3889_v49  ;;  %v4592_v29 = vld [vmem:[#allocation5 + $0x7e8] sm:$0xf]  ;;  %v5363_v30 = vld [vmem:[#allocation5 + $0x7f4] sm:$0xf0]  ;;  %v4465_v37 = vor.u32 %v5331_v26, %v4464_v25 }
  0xb1   :  { %1927 = vmatpush.bf16.msra.mxu3 %v4017_v54  ;;  %v4192_v39 = vld [vmem:[#allocation5 + $0x4c8] sm:$0xf]  ;;  %v5263_v40 = vld [vmem:[#allocation5 + $0x4d4] sm:$0xf0]  ;;  %v4593_v45 = vor.u32 %v5363_v30, %v4592_v29 }
  0xb2   :  { %1889 = vmatpush.bf16.msra.mxu0 %v3617_v60  ;;  %v4320_v44 = vld [vmem:[#allocation5 + $0x5c8] sm:$0xf]  ;;  %v5295_v46 = vld [vmem:[#allocation5 + $0x5d4] sm:$0xf0]  ;;  %v4193_v51 = vor.u32 %v5263_v40, %v4192_v39 }
  0xb3   :  { %v4448_v47 = vld [vmem:[#allocation5 + $0x6c8] sm:$0xf]  ;;  %v5327_v48 = vld [vmem:[#allocation5 + $0x6d4] sm:$0xf0]  ;;  %v4321_v52 = vor.u32 %v5295_v46, %v4320_v44 }
  0xb4   :  { %1902 = vmatpush.bf16.msra.mxu1 %v3745_v61  ;;  %1915 = vmatpush.bf16.msra.mxu2 %v3873_v62  ;;  %v4576_v49 = vld [vmem:[#allocation5 + $0x7c8] sm:$0xf]  ;;  %v5359_v50 = vld [vmem:[#allocation5 + $0x7d4] sm:$0xf0]  ;;  %v4449_v54 = vor.u32 %v5327_v48, %v4448_v47 }
  0xb5   :  { %1928 = vmatpush.bf16.msra.mxu3 %v4001_v2  ;;  %v4176_v55 = vld [vmem:[#allocation5 + $0x4a8] sm:$0xf]  ;;  %v5259_v56 = vld [vmem:[#allocation5 + $0x4b4] sm:$0xf0]  ;;  %v4577_v58 = vor.u32 %v5359_v50, %v4576_v49 }
  0xb6   :  { %1890 = vmatpush.bf16.msra.mxu0 %v3601_v8  ;;  %v4304_v57 = vld [vmem:[#allocation5 + $0x5a8] sm:$0xf]  ;;  %v5291_v59 = vld [vmem:[#allocation5 + $0x5b4] sm:$0xf0]  ;;  %v4177_v0 = vor.u32 %v5259_v56, %v4176_v55 }
  0xb7   :  { %v4432_v60 = vld [vmem:[#allocation5 + $0x6a8] sm:$0xf]  ;;  %v5323_v61 = vld [vmem:[#allocation5 + $0x6b4] sm:$0xf0]  ;;  %v4305_v1 = vor.u32 %v5291_v59, %v4304_v57 }
  0xb8   :  { %1903 = vmatpush.bf16.msra.mxu1 %v3729_v11  ;;  %1916 = vmatpush.bf16.msra.mxu2 %v3857_v12  ;;  %v4560_v62 = vld [vmem:[#allocation5 + $0x7a8] sm:$0xf]  ;;  %v5355_v63 = vld [vmem:[#allocation5 + $0x7b4] sm:$0xf0]  ;;  %v4433_v2 = vor.u32 %v5323_v61, %v4432_v60 }
  0xb9   :  { %1929 = vmatpush.bf16.msra.mxu3 %v3985_v16  ;;  %v4160_v3 = vld [vmem:[#allocation5 + $0x488] sm:$0xf]  ;;  %v5255_v4 = vld [vmem:[#allocation5 + $0x494] sm:$0xf0]  ;;  %v4561_v6 = vor.u32 %v5355_v63, %v4560_v62 }
  0xba   :  { %1891 = vmatpush.bf16.msra.mxu0 %v3585_v23  ;;  %v4288_v5 = vld [vmem:[#allocation5 + $0x588] sm:$0xf]  ;;  %v5287_v7 = vld [vmem:[#allocation5 + $0x594] sm:$0xf0]  ;;  %v4161_v12 = vor.u32 %v5255_v4, %v4160_v3 }
  0xbb   :  { %v4416_v8 = vld [vmem:[#allocation5 + $0x688] sm:$0xf]  ;;  %v5319_v9 = vld [vmem:[#allocation5 + $0x694] sm:$0xf0]  ;;  %v4289_v13 = vor.u32 %v5287_v7, %v4288_v5  ;;  %v5137_v7 = vld [vmem:[#allocation5 + $0xec] sm:$0xf] }
  0xbc   :  { %1904 = vmatpush.bf16.msra.mxu1 %v3713_v27  ;;  %1917 = vmatpush.bf16.msra.mxu2 %v3841_v28  ;;  %v4544_v10 = vld [vmem:[#allocation5 + $0x788] sm:$0xf]  ;;  %v5351_v11 = vld [vmem:[#allocation5 + $0x794] sm:$0xf0]  ;;  %v4417_v14 = vor.u32 %v5319_v9, %v4416_v8  ;;  %v3698_v8 = vld [vmem:[#allocation5 + $0xf8] sm:$0xf0] }
  0xbd   :  { %1930 = vmatpush.bf16.msra.mxu3 %v3969_v31  ;;  %1892 = vmatmul.bf16.vlgmr.msra.gmra.mxu0 %v5672_v42  ;;  %v4144_v15 = vld [vmem:[#allocation5 + $0x468] sm:$0xf]  ;;  %v5251_v16 = vld [vmem:[#allocation5 + $0x474] sm:$0xf0]  ;;  %v4545_v18 = vor.u32 %v5351_v11, %v4544_v10  ;;  %v5169_v9 = vld [vmem:[#allocation5 + $0x1ec] sm:$0xf] }
  0xbe   :  { %1936 = vmatpush.bf16.msrb.mxu0 %v4209_v32  ;;  %v4272_v17 = vld [vmem:[#allocation5 + $0x568] sm:$0xf]  ;;  %v5283_v19 = vld [vmem:[#allocation5 + $0x574] sm:$0xf0]  ;;  %v4145_v24 = vor.u32 %v5251_v16, %v4144_v15 }
  0xbf   :  { %1918 = vmatmul.bf16.vlgmr.msra.gmra.mxu2 %v5668_v34  ;;  %1905 = vmatmul.bf16.vlgmr.msra.gmra.mxu1 %v5674_v43  ;;  %v4400_v20 = vld [vmem:[#allocation5 + $0x668] sm:$0xf]  ;;  %v5315_v21 = vld [vmem:[#allocation5 + $0x674] sm:$0xf0]  ;;  %v4273_v25 = vor.u32 %v5283_v19, %v4272_v17  ;;  %v4082_v19 = vld [vmem:[#allocation5 + $0x3f8] sm:$0xf0] }
  0xc0   :  { %1949 = vmatpush.bf16.msrb.mxu1 %v4337_v33  ;;  %1962 = vmatpush.bf16.msrb.mxu2 %v4465_v37  ;;  %v4528_v22 = vld [vmem:[#allocation5 + $0x768] sm:$0xf]  ;;  %v5347_v23 = vld [vmem:[#allocation5 + $0x774] sm:$0xf0]  ;;  %v4401_v26 = vor.u32 %v5315_v21, %v4400_v20  ;;  %v3701_v21 = vor.u32 %v5137_v7, %v3698_v8  ;;  %v5189_v7 = vld [vmem:[#allocation5 + $0x28c] sm:$0xf] }
  0xc1   :  { %1975 = vmatpush.bf16.msrb.mxu3 %v4593_v45  ;;  %v4128_v27 = vld [vmem:[#allocation5 + $0x448] sm:$0xf]  ;;  %v5247_v28 = vld [vmem:[#allocation5 + $0x454] sm:$0xf0]  ;;  %v4529_v30 = vor.u32 %v5347_v23, %v4528_v22  ;;  %v3906_v8 = vld [vmem:[#allocation5 + $0x298] sm:$0xf0] }
  0xc2   :  { %1931 = vmatmul.bf16.vlgmr.msra.gmra.mxu3 %v5670_v36  ;;  %1937 = vmatpush.bf16.msrb.mxu0 %v4193_v51  ;;  %v4256_v29 = vld [vmem:[#allocation5 + $0x548] sm:$0xf]  ;;  %v5279_v31 = vld [vmem:[#allocation5 + $0x554] sm:$0xf0]  ;;  %v4129_v40 = vor.u32 %v5247_v28, %v4128_v27  ;;  %v5133_v27 = vld [vmem:[#allocation5 + $0xcc] sm:$0xf] }
  0xc3   :  { %v4384_v32 = vld [vmem:[#allocation5 + $0x648] sm:$0xf]  ;;  %v5311_v33 = vld [vmem:[#allocation5 + $0x654] sm:$0xf0]  ;;  %v4257_v45 = vor.u32 %v5279_v31, %v4256_v29  ;;  %v3682_v28 = vld [vmem:[#allocation5 + $0xd8] sm:$0xf0] }
  0xc4   :  { %1950 = vmatpush.bf16.msrb.mxu1 %v4321_v52  ;;  %1963 = vmatpush.bf16.msrb.mxu2 %v4449_v54  ;;  %v4512_v37 = vld [vmem:[#allocation5 + $0x748] sm:$0xf]  ;;  %v5343_v39 = vld [vmem:[#allocation5 + $0x754] sm:$0xf0]  ;;  %v4385_v46 = vor.u32 %v5311_v33, %v4384_v32  ;;  %v5165_v29 = vld [vmem:[#allocation5 + $0x1cc] sm:$0xf] }
  0xc5   :  { %1976 = vmatpush.bf16.msrb.mxu3 %v4577_v58  ;;  %v4112_v44 = vld [vmem:[#allocation5 + $0x428] sm:$0xf]  ;;  %v5243_v47 = vld [vmem:[#allocation5 + $0x434] sm:$0xf0]  ;;  %v4513_v50 = vor.u32 %v5343_v39, %v4512_v37  ;;  %v3810_v31 = vld [vmem:[#allocation5 + $0x1d8] sm:$0xf0] }
  0xc6   :  { %1938 = vmatpush.bf16.msrb.mxu0 %v4177_v0  ;;  %v4240_v48 = vld [vmem:[#allocation5 + $0x528] sm:$0xf]  ;;  %v5713_v49 = vld [vmem:[%s6306_s25] sm:$0xf]  ;;  %v4113_v57 = vor.u32 %v5243_v47, %v4112_v44  ;;  %v1685_v10 = vpop.f32.mrf.mxu0  ;;  %v5197_v32 = vld [vmem:[#allocation5 + $0x2cc] sm:$0xf]  ;;  %v3813_v47 = vor.u32 %v5165_v29, %v3810_v31 }
  0xc7   :  { %v5275_v51 = vld [vmem:[#allocation5 + $0x534] sm:$0xf0]  ;;  %v4368_v52 = vld [vmem:[#allocation5 + $0x628] sm:$0xf]  ;;  %v388_v60 = vperm.slane %v5713_v49, 0 }
  0xc8   :  { %1951 = vmatpush.bf16.msrb.mxu1 %v4305_v1  ;;  %1964 = vmatpush.bf16.msrb.mxu2 %v4433_v2  ;;  %v5307_v54 = vld [vmem:[#allocation5 + $0x634] sm:$0xf0]  ;;  %v4496_v55 = vld [vmem:[#allocation5 + $0x728] sm:$0xf]  ;;  %v4241_v61 = vor.u32 %v5275_v51, %v4240_v48  ;;  %v3938_v33 = vld [vmem:[#allocation5 + $0x2d8] sm:$0xf0] }
  0xc9   :  { %1977 = vmatpush.bf16.msrb.mxu3 %v4561_v6  ;;  %v5339_v56 = vld [vmem:[#allocation5 + $0x734] sm:$0xf0]  ;;  %v4096_v58 = vld [vmem:[#allocation5 + $0x408] sm:$0xf]  ;;  %v4369_v62 = vor.u32 %v5307_v54, %v4368_v52  ;;  %v1686_v15 = vadd.f32 %v1685_v10, %v388_v60  ;;  %v5229_v39 = vld [vmem:[#allocation5 + $0x3cc] sm:$0xf]  ;;  %v3941_v48 = vor.u32 %v5197_v32, %v3938_v33 }
  0xca   :  { %1939 = vmatpush.bf16.msrb.mxu0 %v4161_v12  ;;  %v5239_v59 = vld [vmem:[#allocation5 + $0x414] sm:$0xf0]  ;;  %v4224_v63 = vld [vmem:[#allocation5 + $0x508] sm:$0xf]  ;;  %v4497_v3 = vor.u32 %v5339_v56, %v4496_v55  ;;  %v3826_v12 = vld [vmem:[#allocation5 + $0x1f8] sm:$0xf0] }
  0xcb   :  { %v5271_v0 = vld [vmem:[#allocation5 + $0x514] sm:$0xf0]  ;;  %v4352_v1 = vld [vmem:[#allocation5 + $0x608] sm:$0xf]  ;;  %v4097_v11 = vor.u32 %v5239_v59, %v4096_v58  ;;  %v3666_v51 = vld [vmem:[#allocation5 + $0xb8] sm:$0xf0] }
  0xcc   :  { %1952 = vmatpush.bf16.msrb.mxu1 %v4289_v13  ;;  %1965 = vmatpush.bf16.msrb.mxu2 %v4417_v14  ;;  %v5303_v4 = vld [vmem:[#allocation5 + $0x614] sm:$0xf0]  ;;  %v4480_v5 = vld [vmem:[#allocation5 + $0x708] sm:$0xf]  ;;  %v5201_v13 = vld [vmem:[#allocation5 + $0x2ec] sm:$0xf]  ;;  %v4225_v16 = vor.u32 %v5271_v0, %v4224_v63 }
  0xcd   :  { %1978 = vmatpush.bf16.msrb.mxu3 %v4545_v18  ;;  %v5335_v6 = vld [vmem:[#allocation5 + $0x714] sm:$0xf0]  ;;  %v3954_v14 = vld [vmem:[#allocation5 + $0x2f8] sm:$0xf0]  ;;  %v4353_v17 = vor.u32 %v5303_v4, %v4352_v1  ;;  %v5233_v18 = vld [vmem:[#allocation5 + $0x3ec] sm:$0xf] }
  0xce   :  { %1940 = vmatpush.bf16.msrb.mxu0 %v4145_v24  ;;  %v4481_v20 = vor.u32 %v5335_v6, %v4480_v5  ;;  %v5161_v52 = vld [vmem:[#allocation5 + $0x1ac] sm:$0xf]  ;;  %v1687_v54 = vpop.f32.mrf.mxu0  ;;  %v3794_v56 = vld [vmem:[#allocation5 + $0x1b8] sm:$0xf0] }
  0xcf   :  { %v3922_v58 = vld [vmem:[#allocation5 + $0x2b8] sm:$0xf0]  ;;  %v5225_v59 = vld [vmem:[#allocation5 + $0x3ac] sm:$0xf]  ;;  %v3797_v0 = vor.u32 %v5161_v52, %v3794_v56 }
  0xd0   :  { %1953 = vmatpush.bf16.msrb.mxu1 %v4273_v25  ;;  %1966 = vmatpush.bf16.msrb.mxu2 %v4401_v26  ;;  %v1698_v2 = vpop.f32.mrf.mxu1  ;;  %v3829_v25 = vor.u32 %v5169_v9, %v3826_v12  ;;  %v3957_v26 = vor.u32 %v5201_v13, %v3954_v14  ;;  %v4050_v60 = vld [vmem:[#allocation5 + $0x3b8] sm:$0xf0]  ;;  %v5157_v4 = vld [vmem:[#allocation5 + $0x18c] sm:$0xf]  ;;  %v3909_v14 = vor.u32 %v5189_v7, %v3906_v8 }
  0xd1   :  { %1979 = vmatpush.bf16.msrb.mxu3 %v4529_v30  ;;  %v1699_v22 = vadd.f32 %v1698_v2, %v1686_v15  ;;  %v4085_v30 = vor.u32 %v5233_v18, %v4082_v19  ;;  %v5125_v2 = vld [vmem:[#allocation5 + $0x8c] sm:$0xf]  ;;  %v4053_v5 = vor.u32 %v5225_v59, %v4050_v60  ;;  %v3778_v6 = vld [vmem:[#allocation5 + $0x198] sm:$0xf0] }
  0xd2   :  { %1941 = vmatpush.bf16.msrb.mxu0 %v4129_v40  ;;  %v4066_v40 = vld [vmem:[#allocation5 + $0x3d8] sm:$0xf0]  ;;  %v5221_v9 = vld [vmem:[#allocation5 + $0x38c] sm:$0xf]  ;;  %v3781_v13 = vor.u32 %v5157_v4, %v3778_v6 }
  0xd3   :  { %v4069_v55 = vor.u32 %v5229_v39, %v4066_v40  ;;  %v4034_v10 = vld [vmem:[#allocation5 + $0x398] sm:$0xf0]  ;;  %v5121_v15 = vld [vmem:[#allocation5 + $0x6c] sm:$0xf] }
  0xd4   :  { %1954 = vmatpush.bf16.msrb.mxu1 %v4257_v45  ;;  %1967 = vmatpush.bf16.msrb.mxu2 %v4385_v46  ;;  %v1711_v23 = vpop.f32.mrf.mxu2  ;;  %v3685_v45 = vor.u32 %v5133_v27, %v3682_v28  ;;  %v4037_v18 = vor.u32 %v5221_v9, %v4034_v10  ;;  %v3762_v19 = vld [vmem:[#allocation5 + $0x178] sm:$0xf0]  ;;  %v5117_v29 = vld [vmem:[#allocation5 + $0x4c] sm:$0xf] }
  0xd5   :  { %1980 = vmatpush.bf16.msrb.mxu3 %v4513_v50  ;;  %v1724_v24 = vpop.f32.mrf.mxu3  ;;  %v1712_v37 = vadd.f32 %v1711_v23, %v1699_v22  ;;  %v5129_v50 = vld [vmem:[#allocation5 + $0xac] sm:$0xf]  ;;  %v4018_v23 = vld [vmem:[#allocation5 + $0x378] sm:$0xf0] }
  0xd6   :  { %1942 = vmatpush.bf16.msrb.mxu0 %v4113_v57  ;;  %v5193_v57 = vld [vmem:[#allocation5 + $0x2ac] sm:$0xf]  ;;  %v3874_v40 = vld [vmem:[#allocation5 + $0x258] sm:$0xf0] }
  0xd7   :  { %v1725_v46 = vadd.f32 %v1724_v24, %v1712_v37  ;;  %v3925_v1 = vor.u32 %v5193_v57, %v3922_v58  ;;  %v5217_v22 = vld [vmem:[#allocation5 + $0x36c] sm:$0xf]  ;;  %v3746_v37 = vld [vmem:[#allocation5 + $0x158] sm:$0xf0] }
  0xd8   :  { %1955 = vmatpush.bf16.msrb.mxu1 %v4241_v61  ;;  %1968 = vmatpush.bf16.msrb.mxu2 %v4369_v62  ;;  %v1700_v44 = vpop.f32.mrf.mxu1  ;;  %v3669_v61 = vor.u32 %v5129_v50, %v3666_v51  ;;  %v5149_v31 = vld [vmem:[#allocation5 + $0x14c] sm:$0xf]  ;;  %v4021_v33 = vor.u32 %v5217_v22, %v4018_v23  ;;  %v3602_v56 = vld [vmem:[#allocation5 + $0x38] sm:$0xf0] }
  0xd9   :  { %1981 = vmatpush.bf16.msrb.mxu3 %v4497_v3  ;;  %v3650_v3 = vld [vmem:[#allocation5 + $0x98] sm:$0xf0]  ;;  %v5181_v39 = vld [vmem:[#allocation5 + $0x24c] sm:$0xf]  ;;  %v3749_v52 = vor.u32 %v5149_v31, %v3746_v37 }
  0xda   :  { %1943 = vmatpush.bf16.msrb.mxu0 %v4097_v11  ;;  %v3653_v11 = vor.u32 %v5125_v2, %v3650_v3  ;;  %v3877_v54 = vor.u32 %v5181_v39, %v3874_v40  ;;  %v5145_v57 = vld [vmem:[#allocation5 + $0x12c] sm:$0xf]  ;;  %v3730_v59 = vld [vmem:[#allocation5 + $0x138] sm:$0xf0] }
  0xdb   :  { %v5177_v60 = vld [vmem:[#allocation5 + $0x22c] sm:$0xf]  ;;  %v3586_v4 = vld [vmem:[#allocation5 + $0x18] sm:$0xf0] }
  0xdc   :  { %1956 = vmatpush.bf16.msrb.mxu1 %v4225_v16  ;;  %1969 = vmatpush.bf16.msrb.mxu2 %v4353_v17  ;;  %v1713_v62 = vpop.f32.mrf.mxu2  ;;  %v3634_v16 = vld [vmem:[#allocation5 + $0x78] sm:$0xf0]  ;;  %v5153_v17 = vld [vmem:[#allocation5 + $0x16c] sm:$0xf] }
  0xdd   :  { %1982 = vmatpush.bf16.msrb.mxu3 %v4481_v20  ;;  %1944 = vmatmul.bf16.vlgmr.msrb.gmra.mxu0 %v5693_v53  ;;  %v1726_v63 = vpop.f32.mrf.mxu3  ;;  %v5185_v20 = vld [vmem:[#allocation5 + $0x26c] sm:$0xf]  ;;  %v3765_v27 = vor.u32 %v5153_v17, %v3762_v19  ;;  %v3714_v8 = vld [vmem:[#allocation5 + $0x118] sm:$0xf0] }
  0xde   :  { %1988 = vmatpush.bf16.msra.mxu0 %v3701_v21  ;;  %v3890_v21 = vld [vmem:[#allocation5 + $0x278] sm:$0xf0]  ;;  %v5209_v63 = vld [vmem:[#allocation5 + $0x32c] sm:$0xf] }
  0xdf   :  { %1970 = vmatmul.bf16.vlgmr.msrb.gmra.mxu2 %v5686_v35  ;;  %1957 = vmatmul.bf16.vlgmr.msrb.gmra.mxu1 %v5690_v41  ;;  %v3893_v28 = vor.u32 %v5185_v20, %v3890_v21  ;;  %v5109_v3 = vld [vmem:[#allocation5 + $0xc] sm:$0xf]  ;;  %v4210_v17 = vld [vmem:[#allocation5 + $0x4f8] sm:$0xf0] }
  0xe0   :  { %2001 = vmatpush.bf16.msra.mxu1 %v3829_v25  ;;  %2014 = vmatpush.bf16.msra.mxu2 %v3957_v26  ;;  %v1750_v12 = vpop.f32.mrf.mxu1  ;;  %v1737_v24 = vpop.f32.mrf.mxu0  ;;  %v3637_v25 = vor.u32 %v5121_v15, %v3634_v16  ;;  %v5141_v7 = vld [vmem:[#allocation5 + $0x10c] sm:$0xf]  ;;  %v3589_v19 = vor.u32 %v5109_v3, %v3586_v4  ;;  %v4338_v20 = vld [vmem:[#allocation5 + $0x5f8] sm:$0xf0] }
  0xe1   :  { %2027 = vmatpush.bf16.msra.mxu3 %v4085_v30  ;;  %v1738_v26 = vadd.f32 %v1737_v24, %v1725_v46  ;;  %v3618_v30 = vld [vmem:[#allocation5 + $0x58] sm:$0xf0]  ;;  %v5173_v9 = vld [vmem:[#allocation5 + $0x20c] sm:$0xf]  ;;  %v3717_v23 = vor.u32 %v5141_v7, %v3714_v8 }
  0xe2   :  { %1983 = vmatmul.bf16.vlgmr.msrb.gmra.mxu3 %v5688_v38  ;;  %1989 = vmatpush.bf16.msra.mxu0 %v3685_v45  ;;  %v3621_v50 = vor.u32 %v5117_v29, %v3618_v30  ;;  %v5265_v16 = vld [vmem:[#allocation5 + $0x4ec] sm:$0xf]  ;;  %v4466_v22 = vld [vmem:[#allocation5 + $0x6f8] sm:$0xf0] }
  0xe3   :  { %v1751_v44 = vadd.f32 %v1750_v12, %v1738_v26  ;;  %v3842_v12 = vld [vmem:[#allocation5 + $0x218] sm:$0xf0]  ;;  %v5329_v21 = vld [vmem:[#allocation5 + $0x6ec] sm:$0xf] }
  0xe4   :  { %2002 = vmatpush.bf16.msra.mxu1 %v3813_v47  ;;  %2015 = vmatpush.bf16.msra.mxu2 %v3941_v48  ;;  %v1763_v32 = vpop.f32.mrf.mxu2  ;;  %v5213_v47 = vld [vmem:[#allocation5 + $0x34c] sm:$0xf]  ;;  %v4002_v48 = vld [vmem:[#allocation5 + $0x358] sm:$0xf0]  ;;  %v3845_v24 = vor.u32 %v5173_v9, %v3842_v12  ;;  %v4469_v30 = vor.u32 %v5329_v21, %v4466_v22 }
  0xe5   :  { %2028 = vmatpush.bf16.msra.mxu3 %v4069_v55  ;;  %v1776_v45 = vpop.f32.mrf.mxu3  ;;  %v1764_v46 = vadd.f32 %v1763_v32, %v1751_v44  ;;  %v5113_v55 = vld [vmem:[#allocation5 + $0x2c] sm:$0xf]  ;;  %v4005_v58 = vor.u32 %v5213_v47, %v4002_v48  ;;  %v4594_v26 = vld [vmem:[#allocation5 + $0x7f8] sm:$0xf0] }
  0xe6   :  { %1990 = vmatpush.bf16.msra.mxu0 %v3669_v61  ;;  %v3858_v61 = vld [vmem:[#allocation5 + $0x238] sm:$0xf0]  ;;  %v3605_v2 = vor.u32 %v5113_v55, %v3602_v56  ;;  %v5261_v31 = vld [vmem:[#allocation5 + $0x4cc] sm:$0xf] }
  0xe7   :  { %v5720_v62 = vadd.f32 %v1776_v45, %v1764_v46  ;;  %v3861_v6 = vor.u32 %v5177_v60, %v3858_v61  ;;  %v4194_v32 = vld [vmem:[#allocation5 + $0x4d8] sm:$0xf0]  ;;  %v5325_v40 = vld [vmem:[#allocation5 + $0x6cc] sm:$0xf] }
  0xe8   :  { %2003 = vmatpush.bf16.msra.mxu1 %v3797_v0  ;;  %2016 = vmatpush.bf16.msra.mxu2 %v3925_v1  ;;  %v1752_v51 = vpop.f32.mrf.mxu1  ;;  %v3986_v0 = vld [vmem:[#allocation5 + $0x338] sm:$0xf0]  ;;  %v1739_v1 = vpop.f32.mrf.mxu0  ;;  %v5357_v45 = vld [vmem:[#allocation5 + $0x7cc] sm:$0xf]  ;;  %v4197_v48 = vor.u32 %v5261_v31, %v4194_v32 }
  0xe9   :  { %2029 = vmatpush.bf16.msra.mxu3 %v4053_v5  ;;  %v3733_v5 = vor.u32 %v5145_v57, %v3730_v59  ;;  %v4322_v39 = vld [vmem:[#allocation5 + $0x5d8] sm:$0xf0]  ;;  %v5257_v51 = vld [vmem:[#allocation5 + $0x4ac] sm:$0xf] }
  0xea   :  { %1991 = vmatpush.bf16.msra.mxu0 %v3653_v11  ;;  %v3989_v11 = vor.u32 %v5209_v63, %v3986_v0  ;;  %v4450_v44 = vld [vmem:[#allocation5 + $0x6d8] sm:$0xf0]  ;;  %v5321_v57 = vld [vmem:[#allocation5 + $0x6ac] sm:$0xf] }
  0xeb   :  { %v4578_v47 = vld [vmem:[#allocation5 + $0x7d8] sm:$0xf0]  ;;  %v4453_v46 = vor.u32 %v5325_v40, %v4450_v44  ;;  %v5353_v59 = vld [vmem:[#allocation5 + $0x7ac] sm:$0xf] }
  0xec   :  { %2004 = vmatpush.bf16.msra.mxu1 %v3781_v13  ;;  %2017 = vmatpush.bf16.msra.mxu2 %v3909_v14  ;;  %v1765_v10 = vpop.f32.mrf.mxu2  ;;  %v5205_v13 = vld [vmem:[#allocation5 + $0x30c] sm:$0xf]  ;;  %v3970_v14 = vld [vmem:[#allocation5 + $0x318] sm:$0xf0]  ;;  %v4581_v55 = vor.u32 %v5357_v45, %v4578_v47 }
  0xed   :  { %2030 = vmatpush.bf16.msra.mxu3 %v4037_v18  ;;  %v1778_v15 = vpop.f32.mrf.mxu3  ;;  %v5297_v18 = vld [vmem:[#allocation5 + $0x5ec] sm:$0xf]  ;;  %v4306_v56 = vld [vmem:[#allocation5 + $0x5b8] sm:$0xf0] }
  0xee   :  { %1992 = vmatpush.bf16.msra.mxu0 %v3637_v25  ;;  %v5361_v25 = vld [vmem:[#allocation5 + $0x7ec] sm:$0xf]  ;;  %v4341_v29 = vor.u32 %v5297_v18, %v4338_v20  ;;  %v4562_v60 = vld [vmem:[#allocation5 + $0x7b8] sm:$0xf0] }
  0xef   :  { %v4597_v37 = vor.u32 %v5361_v25, %v4594_v26  ;;  %v5253_v1 = vld [vmem:[#allocation5 + $0x48c] sm:$0xf]  ;;  %v4565_v3 = vor.u32 %v5353_v59, %v4562_v60  ;;  %v4290_v4 = vld [vmem:[#allocation5 + $0x598] sm:$0xf0] }
  0xf0   :  { %2005 = vmatpush.bf16.msra.mxu1 %v3765_v27  ;;  %2018 = vmatpush.bf16.msra.mxu2 %v3893_v28  ;;  %v3973_v27 = vor.u32 %v5205_v13, %v3970_v14  ;;  %v4213_v28 = vor.u32 %v5265_v16, %v4210_v17  ;;  %v5349_v7 = vld [vmem:[#allocation5 + $0x78c] sm:$0xf]  ;;  %v4274_v15 = vld [vmem:[#allocation5 + $0x578] sm:$0xf0] }
  0xf1   :  { %2031 = vmatpush.bf16.msra.mxu3 %v4021_v33  ;;  %v5293_v33 = vld [vmem:[#allocation5 + $0x5cc] sm:$0xf]  ;;  %v4402_v17 = vld [vmem:[#allocation5 + $0x678] sm:$0xf0] }
  0xf2   :  { %1993 = vmatpush.bf16.msra.mxu0 %v3621_v50  ;;  %v4325_v50 = vor.u32 %v5293_v33, %v4322_v39  ;;  %v5249_v10 = vld [vmem:[#allocation5 + $0x46c] sm:$0xf]  ;;  %v4514_v33 = vld [vmem:[#allocation5 + $0x758] sm:$0xf0] }
  0xf3   :  { %v5281_v12 = vld [vmem:[#allocation5 + $0x56c] sm:$0xf]  ;;  %v4114_v47 = vld [vmem:[#allocation5 + $0x438] sm:$0xf0] }
  0xf4   :  { %2006 = vmatpush.bf16.msra.mxu1 %v3749_v52  ;;  %2019 = vmatpush.bf16.msra.mxu2 %v3877_v54  ;;  %v4178_v52 = vld [vmem:[#allocation5 + $0x4b8] sm:$0xf0]  ;;  %v5289_v54 = vld [vmem:[#allocation5 + $0x5ac] sm:$0xf]  ;;  %v4277_v21 = vor.u32 %v5281_v12, %v4274_v15  ;;  %v5379_v12 = vld [vmem:[%s6282_s4 + $0x78] sm:$0xff] }
  0xf5   :  { %2032 = vmatpush.bf16.msra.mxu3 %v4005_v58  ;;  %v4434_v58 = vld [vmem:[#allocation5 + $0x6b8] sm:$0xf0]  ;;  %v4181_v61 = vor.u32 %v5257_v51, %v4178_v52  ;;  %v4309_v63 = vor.u32 %v5289_v54, %v4306_v56  ;;  %v5313_v16 = vld [vmem:[#allocation5 + $0x66c] sm:$0xf]  ;;  %v5387_v15 = vld [vmem:[%s6282_s4 + $0xb8] sm:$0xff] }
  0xf6   :  { %1994 = vmatpush.bf16.msra.mxu0 %v3605_v2  ;;  %v4437_v0 = vor.u32 %v5321_v57, %v4434_v58  ;;  %v4162_v2 = vld [vmem:[#allocation5 + $0x498] sm:$0xf0]  ;;  %v5345_v18 = vld [vmem:[#allocation5 + $0x76c] sm:$0xf]  ;;  %v4405_v22 = vor.u32 %v5313_v16, %v4402_v17  ;;  %v389_v57 = vperm.slane %v5713_v49, 1  ;;  %v5369_v17 = vld [vmem:[%s6282_s4 + $0x28] sm:$0xff] }
  0xf7   :  { %v5277_v25 = vld [vmem:[#allocation5 + $0x54c] sm:$0xf]  ;;  %v4242_v51 = vld [vmem:[#allocation5 + $0x538] sm:$0xf0] }
  0xf8   :  { %2007 = vmatpush.bf16.msra.mxu1 %v3733_v5  ;;  %2020 = vmatpush.bf16.msra.mxu2 %v3861_v6  ;;  %v5317_v5 = vld [vmem:[#allocation5 + $0x68c] sm:$0xf]  ;;  %v4418_v6 = vld [vmem:[#allocation5 + $0x698] sm:$0xf0] }
  0xf9   :  { %2033 = vmatpush.bf16.msra.mxu3 %v3989_v11  ;;  %v4421_v9 = vor.u32 %v5317_v5, %v4418_v6  ;;  %v4146_v11 = vld [vmem:[#allocation5 + $0x478] sm:$0xf0]  ;;  %v5341_v32 = vld [vmem:[#allocation5 + $0x74c] sm:$0xf] }
  0xfa   :  { %1995 = vmatpush.bf16.msra.mxu0 %v3589_v19  ;;  %v5726_v8 = vpop.f32.mrf.mxu0  ;;  %v4530_v19 = vld [vmem:[#allocation5 + $0x778] sm:$0xf0]  ;;  %v4149_v20 = vor.u32 %v5249_v10, %v4146_v11  ;;  %v5241_v45 = vld [vmem:[#allocation5 + $0x42c] sm:$0xf]  ;;  %v5371_v11 = vld [vmem:[%s6282_s4 + $0x38] sm:$0xff] }
  0xfb   :  { %v5305_v52 = vld [vmem:[#allocation5 + $0x62c] sm:$0xf]  ;;  %v4370_v54 = vld [vmem:[#allocation5 + $0x638] sm:$0xf0]  ;;  %v4117_v58 = vor.u32 %v5241_v45, %v4114_v47 }
  0xfc   :  { %2008 = vmatpush.bf16.msra.mxu1 %v3717_v23  ;;  %2021 = vmatpush.bf16.msra.mxu2 %v3845_v24  ;;  %v5728_v13 = vpop.f32.mrf.mxu1  ;;  %v5245_v23 = vld [vmem:[#allocation5 + $0x44c] sm:$0xf]  ;;  %v4130_v24 = vld [vmem:[#allocation5 + $0x458] sm:$0xf0]  ;;  %v4373_v60 = vor.u32 %v5305_v52, %v4370_v54 }
  0xfd   :  { %2034 = vmatpush.bf16.msra.mxu3 %v3973_v27  ;;  %1996 = vmatmul.bf16.vlgmr.msra.gmra.mxu0 %v5672_v42  ;;  %v4546_v42 = vld [vmem:[#allocation5 + $0x798] sm:$0xf0]  ;;  %v4533_v27 = vor.u32 %v5345_v18, %v4530_v19  ;;  %v5333_v6 = vld [vmem:[#allocation5 + $0x70c] sm:$0xf]  ;;  %v5377_v18 = vld [vmem:[%s6282_s4 + $0x68] sm:$0xff] }
  0xfe   :  { %2040 = vmatpush.bf16.msrb.mxu0 %v4213_v28  ;;  %v4549_v14 = vor.u32 %v5349_v7, %v4546_v42  ;;  %v4258_v28 = vld [vmem:[#allocation5 + $0x558] sm:$0xf0]  ;;  %v1790_v42 = vadd.f32 %v5726_v8, %v389_v57  ;;  %v5370_v8 = vld [vmem:[%s6282_s4 + $0x30] sm:$0xff] }
  0xff   :  { %2022 = vmatmul.bf16.vlgmr.msra.gmra.mxu2 %v5668_v34  ;;  %2009 = vmatmul.bf16.vlgmr.msra.gmra.mxu1 %v5674_v43  ;;  %v5285_v34 = vld [vmem:[#allocation5 + $0x58c] sm:$0xf]  ;;  %v4261_v40 = vor.u32 %v5277_v25, %v4258_v28  ;;  %v4498_v56 = vld [vmem:[#allocation5 + $0x738] sm:$0xf0] }
 0x100   :  { %2053 = vmatpush.bf16.msrb.mxu1 %v4341_v29  ;;  %2066 = vmatpush.bf16.msrb.mxu2 %v4469_v30  ;;  %v4293_v43 = vor.u32 %v5285_v34, %v4290_v4  ;;  %v5309_v29 = vld [vmem:[#allocation5 + $0x64c] sm:$0xf]  ;;  %v4386_v30 = vld [vmem:[#allocation5 + $0x658] sm:$0xf0] }
 0x101   :  { %2079 = vmatpush.bf16.msrb.mxu3 %v4597_v37  ;;  %v4133_v37 = vor.u32 %v5245_v23, %v4130_v24  ;;  %v4389_v44 = vor.u32 %v5309_v29, %v4386_v30  ;;  %v4226_v34 = vld [vmem:[#allocation5 + $0x518] sm:$0xf0]  ;;  %v5375_v24 = vld [vmem:[%s6282_s4 + $0x58] sm:$0xff]  ;;  %v5366_v28 = vld [vmem:[%s6282_s4 + $0x10] sm:$0xff] }
 0x102   :  { %2035 = vmatmul.bf16.vlgmr.msra.gmra.mxu3 %v5670_v36  ;;  %2041 = vmatpush.bf16.msrb.mxu0 %v4197_v48  ;;  %v4165_v36 = vor.u32 %v5253_v1, %v4162_v2  ;;  %v5730_v26 = vpop.f32.mrf.mxu2  ;;  %v1791_v39 = vpop.f32.mrf.mxu0  ;;  %v5273_v48 = vld [vmem:[#allocation5 + $0x52c] sm:$0xf]  ;;  %v4354_v4 = vld [vmem:[#allocation5 + $0x618] sm:$0xf0] }
 0x103   :  { %v4245_v59 = vor.u32 %v5273_v48, %v4242_v51  ;;  %v4482_v7 = vld [vmem:[#allocation5 + $0x718] sm:$0xf0]  ;;  %v5365_v39 = vld [vmem:[%s6282_s4 + $0x8] sm:$0xff]  ;;  %v5382_v57 = vld [vmem:[%s6282_s4 + $0x90] sm:$0xff] }
 0x104   :  { %2054 = vmatpush.bf16.msrb.mxu1 %v4325_v50  ;;  %2067 = vmatpush.bf16.msrb.mxu2 %v4453_v46  ;;  %v1804_v50 = vpop.f32.mrf.mxu1  ;;  %v4517_v46 = vor.u32 %v5341_v32, %v4514_v33  ;;  %v4485_v10 = vor.u32 %v5333_v6, %v4482_v7  ;;  %v5374_v32 = vld [vmem:[%s6282_s4 + $0x50] sm:$0xff]  ;;  %v5372_v51 = vld [vmem:[%s6282_s4 + $0x40] sm:$0xff] }
 0x105   :  { %2080 = vmatpush.bf16.msrb.mxu3 %v4581_v55  ;;  %v5732_v31 = vpop.f32.mrf.mxu3  ;;  %v5337_v55 = vld [vmem:[#allocation5 + $0x72c] sm:$0xf]  ;;  %v5364_v50 = vld [vmem:[%s6282_s4] sm:$0xff] }
 0x106   :  { %2042 = vmatpush.bf16.msrb.mxu0 %v4181_v61  ;;  %v5237_v61 = vld [vmem:[#allocation5 + $0x40c] sm:$0xf]  ;;  %v4501_v2 = vor.u32 %v5337_v55, %v4498_v56 }
 0x108   :  { %2055 = vmatpush.bf16.msrb.mxu1 %v4309_v63  ;;  %2068 = vmatpush.bf16.msrb.mxu2 %v4437_v0  ;;  %v4098_v63 = vld [vmem:[#allocation5 + $0x418] sm:$0xf0]  ;;  %v5269_v0 = vld [vmem:[#allocation5 + $0x50c] sm:$0xf] }
 0x109   :  { %2081 = vmatpush.bf16.msrb.mxu3 %v4565_v3  ;;  %v5301_v3 = vld [vmem:[#allocation5 + $0x60c] sm:$0xf] }
 0x10a   :  { %2043 = vmatpush.bf16.msrb.mxu0 %v4165_v36  ;;  %v1817_v1 = vpop.f32.mrf.mxu2  ;;  %v4101_v36 = vor.u32 %v5237_v61, %v4098_v63  ;;  %v5380_v63 = vld [vmem:[%s6282_s4 + $0x80] sm:$0xff] }
 0x10c   :  { %2056 = vmatpush.bf16.msrb.mxu1 %v4293_v43  ;;  %2069 = vmatpush.bf16.msrb.mxu2 %v4421_v9  ;;  %v4229_v43 = vor.u32 %v5269_v0, %v4226_v34  ;;  %v4357_v9 = vor.u32 %v5301_v3, %v4354_v4  ;;  %v390_v0 = vperm.slane %v5713_v49, 2 }
 0x10d   :  { %2082 = vmatpush.bf16.msrb.mxu3 %v4549_v14  ;;  %v1830_v5 = vpop.f32.mrf.mxu3  ;;  %v1803_v14 = vadd.f32 %v5728_v13, %v1790_v42  ;;  %v5378_v13 = vld [vmem:[%s6282_s4 + $0x70] sm:$0xff] }
 0x10e   :  { %2044 = vmatpush.bf16.msrb.mxu0 %v4149_v20 }
 0x10f   :  { %v1816_v16 = vadd.f32 %v5730_v26, %v1803_v14 }
 0x110   :  { %2057 = vmatpush.bf16.msrb.mxu1 %v4277_v21  ;;  %2070 = vmatpush.bf16.msrb.mxu2 %v4405_v22  ;;  %v5386_v21 = vld [vmem:[%s6282_s4 + $0xb0] sm:$0xff]  ;;  %v5367_v22 = vld [vmem:[%s6282_s4 + $0x18] sm:$0xff] }
 0x111   :  { %2083 = vmatpush.bf16.msrb.mxu3 %v4533_v27  ;;  %v5385_v27 = vld [vmem:[%s6282_s4 + $0xa8] sm:$0xff] }
 0x112   :  { %2045 = vmatpush.bf16.msrb.mxu0 %v4133_v37 }
 0x114   :  { %2058 = vmatpush.bf16.msrb.mxu1 %v4261_v40  ;;  %2071 = vmatpush.bf16.msrb.mxu2 %v4389_v44  ;;  %v5383_v40 = vld [vmem:[%s6282_s4 + $0x98] sm:$0xff]  ;;  %v5373_v44 = vld [vmem:[%s6282_s4 + $0x48] sm:$0xff] }
 0x115   :  { %2084 = vmatpush.bf16.msrb.mxu3 %v4517_v46  ;;  %v2092_v46 = vmax.f32 %v5720_v62, 0.0 }
 0x116   :  { %2046 = vmatpush.bf16.msrb.mxu0 %v4117_v58 }
 0x117   :  { %v2096_v54 = vpack.c.bf16 %v2092_v46, %v2092_v46 }
 0x118   :  { %2059 = vmatpush.bf16.msrb.mxu1 %v4245_v59  ;;  %2072 = vmatpush.bf16.msrb.mxu2 %v4373_v60  ;;  %v5381_v59 = vld [vmem:[%s6282_s4 + $0x88] sm:$0xff] }
 0x119   :  { %2085 = vmatpush.bf16.msrb.mxu3 %v4501_v2 }
 0x11a   :  { %2047 = vmatpush.bf16.msrb.mxu0 %v4101_v36 }
 0x11c   :  { %2060 = vmatpush.bf16.msrb.mxu1 %v4229_v43  ;;  %2073 = vmatpush.bf16.msrb.mxu2 %v4357_v9  ;;  %v1854_v20 = vpop.f32.mrf.mxu1 }
 0x11d   :  { %2086 = vmatpush.bf16.msrb.mxu3 %v4485_v10  ;;  %2048 = vmatmul.bf16.vlgmr.msrb.gmra.mxu0 %v5693_v53  ;;  %v1829_v53 = vadd.f32 %v5732_v31, %v1816_v16  ;;  %v5384_v31 = vld [vmem:[%s6282_s4 + $0xa0] sm:$0xff] }
 0x11e   :  { %2360 = vmatpush.bf16.msra.mxu0 %v5371_v11  ;;  %v5395_v11 = vld [vmem:[%s6282_s4 + $0xf8] sm:$0xff] }
 0x11f   :  { %2061 = vmatmul.bf16.vlgmr.msrb.gmra.mxu1 %v5690_v41  ;;  %2074 = vmatmul.bf16.vlgmr.msrb.gmra.mxu2 %v5686_v35  ;;  %v5368_v35 = vld [vmem:[%s6282_s4 + $0x20] sm:$0xff]  ;;  %v1841_v41 = vpop.f32.mrf.mxu0 }
 0x120   :  { %2373 = vmatpush.bf16.msra.mxu1 %v5379_v12  ;;  %2087 = vmatmul.bf16.vlgmr.msrb.gmra.mxu3 %v5688_v38  ;;  %v5376_v38 = vld [vmem:[%s6282_s4 + $0x60] sm:$0xff]  ;;  %v1842_v19 = vadd.f32 %v1841_v41, %v1829_v53  ;;  %v5391_v41 = vld [vmem:[%s6282_s4 + $0xd8] sm:$0xff] }
 0x121   :  { %2386 = vmatpush.bf16.msra.mxu2 %v5387_v15  ;;  %2399 = vmatpush.bf16.msra.mxu3 %v5395_v11 }
 0x122   :  { %2361 = vmatpush.bf16.msra.mxu0 %v5370_v8  ;;  %v1855_v23 = vadd.f32 %v1854_v20, %v1842_v19  ;;  %v1867_v25 = vpop.f32.mrf.mxu2  ;;  %v5394_v8 = vld [vmem:[%s6282_s4 + $0xf0] sm:$0xff] }
 0x124   :  { %2374 = vmatpush.bf16.msra.mxu1 %v5378_v13  ;;  %v1868_v29 = vadd.f32 %v1867_v25, %v1855_v23  ;;  %v1856_v33 = vpop.f32.mrf.mxu1  ;;  %v5388_v25 = vld [vmem:[%s6282_s4 + $0xc0] sm:$0xff] }
 0x125   :  { %2387 = vmatpush.bf16.msra.mxu2 %v5386_v21  ;;  %v1880_v26 = vpop.f32.mrf.mxu3  ;;  %2400 = vmatpush.bf16.msra.mxu3 %v5394_v8  ;;  %v5389_v21 = vld [vmem:[%s6282_s4 + $0xc8] sm:$0xff] }
 0x126   :  { %2362 = vmatpush.bf16.msra.mxu0 %v5369_v17  ;;  %v1881_v37 = vadd.f32 %v1880_v26, %v1868_v29  ;;  %v5393_v17 = vld [vmem:[%s6282_s4 + $0xe8] sm:$0xff] }
 0x127   :  { %v1843_v30 = vpop.f32.mrf.mxu0  ;;  %v5411_v8 = vld [vmem:[%s6287_s9 + $0x2c] sm:$0xf] }
 0x128   :  { %2375 = vmatpush.bf16.msra.mxu1 %v5377_v18  ;;  %v2093_v48 = vmax.f32 %v1881_v37, 0.0 }
 0x129   :  { %2388 = vmatpush.bf16.msra.mxu2 %v5385_v27  ;;  %2401 = vmatpush.bf16.msra.mxu3 %v5393_v17  ;;  %v391_v27 = vperm.slane %v5713_v49, 3  ;;  %v5406_v17 = vld [vmem:[%s6287_s9 + $0x4] sm:$0xf] }
 0x12a   :  { %2363 = vmatpush.bf16.msra.mxu0 %v5368_v35  ;;  %v1869_v45 = vpop.f32.mrf.mxu2  ;;  %v2097_v52 = vpack.c.bf16 %v2093_v48, %v2093_v48  ;;  %v5392_v35 = vld [vmem:[%s6282_s4 + $0xe0] sm:$0xff] }
 0x12c   :  { %2376 = vmatpush.bf16.msra.mxu1 %v5376_v38  ;;  %v5390_v38 = vld [vmem:[%s6282_s4 + $0xd0] sm:$0xff] }
 0x12d   :  { %2389 = vmatpush.bf16.msra.mxu2 %v5384_v31  ;;  %v1882_v47 = vpop.f32.mrf.mxu3  ;;  %2402 = vmatpush.bf16.msra.mxu3 %v5392_v35 }
 0x12e   :  { %2364 = vmatpush.bf16.msra.mxu0 %v5367_v22 }
 0x130   :  { %2377 = vmatpush.bf16.msra.mxu1 %v5375_v24 }
 0x131   :  { %2390 = vmatpush.bf16.msra.mxu2 %v5383_v40  ;;  %2403 = vmatpush.bf16.msra.mxu3 %v5391_v41  ;;  %v5409_v41 = vld [vmem:[%s6287_s9 + $0x14] sm:$0xf0] }
 0x132   :  { %2365 = vmatpush.bf16.msra.mxu0 %v5366_v28 }
 0x134   :  { %2378 = vmatpush.bf16.msra.mxu1 %v5374_v32 }
 0x135   :  { %2391 = vmatpush.bf16.msra.mxu2 %v5382_v57  ;;  %2404 = vmatpush.bf16.msra.mxu3 %v5390_v38  ;;  %v4737_v38 = vld [vmem:[%s6287_s9] sm:$0xf] }
 0x136   :  { %2366 = vmatpush.bf16.msra.mxu0 %v5365_v39 }
 0x138   :  { %2379 = vmatpush.bf16.msra.mxu1 %v5373_v44 }
 0x139   :  { %2392 = vmatpush.bf16.msra.mxu2 %v5381_v59  ;;  %2405 = vmatpush.bf16.msra.mxu3 %v5389_v21 }
 0x13a   :  { %2367 = vmatpush.bf16.msra.mxu0 %v5364_v50  ;;  %v1893_v55 = vpop.f32.mrf.mxu0 }
 0x13b   :  { %v1894_v34 = vadd.f32 %v1893_v55, %v390_v0  ;;  %v5396_v0 = vld [vmem:[%s6284_s6] sm:$0xff] }
 0x13c   :  { %2380 = vmatpush.bf16.msra.mxu1 %v5372_v51  ;;  %v1906_v56 = vpop.f32.mrf.mxu1 }
 0x13d   :  { %2368 = vmatmul.bf16.vlgmr.msra.gmra.mxu0 %v2096_v54  ;;  %2393 = vmatpush.bf16.msra.mxu2 %v5380_v63  ;;  %v1907_v3 = vadd.f32 %v1906_v56, %v1894_v34  ;;  %v5496_v56 = vld [vmem:[%s6283_s5] ss:$0 sm:$0xff]  ;;  %v5397_v63 = vld [vmem:[%s6284_s6 + $0x8] sm:$0xff]  ;;  %v5410_v34 = vld [vmem:[%s6287_s9 + $0x24] sm:$0xf] }
 0x13e   :  { %2406 = vmatpush.bf16.msra.mxu3 %v5388_v25  ;;  %2444 = vmatpush.bf16.msrb.mxu0 %v5397_v63  ;;  %v5402_v25 = vld [vmem:[%s6286_s8 + $0x24] sm:$0xf] }
 0x13f   :  { %2381 = vmatmul.bf16.vlgmr.msra.gmra.mxu1 %v2097_v52 }
 0x142   :  { %v1919_v58 = vpop.f32.mrf.mxu2  ;;  %v1895_v60 = vpop.f32.mrf.mxu0  ;;  %2445 = vmatpush.bf16.msrb.mxu0 %v5396_v0 }
 0x143   :  { %v1920_v4 = vadd.f32 %v1919_v58, %v1907_v3  ;;  %v4755_v3 = vld [vmem:[%s6287_s9 + $0x30] sm:$0xf0] }
 0x144   :  { %v1908_v61 = vpop.f32.mrf.mxu1 }
 0x145   :  { %v1932_v62 = vpop.f32.mrf.mxu3 }
 0x146   :  { %v1933_v5 = vadd.f32 %v1932_v62, %v1920_v4  ;;  %v4761_v4 = vld [vmem:[%s6287_s9 + $0x28] sm:$0xf] }
 0x14a   :  { %v1921_v1 = vpop.f32.mrf.mxu2 }
 0x14d   :  { %v1934_v2 = vpop.f32.mrf.mxu3 }
 0x15a   :  { %v1945_v6 = vpop.f32.mrf.mxu0 }
 0x15b   :  { %v1946_v7 = vadd.f32 %v1945_v6, %v1933_v5  ;;  %v4758_v5 = vor.u32 %v5410_v34, %v4755_v3  ;;  %v5413_v6 = vld [vmem:[%s6287_s9 + $0x34] sm:$0xf0]  ;;  %v5420_v34 = vld [vmem:[%s6289_s11 + $0x30] sm:$0xff] }
 0x15c   :  { %v1958_v42 = vpop.f32.mrf.mxu1  ;;  %v5444_v3 = vld [vmem:[%s6289_s11 + $0xf0] sm:$0xff] }
 0x15d   :  { %v1959_v36 = vadd.f32 %v1958_v42, %v1946_v7  ;;  %v4762_v7 = vor.u32 %v5413_v6, %v4761_v4  ;;  %2533 = vmatpush.bf16.msrb.mxu2 %v4758_v5  ;;  %v5429_v4 = vld [vmem:[%s6289_s11 + $0x78] sm:$0xff]  ;;  %v5419_v6 = vld [vmem:[%s6289_s11 + $0x28] sm:$0xff] }
 0x15e   :  { %v5437_v5 = vld [vmem:[%s6289_s11 + $0xb8] sm:$0xff] }
 0x15f   :  { %2546 = vmatpush.bf16.msrb.mxu3 %v4762_v7  ;;  %v5443_v7 = vld [vmem:[%s6289_s11 + $0xe8] sm:$0xff] }
 0x162   :  { %v1971_v43 = vpop.f32.mrf.mxu2  ;;  %v1947_v14 = vpop.f32.mrf.mxu0 }
 0x163   :  { %v1972_v9 = vadd.f32 %v1971_v43, %v1959_v36  ;;  %v5412_v14 = vld [vmem:[%s6287_s9 + $0x2c] sm:$0xf0] }
 0x164   :  { %v1960_v15 = vpop.f32.mrf.mxu1 }
 0x165   :  { %v1984_v10 = vpop.f32.mrf.mxu3 }
 0x166   :  { %v1985_v12 = vadd.f32 %v1984_v10, %v1972_v9 }
 0x168   :  { %v2094_v13 = vmax.f32 %v1985_v12, 0.0  ;;  %v4753_v12 = vld [vmem:[%s6287_s9 + $0x20] sm:$0xf] }
 0x169   :  { %v4754_v15 = vor.u32 %v5412_v14, %v4753_v12  ;;  %v5417_v12 = vld [vmem:[%s6289_s11 + $0x18] sm:$0xff] }
 0x16a   :  { %v2098_v16 = vpack.c.bf16 %v2094_v13, %v2094_v13  ;;  %v1973_v53 = vpop.f32.mrf.mxu2  ;;  %v4763_v13 = vld [vmem:[%s6287_s9 + $0x38] sm:$0xf0] }
 0x16b   :  { %2520 = vmatpush.bf16.msrb.mxu1 %v4754_v15  ;;  %v4739_v53 = vld [vmem:[%s6287_s9 + $0x10] sm:$0xf0]  ;;  %v5441_v14 = vld [vmem:[%s6289_s11 + $0xd8] sm:$0xff]  ;;  %v5434_v15 = vld [vmem:[%s6289_s11 + $0xa0] sm:$0xff] }
 0x16c   :  { %2394 = vmatmul.bf16.vlgmr.msra.gmra.mxu2 %v2098_v16  ;;  %v4766_v16 = vor.u32 %v5411_v8, %v4763_v13  ;;  %v4742_v35 = vor.u32 %v5406_v17, %v4739_v53  ;;  %v5426_v8 = vld [vmem:[%s6289_s11 + $0x60] sm:$0xff]  ;;  %v5416_v13 = vld [vmem:[%s6289_s11 + $0x10] sm:$0xff]  ;;  %v5425_v17 = vld [vmem:[%s6289_s11 + $0x58] sm:$0xff] }
 0x16d   :  { %v1986_v18 = vpop.f32.mrf.mxu3  ;;  %v5433_v53 = vld [vmem:[%s6289_s11 + $0x98] sm:$0xff] }
 0x16e   :  { %2559 = vmatpush.bf16.msra.mxu0 %v4766_v16  ;;  %v4745_v18 = vld [vmem:[%s6287_s9 + $0x8] sm:$0xf]  ;;  %2534 = vmatpush.bf16.msrb.mxu2 %v4742_v35  ;;  %v5440_v16 = vld [vmem:[%s6289_s11 + $0xd0] sm:$0xff] }
 0x16f   :  { %v5439_v35 = vld [vmem:[%s6289_s11 + $0xc8] sm:$0xff] }
 0x17a   :  { %v1997_v19 = vpop.f32.mrf.mxu0 }
 0x17b   :  { %v1998_v30 = vadd.f32 %v1997_v19, %v391_v27  ;;  %v5408_v19 = vld [vmem:[%s6287_s9 + $0xc] sm:$0xf0]  ;;  %v4797_v27 = vld [vmem:[%s6286_s8 + $0x28] sm:$0xf] }
 0x17c   :  { %v2010_v20 = vpop.f32.mrf.mxu1  ;;  %v4738_v21 = vor.u32 %v5408_v19, %v4737_v38  ;;  %v5432_v38 = vld [vmem:[%s6289_s11 + $0x90] sm:$0xff]  ;;  %v5414_v19 = vld [vmem:[%s6289_s11] sm:$0xff] }
 0x17d   :  { %v2011_v31 = vadd.f32 %v2010_v20, %v1998_v30  ;;  %v4746_v20 = vor.u32 %v5409_v41, %v4745_v18  ;;  %v5398_v30 = vld [vmem:[%s6286_s8 + $0x4] sm:$0xf]  ;;  %v5415_v18 = vld [vmem:[%s6289_s11 + $0x8] sm:$0xff]  ;;  %v5424_v41 = vld [vmem:[%s6289_s11 + $0x50] sm:$0xff] }
 0x17e   :  { %2521 = vmatpush.bf16.msrb.mxu1 %v4738_v21  ;;  %v5423_v21 = vld [vmem:[%s6289_s11 + $0x48] sm:$0xff] }
 0x17f   :  { %2547 = vmatpush.bf16.msrb.mxu3 %v4746_v20  ;;  %v5438_v20 = vld [vmem:[%s6289_s11 + $0xc0] sm:$0xff] }
 0x182   :  { %v2023_v22 = vpop.f32.mrf.mxu2  ;;  %v1999_v24 = vpop.f32.mrf.mxu0 }
 0x183   :  { %v2024_v32 = vadd.f32 %v2023_v22, %v2011_v31  ;;  %v5407_v22 = vld [vmem:[%s6287_s9 + $0xc] sm:$0xf]  ;;  %v4775_v31 = vld [vmem:[%s6286_s8 + $0x10] sm:$0xf0] }
 0x184   :  { %v2012_v26 = vpop.f32.mrf.mxu1 }
 0x185   :  { %v2036_v23 = vpop.f32.mrf.mxu3  ;;  %v4791_v26 = vld [vmem:[%s6286_s8 + $0x30] sm:$0xf0] }
 0x186   :  { %v2037_v33 = vadd.f32 %v2036_v23, %v2024_v32  ;;  %v4747_v23 = vld [vmem:[%s6287_s9 + $0x18] sm:$0xf0] }
 0x187   :  { %v4750_v24 = vor.u32 %v5407_v22, %v4747_v23  ;;  %v5431_v22 = vld [vmem:[%s6289_s11 + $0x88] sm:$0xff]  ;;  %v5422_v23 = vld [vmem:[%s6289_s11 + $0x40] sm:$0xff] }
 0x189   :  { %2560 = vmatpush.bf16.msra.mxu0 %v4750_v24  ;;  %v5430_v24 = vld [vmem:[%s6289_s11 + $0x80] sm:$0xff] }
 0x18a   :  { %v2025_v28 = vpop.f32.mrf.mxu2 }
 0x18b   :  { %v4794_v28 = vor.u32 %v5402_v25, %v4791_v26  ;;  %v5452_v26 = vld [vmem:[%s6291_s13 + $0x24] sm:$0xf] }
 0x18d   :  { %v2038_v29 = vpop.f32.mrf.mxu3  ;;  %2628 = vmatpush.bf16.msra.mxu2 %v4794_v28  ;;  %v4966_v28 = vld [vmem:[%s6291_s13 + $0x28] sm:$0xf] }
 0x18e   :  { %v5405_v29 = vld [vmem:[%s6286_s8 + $0x34] sm:$0xf0] }
 0x18f   :  { %v4798_v32 = vor.u32 %v5405_v29, %v4797_v27  ;;  %v4960_v27 = vld [vmem:[%s6291_s13 + $0x30] sm:$0xf0] }
 0x19a   :  { %v2049_v37 = vpop.f32.mrf.mxu0 }
 0x19b   :  { %v2050_v40 = vadd.f32 %v2049_v37, %v2037_v33  ;;  %v4789_v33 = vld [vmem:[%s6286_s8 + $0x20] sm:$0xf]  ;;  %v5404_v37 = vld [vmem:[%s6286_s8 + $0x2c] sm:$0xf0] }
 0x19c   :  { %v2062_v39 = vpop.f32.mrf.mxu1 }
 0x19d   :  { %v2063_v44 = vadd.f32 %v2062_v39, %v2050_v40  ;;  %v5403_v39 = vld [vmem:[%s6286_s8 + $0x2c] sm:$0xf]  ;;  %v4778_v40 = vor.u32 %v5398_v30, %v4775_v31  ;;  %v4963_v30 = vor.u32 %v5452_v26, %v4960_v27  ;;  %v5455_v31 = vld [vmem:[%s6291_s13 + $0x34] sm:$0xf0] }
 0x19f   :  { %2629 = vmatpush.bf16.msra.mxu2 %v4778_v40  ;;  %v5453_v40 = vld [vmem:[%s6291_s13 + $0x2c] sm:$0xf] }
 0x1a2   :  { %v2075_v45 = vpop.f32.mrf.mxu2  ;;  %v2051_v50 = vpop.f32.mrf.mxu0 }
 0x1a3   :  { %v2076_v47 = vadd.f32 %v2075_v45, %v2063_v44  ;;  %v2088_v48 = vpop.f32.mrf.mxu3  ;;  %v4790_v44 = vor.u32 %v5404_v37, %v4789_v33  ;;  %v4799_v45 = vld [vmem:[%s6286_s8 + $0x38] sm:$0xf0]  ;;  %v5454_v33 = vld [vmem:[%s6291_s13 + $0x2c] sm:$0xf0]  ;;  %v4967_v37 = vor.u32 %v5455_v31, %v4966_v28 }
 0x1a4   :  { %v2064_v46 = vpop.f32.mrf.mxu1  ;;  %v4802_v50 = vor.u32 %v5403_v39, %v4799_v45  ;;  %v4942_v45 = vld [vmem:[%s6291_s13] sm:$0xf]  ;;  %v5471_v31 = vld [vmem:[%s6294_s16 + $0x78] sm:$0xff] }
 0x1a5   :  { %v2089_v51 = vadd.f32 %v2088_v48, %v2076_v47  ;;  %v4781_v47 = vld [vmem:[%s6286_s8 + $0x8] sm:$0xf]  ;;  %v5401_v48 = vld [vmem:[%s6286_s8 + $0x14] sm:$0xf0]  ;;  %2615 = vmatpush.bf16.msra.mxu1 %v4790_v44  ;;  %v4968_v44 = vld [vmem:[%s6291_s13 + $0x38] sm:$0xf0] }
 0x1a6   :  { %v4782_v46 = vor.u32 %v5401_v48, %v4781_v47  ;;  %v4971_v47 = vor.u32 %v5453_v40, %v4968_v44  ;;  %v5450_v48 = vld [vmem:[%s6291_s13 + $0xc] sm:$0xf0]  ;;  %v5483_v44 = vld [vmem:[%s6294_s16 + $0xd8] sm:$0xff] }
 0x1a7   :  { %v2095_v52 = vmax.f32 %v2089_v51, 0.0  ;;  %v4773_v51 = vld [vmem:[%s6286_s8] sm:$0xf]  ;;  %v5478_v40 = vld [vmem:[%s6294_s16 + $0xb0] sm:$0xff] }
 0x1a9   :  { %v2099_v54 = vpack.c.bf16 %v2095_v52, %v2095_v52  ;;  %v5400_v52 = vld [vmem:[%s6286_s8 + $0xc] sm:$0xf0] }
 0x1aa   :  { %v2077_v55 = vpop.f32.mrf.mxu2 }
 0x1ab   :  { %v2090_v49 = vpop.f32.mrf.mxu3  ;;  %2407 = vmatmul.bf16.vlgmr.msra.gmra.mxu3 %v2099_v54  ;;  %v5399_v54 = vld [vmem:[%s6286_s8 + $0xc] sm:$0xf]  ;;  %v4774_v55 = vor.u32 %v5400_v52, %v4773_v51  ;;  %v4943_v51 = vor.u32 %v5450_v48, %v4942_v45  ;;  %v5448_v52 = vld [vmem:[%s6291_s13 + $0x4] sm:$0xf]  ;;  %v5458_v45 = vld [vmem:[%s6294_s16 + $0x10] sm:$0xff] }
 0x1ac   :  { %2641 = vmatpush.bf16.msra.mxu3 %v4798_v32  ;;  %v4783_v49 = vld [vmem:[%s6286_s8 + $0x18] sm:$0xf0]  ;;  %s5552_s8 = smov 32   ;;  %v4958_v32 = vld [vmem:[%s6291_s13 + $0x20] sm:$0xf]  ;;  %v5477_v48 = vld [vmem:[%s6294_s16 + $0xa8] sm:$0xff] }
 0x1ad   :  { %2616 = vmatpush.bf16.msra.mxu1 %v4774_v55  ;;  %v4959_v39 = vor.u32 %v5454_v33, %v4958_v32  ;;  %v5479_v32 = vld [vmem:[%s6294_s16 + $0xb8] sm:$0xff]  ;;  %v5484_v33 = vld [vmem:[%s6294_s16 + $0xe0] sm:$0xff] }
 0x1b0   :  { %2642 = vmatpush.bf16.msra.mxu3 %v4782_v46  ;;  %v4952_v46 = vld [vmem:[%s6291_s13 + $0x18] sm:$0xf0] }
 0x1ba   :  { %v2369_v57 = vpop.f32.mrf.mxu0 }
 0x1bb   :  { %v2370_v58 = vadd.f32 %v5496_v56, %v2369_v57  ;;  %v4786_v56 = vor.u32 %v5399_v54, %v4783_v49  ;;  %v5497_v57 = vld [vmem:[%s6285_s7] ss:$0 sm:$0xff]  ;;  %v4944_v54 = vld [vmem:[%s6291_s13 + $0x10] sm:$0xf0]  ;;  %s3006_s7 = sshra.s32 %s6196_s1, 3 }
 0x1bc   :  { %v2382_v62 = vpop.f32.mrf.mxu1  ;;  %v4947_v49 = vor.u32 %v5448_v52, %v4944_v54  ;;  %v5476_v52 = vld [vmem:[%s6294_s16 + $0xa0] sm:$0xff]  ;;  %v5481_v54 = vld [vmem:[%s6294_s16 + $0xc8] sm:$0xff] }
 0x1bd   :  { %v2383_v59 = vadd.f32 %v2382_v62, %v2370_v58 }
 0x1c2   :  { %v2371_v60 = vpop.f32.mrf.mxu0 }
 0x1c4   :  { %v2384_v61 = vpop.f32.mrf.mxu1 }
 0x1ef   :  { %v2395_v1 = vpop.f32.mrf.mxu2 }
 0x1f0   :  { %v2396_v42 = vadd.f32 %v2395_v1, %v2383_v59  ;;  %v5421_v1 = vld [vmem:[%s6289_s11 + $0x38] sm:$0xff] }
 0x1f7   :  { %v2397_v2 = vpop.f32.mrf.mxu2 }
 0x1f8   :  { %v5445_v2 = vld [vmem:[%s6289_s11 + $0xf8] sm:$0xff] }
 0x22e   :  { %v2408_v36 = vpop.f32.mrf.mxu3 }
 0x22f   :  { %v2409_v43 = vadd.f32 %v2408_v36, %v2396_v42  ;;  %v5428_v42 = vld [vmem:[%s6289_s11 + $0x70] sm:$0xff] }
 0x230   :  { %v5436_v36 = vld [vmem:[%s6289_s11 + $0xb0] sm:$0xff] }
 0x231   :  { %v2412_v9 = vmax.f32 %v2409_v43, 0.0  ;;  %v5418_v43 = vld [vmem:[%s6289_s11 + $0x20] sm:$0xff] }
 0x233   :  { %v2413_v10 = vpack.c.bf16 %v2412_v9, %v2412_v9  ;;  %v5442_v9 = vld [vmem:[%s6289_s11 + $0xe0] sm:$0xff] }
 0x235   :  { %4734 = vmatmul.msk.bf16.vlgmr.msrb.gmra.mxu0 %vm2434_vm0, %v2413_v10  ;;  %v5427_v10 = vld [vmem:[%s6289_s11 + $0x68] sm:$0xff] }
 0x236   :  { %v2410_v11 = vpop.f32.mrf.mxu3  ;;  %2654 = vmatpush.bf16.msrb.mxu0 %v4802_v50  ;;  %v5449_v50 = vld [vmem:[%s6291_s13 + $0xc] sm:$0xf] }
 0x237   :  { %v5435_v11 = vld [vmem:[%s6289_s11 + $0xa8] sm:$0xff]  ;;  %v4955_v55 = vor.u32 %v5449_v50, %v4952_v46  ;;  %v5482_v50 = vld [vmem:[%s6294_s16 + $0xd0] sm:$0xff]  ;;  %s5447_s11 = sshll.u32 %s3006_s7, 5 }
 0x238   :  { %v5457_v46 = vld [vmem:[%s6294_s16 + $0x8] sm:$0xff]  ;;  %s3012_s22 = sadd.s32 %s5447_s11, %s3009_s21 }
 0x239   :  { %s3013_s26 = scalar_lea.vmem %s6292_s14, %s3012_s22 }
 0x23a   :  { %2655 = vmatpush.bf16.msrb.mxu0 %v4786_v56 }
 0x2b2   :  { %v2447_v58 = vpop.f32.mrf.mxu0 }
 0x2b3   :  { %v2448_v62 = vadd.f32 %v5497_v57, %v2447_v58 }
 0x2b5   :  { %v5951_v59 = vmax.f32 %v2448_v62, 0.0 }
 0x2b7   :  { %v5955_v60 = vpack.c.bf16 %v5951_v59, %v5951_v59  ;;  %v3518_v61 = vrot.slane %v5951_v59, 2  ;;  %v5554_v59 = vmov 2.0  }
 0x2b9   :  { %3551 = vrot.lane.b32.xlu2 %v3518_v61, %s5552_s8  ;;  %v2470_v63 = vrot.slane %v5955_v60, 1  ;;  %s2996_s8 = sshra.s32 %s6188_s0, 3 }
 0x2ba   :  { %v2449_v0 = vpop.f32.mrf.mxu0  ;;  %s5446_s28 = sshll.u32 %s2996_s8, 5 }
 0x2bb   :  { %4767 = vmatmul.msk.bf16.vlgmr.msrb.gmra.mxu1 %vm2434_vm0, %v2470_v63  ;;  %4768 = vmatmul.msk.bf16.vlgmr.msrb.gmra.mxu2 %vm2434_vm0, %v2470_v63  ;;  %v5451_v0 = vld [vmem:[%s6291_s13 + $0x14] sm:$0xf0]  ;;  %s3002_s5 = sadd.s32 %s5446_s28, %s2999_s27 }
 0x2bc   :  { %4769 = vmatmul.msk.bf16.vlgmr.msrb.gmra.mxu3 %vm2434_vm0, %v2470_v63  ;;  %4770 = vmatmul.msk.bf16.vlgmr.msra.gmra.mxu0 %vm2434_vm0, %v2470_v63  ;;  %v4950_v63 = vld [vmem:[%s6291_s13 + $0x8] sm:$0xf]  ;;  %s3003_s25 = scalar_lea.vmem %s6292_s14, %s3002_s5 }
 0x2bd   :  { %2943 = vmatpush.bf16.msrb.mxu1 %v5421_v1  ;;  %2982 = vmatpush.bf16.msra.mxu0 %v5445_v2  ;;  %v4951_v1 = vor.u32 %v5451_v0, %v4950_v63  ;;  %v2661_v2 = vld [vmem:[%s6288_s10] sm:$0xf]  ;;  %v5465_v63 = vld [vmem:[%s6294_s16 + $0x48] sm:$0xff] }
 0x2be   :  { %2956 = vmatpush.bf16.msrb.mxu2 %v5429_v4  ;;  %2969 = vmatpush.bf16.msrb.mxu3 %v5437_v5  ;;  %v2663_v4 = vperm.slane %v2661_v2, 0  ;;  %v5473_v0 = vld [vmem:[%s6294_s16 + $0x88] sm:$0xff] }
 0x2c1   :  { %2944 = vmatpush.bf16.msrb.mxu1 %v5420_v34  ;;  %2983 = vmatpush.bf16.msra.mxu0 %v5444_v3 }
 0x2c2   :  { %2957 = vmatpush.bf16.msrb.mxu2 %v5428_v42  ;;  %2970 = vmatpush.bf16.msrb.mxu3 %v5436_v36 }
 0x2c5   :  { %2945 = vmatpush.bf16.msrb.mxu1 %v5419_v6  ;;  %2984 = vmatpush.bf16.msra.mxu0 %v5443_v7  ;;  %v2666_v6 = vperm.slane %v2661_v2, 3 }
 0x2c6   :  { %2958 = vmatpush.bf16.msrb.mxu2 %v5427_v10  ;;  %2971 = vmatpush.bf16.msrb.mxu3 %v5435_v11  ;;  %v2664_v11 = vperm.slane %v2661_v2, 1 }
 0x2c9   :  { %2946 = vmatpush.bf16.msrb.mxu1 %v5418_v43  ;;  %2985 = vmatpush.bf16.msra.mxu0 %v5442_v9 }
 0x2ca   :  { %2959 = vmatpush.bf16.msrb.mxu2 %v5426_v8  ;;  %2972 = vmatpush.bf16.msrb.mxu3 %v5434_v15  ;;  %v2665_v8 = vperm.slane %v2661_v2, 2  ;;  %v5463_v15 = vld [vmem:[%s6294_s16 + $0x38] sm:$0xff] }
 0x2cb   :  { %4803 = vmatmul.msk.bf16.vlgmr.msra.gmra.mxu1 %vm2434_vm0, %v5955_v60  ;;  %4804 = vmatmul.msk.bf16.vlgmr.msra.gmra.mxu2 %vm2434_vm0, %v5955_v60 }
 0x2cc   :  { %4805 = vmatmul.msk.bf16.vlgmr.msra.gmra.mxu3 %vm2434_vm0, %v5955_v60  ;;  %4806 = vmatmul.msk.bf16.vlgmr.msrb.gmra.mxu0 %vm2434_vm0, %v5955_v60 }
 0x2cd   :  { %2947 = vmatpush.bf16.msrb.mxu1 %v5417_v12  ;;  %2986 = vmatpush.bf16.msra.mxu0 %v5441_v14 }
 0x2ce   :  { %2960 = vmatpush.bf16.msrb.mxu2 %v5425_v17  ;;  %2973 = vmatpush.bf16.msrb.mxu3 %v5433_v53  ;;  %v5487_v53 = vld [vmem:[%s6294_s16 + $0xf8] sm:$0xff] }
 0x2d1   :  { %2948 = vmatpush.bf16.msrb.mxu1 %v5416_v13  ;;  %2987 = vmatpush.bf16.msra.mxu0 %v5440_v16 }
 0x2d2   :  { %2961 = vmatpush.bf16.msrb.mxu2 %v5424_v41  ;;  %2974 = vmatpush.bf16.msrb.mxu3 %v5432_v38 }
 0x2d5   :  { %2949 = vmatpush.bf16.msrb.mxu1 %v5415_v18  ;;  %2988 = vmatpush.bf16.msra.mxu0 %v5439_v35 }
 0x2d6   :  { %2962 = vmatpush.bf16.msrb.mxu2 %v5423_v21  ;;  %2975 = vmatpush.bf16.msrb.mxu3 %v5431_v22  ;;  %v5462_v21 = vld [vmem:[%s6294_s16 + $0x30] sm:$0xff] }
 0x2d9   :  { %2950 = vmatpush.bf16.msrb.mxu1 %v5414_v19  ;;  %2989 = vmatpush.bf16.msra.mxu0 %v5438_v20 }
 0x2da   :  { %2963 = vmatpush.bf16.msrb.mxu2 %v5422_v23  ;;  %2976 = vmatpush.bf16.msrb.mxu3 %v5430_v24  ;;  %v5486_v23 = vld [vmem:[%s6294_s16 + $0xf0] sm:$0xff] }
 0x2dd   :  { %3092 = vmatpush.bf16.msra.mxu1 %v4959_v39  ;;  %3131 = vmatpush.bf16.msrb.mxu0 %v4971_v47  ;;  %v5470_v39 = vld [vmem:[%s6294_s16 + $0x70] sm:$0xff]  ;;  %v5469_v47 = vld [vmem:[%s6294_s16 + $0x68] sm:$0xff] }
 0x2de   :  { %3105 = vmatpush.bf16.msra.mxu2 %v4963_v30  ;;  %3118 = vmatpush.bf16.msra.mxu3 %v4967_v37  ;;  %v5485_v30 = vld [vmem:[%s6294_s16 + $0xe8] sm:$0xff]  ;;  %v5459_v37 = vld [vmem:[%s6294_s16 + $0x18] sm:$0xff] }
 0x2e1   :  { %3093 = vmatpush.bf16.msra.mxu1 %v4943_v51  ;;  %3132 = vmatpush.bf16.msrb.mxu0 %v4955_v55  ;;  %v5468_v51 = vld [vmem:[%s6294_s16 + $0x60] sm:$0xff] }
 0x2e2   :  { %3106 = vmatpush.bf16.msra.mxu2 %v4947_v49  ;;  %3119 = vmatpush.bf16.msra.mxu3 %v4951_v1  ;;  %v5456_v55 = vld [vmem:[%s6294_s16] sm:$0xff]  ;;  %v5467_v49 = vld [vmem:[%s6294_s16 + $0x58] sm:$0xff] }
 0x338   :  { %v2523_v25 = vpop.f32.mrf.mxu1 }
 0x339   :  { %v2562_v29 = vpop.f32.mrf.mxu0 }
 0x33e   :  { %v2536_v56 = vpop.f32.mrf.mxu2 }
 0x33f   :  { %v2549_v57 = vpop.f32.mrf.mxu3 }
 0x340   :  { %v2525_v58 = vpop.f32.mrf.mxu1 }
 0x341   :  { %v2564_v62 = vpop.f32.mrf.mxu0  ;;  %v5466_v58 = vld [vmem:[%s6294_s16 + $0x50] sm:$0xff] }
 0x342   :  { %v5474_v62 = vld [vmem:[%s6294_s16 + $0x90] sm:$0xff] }
 0x346   :  { %v2538_v34 = vpop.f32.mrf.mxu2 }
 0x347   :  { %v2551_v3 = vpop.f32.mrf.mxu3  ;;  %v5464_v34 = vld [vmem:[%s6294_s16 + $0x40] sm:$0xff] }
 0x348   :  { %v2618_v5 = vpop.f32.mrf.mxu1  ;;  %v5472_v3 = vld [vmem:[%s6294_s16 + $0x80] sm:$0xff] }
 0x349   :  { %v2619_v7 = vadd.f32 %v2618_v5, %v2523_v25  ;;  %v2657_v42 = vpop.f32.mrf.mxu0  ;;  %v3004_v5 = vld [vmem:[%s3003_s25] ss:$8 sm:$0xf] }
 0x34a   :  { %v2658_v36 = vadd.f32 %v2657_v42, %v2562_v29  ;;  %v5461_v29 = vld [vmem:[%s6294_s16 + $0x28] sm:$0xff] }
 0x34b   :  { %v2671_v43 = vadd.f32 %v2663_v4, %v2619_v7  ;;  %v3472_v4 = vlaneseq  ;;  %v5498_v7 = vld [vmem:[%s6290_s12] ss:$0 sm:$0xff] }
 0x34c   :  { %v2674_v9 = vadd.f32 %v2666_v6, %v2658_v36  ;;  %v3014_v42 = vld [vmem:[%s3013_s26] ss:$8 sm:$0xf]  ;;  %v3474_v36 = vstv %s6188_s0 }
 0x34d   :  { %v2675_v10 = vmax.f32 %v2671_v43, 0.0  ;;  %v6238_v6 = vand.u32 127, %v3472_v4  ;;  %v3478_v43 = vstv %s6196_s1 }
 0x34e   :  { %v2678_v12 = vmax.f32 %v2674_v9, 0.0  ;;  %v2631_v14 = vpop.f32.mrf.mxu2 }
 0x34f   :  { %v2679_v13 = vpack.c.bf16 %v2675_v10, %v2675_v10  ;;  %v2632_v16 = vadd.f32 %v2631_v14, %v2536_v56  ;;  %v2644_v17 = vpop.f32.mrf.mxu3  ;;  %v5475_v56 = vld [vmem:[%s6294_s16 + $0x98] sm:$0xff]  ;;  %vm3475_vm1 = vcmp.eq.s32.totalorder %v6238_v6, %v3474_v36  ;;  %vm3479_vm2 = vcmp.eq.s32.totalorder %v6238_v6, %v3478_v43 }
 0x350   :  { %v2682_v18 = vpack.c.bf16 %v2678_v12, %v2678_v12  ;;  %v2645_v35 = vadd.f32 %v2644_v17, %v2549_v57  ;;  %v2620_v41 = vpop.f32.mrf.mxu1  ;;  %v5480_v57 = vld [vmem:[%s6294_s16 + $0xc0] sm:$0xff]  ;;  %v3025_v12 = vperm.slane %v3014_v42, 0  ;;  %vm3541_vm10 = vcmp.eq.s32.totalorder %v6238_v6, 0 }
 0x351   :  { %v2672_v38 = vadd.f32 %v2664_v11, %v2632_v16  ;;  %v2659_v19 = vpop.f32.mrf.mxu0  ;;  %2951 = vmatmul.bf16.vlgmr.msrb.gmra.mxu1 %v2679_v13  ;;  %v3016_v11 = vperm.slane %v3004_v5, 0  ;;  %v3138_v16 = vld [vmem:[%s6293_s15] sm:$0xf]  ;;  %vm3545_vm11 = vcmp.eq.s32.totalorder %v6238_v6, 1 }
 0x352   :  { %v2673_v20 = vadd.f32 %v2665_v8, %v2645_v35  ;;  %2990 = vmatmul.bf16.vlgmr.msra.gmra.mxu0 %v2682_v18  ;;  %3420 = vmatpush.bf16.msrb.mxu1 %v5463_v15  ;;  %v3019_v8 = vperm.slane %v3004_v5, 3  ;;  %v3028_v15 = vperm.slane %v3014_v42, 3  ;;  %v5553_v18 = vmov 0.0  }
 0x353   :  { %v2676_v22 = vmax.f32 %v2672_v38, 0.0  ;;  %3459 = vmatpush.bf16.msra.mxu0 %v5487_v53  ;;  %v5104_v35 = vsel %vm3475_vm1, 1.0, %v5553_v18  ;;  %v5105_v41 = vsel %vm3479_vm2, 1.0, %v5553_v18  ;;  %v3034_v38 = vsel %vm3033_vm3, %v3016_v11, %v3025_v12 }
 0x354   :  { %v2677_v24 = vmax.f32 %v2673_v20, 0.0  ;;  %v3140_v20 = vperm.slane %v3138_v16, 0 }
 0x355   :  { %v2680_v25 = vpack.c.bf16 %v2676_v22, %v2676_v22 }
 0x356   :  { %v2681_v26 = vpack.c.bf16 %v2677_v24, %v2677_v24  ;;  %v2633_v27 = vpop.f32.mrf.mxu2  ;;  %3421 = vmatpush.bf16.msrb.mxu1 %v5462_v21  ;;  %v3037_v21 = vsel %vm3033_vm3, %v3019_v8, %v3028_v15  ;;  %v3482_v24 = vsel %vm3033_vm3, %v5104_v35, %v5105_v41  ;;  %v5499_v15 = vld [vmem:[%s6295_s17] ss:$0 sm:$0xff] }
 0x357   :  { %v2646_v28 = vpop.f32.mrf.mxu3  ;;  %2964 = vmatmul.bf16.vlgmr.msrb.gmra.mxu2 %v2680_v25  ;;  %3460 = vmatpush.bf16.msra.mxu0 %v5486_v23  ;;  %v3143_v23 = vperm.slane %v3138_v16, 3 }
 0x358   :  { %2977 = vmatmul.bf16.vlgmr.msrb.gmra.mxu3 %v2681_v26  ;;  %3433 = vmatpush.bf16.msrb.mxu2 %v5471_v31 }
 0x359   :  { %3446 = vmatpush.bf16.msrb.mxu3 %v5479_v32 }
 0x35a   :  { %3422 = vmatpush.bf16.msrb.mxu1 %v5461_v29 }
 0x35b   :  { %3461 = vmatpush.bf16.msra.mxu0 %v5485_v30 }
 0x35c   :  { %3434 = vmatpush.bf16.msrb.mxu2 %v5470_v39 }
 0x35d   :  { %3447 = vmatpush.bf16.msrb.mxu3 %v5478_v40 }
 0x35f   :  { %3462 = vmatpush.bf16.msra.mxu0 %v5484_v33 }
 0x360   :  { %3435 = vmatpush.bf16.msrb.mxu2 %v5469_v47 }
 0x361   :  { %4972 = vmatmul.msk.bf16.vlgmr.msra.gmra.mxu1 %vm2434_vm0, %v5955_v60  ;;  %3448 = vmatpush.bf16.msrb.mxu3 %v5477_v48  ;;  %v3018_v48 = vperm.slane %v3004_v5, 2 }
 0x362   :  { %4975 = vmatmul.msk.bf16.vlgmr.msrb.gmra.mxu0 %vm2434_vm0, %v5955_v60 }
 0x363   :  { %3463 = vmatpush.bf16.msra.mxu0 %v5483_v44  ;;  %v3017_v44 = vperm.slane %v3004_v5, 1 }
 0x364   :  { %3436 = vmatpush.bf16.msrb.mxu2 %v5468_v51 }
 0x365   :  { %3449 = vmatpush.bf16.msrb.mxu3 %v5476_v52 }
 0x367   :  { %4973 = vmatmul.msk.bf16.vlgmr.msra.gmra.mxu2 %vm2434_vm0, %v5955_v60  ;;  %3464 = vmatpush.bf16.msra.mxu0 %v5482_v50  ;;  %v3027_v50 = vperm.slane %v3014_v42, 2 }
 0x368   :  { %4974 = vmatmul.msk.bf16.vlgmr.msra.gmra.mxu3 %vm2434_vm0, %v5955_v60  ;;  %v5460_v60 = vld [vmem:[%s6294_s16 + $0x20] sm:$0xff]  ;;  %3437 = vmatpush.bf16.msrb.mxu2 %v5467_v49 }
 0x369   :  { %3423 = vmatpush.bf16.msrb.mxu1 %v5460_v60  ;;  %3450 = vmatpush.bf16.msrb.mxu3 %v5475_v56  ;;  %v3036_v49 = vsel %vm3033_vm3, %v3018_v48, %v3027_v50 }
 0x36b   :  { %3465 = vmatpush.bf16.msra.mxu0 %v5481_v54 }
 0x36c   :  { %3438 = vmatpush.bf16.msrb.mxu2 %v5466_v58 }
 0x36d   :  { %3424 = vmatpush.bf16.msrb.mxu1 %v5459_v37  ;;  %3451 = vmatpush.bf16.msrb.mxu3 %v5474_v62 }
 0x36f   :  { %3466 = vmatpush.bf16.msra.mxu0 %v5480_v57  ;;  %v3142_v57 = vperm.slane %v3138_v16, 2 }
 0x370   :  { %3439 = vmatpush.bf16.msrb.mxu2 %v5465_v63 }
 0x371   :  { %3425 = vmatpush.bf16.msrb.mxu1 %v5458_v45  ;;  %3452 = vmatpush.bf16.msrb.mxu3 %v5473_v0  ;;  %v3026_v45 = vperm.slane %v3014_v42, 1 }
 0x373   :  { %v3035_v54 = vsel %vm3033_vm3, %v3017_v44, %v3026_v45 }
 0x374   :  { %3440 = vmatpush.bf16.msrb.mxu2 %v5464_v34 }
 0x375   :  { %3426 = vmatpush.bf16.msrb.mxu1 %v5457_v46  ;;  %3453 = vmatpush.bf16.msrb.mxu3 %v5472_v3 }
 0x379   :  { %3427 = vmatpush.bf16.msrb.mxu1 %v5456_v55  ;;  %v3141_v55 = vperm.slane %v3138_v16, 1 }
 0x3ce   :  { %v2952_v1 = vpop.f32.mrf.mxu1 }
 0x3cf   :  { %v2991_v2 = vpop.f32.mrf.mxu0  ;;  %v2953_v14 = vadd.f32 %v5498_v7, %v2952_v1 }
 0x3d6   :  { %v2954_v9 = vpop.f32.mrf.mxu1 }
 0x3d7   :  { %v2993_v10 = vpop.f32.mrf.mxu0 }
 0x3da   :  { %v2965_v13 = vpop.f32.mrf.mxu2 }
 0x3db   :  { %v2966_v17 = vadd.f32 %v2965_v13, %v2953_v14  ;;  %v2978_v53 = vpop.f32.mrf.mxu3 }
 0x3dd   :  { %v2979_v19 = vadd.f32 %v2978_v53, %v2966_v17 }
 0x3de   :  { %v3095_v22 = vpop.f32.mrf.mxu1 }
 0x3df   :  { %v2992_v25 = vadd.f32 %v2991_v2, %v2979_v19  ;;  %v3096_v26 = vadd.f32 %v3095_v22, %v3034_v38  ;;  %v3134_v27 = vpop.f32.mrf.mxu0  ;;  %v3552_v38 = vpop.permute.xlu2 %3551 }
 0x3e0   :  { %v3135_v28 = vadd.f32 %v3134_v27, %v3037_v21 }
 0x3e1   :  { %v3148_v29 = vadd.f32 %v3140_v20, %v3096_v26  ;;  %v3484_v30 = vsel %vm3483_vm4, %v2992_v25, -inf  ;;  %v3496_v31 = vmul.f32 %v3482_v24, %v2992_v25 }
 0x3e2   :  { %v3151_v32 = vadd.f32 %v3143_v23, %v3135_v28  ;;  %v2967_v60 = vpop.f32.mrf.mxu2  ;;  %3485 = vmax.xlane.f32.xlu0 %v3484_v30 }
 0x3e3   :  { %v3152_v33 = vmax.f32 %v3148_v29, 0.0  ;;  %v2980_v37 = vpop.f32.mrf.mxu3  ;;  %v3497_v39 = vsel %vm3483_vm4, %v3496_v31, 0.0 }
 0x3e4   :  { %v3155_v40 = vmax.f32 %v3151_v32, 0.0  ;;  %3498 = vadd.xlane.f32.xlu1 %v3497_v39  ;;  %v5555_v32 = vmov 64.0  }
 0x3e5   :  { %v3156_v47 = vpack.c.bf16 %v3152_v33, %v3152_v33 }
 0x3e6   :  { %v3159_v46 = vpack.c.bf16 %v3155_v40, %v3155_v40  ;;  %v3097_v51 = vpop.f32.mrf.mxu1 }
 0x3e7   :  { %v3136_v52 = vpop.f32.mrf.mxu0  ;;  %3428 = vmatmul.bf16.vlgmr.msrb.gmra.mxu1 %v3156_v47 }
 0x3e8   :  { %3467 = vmatmul.bf16.vlgmr.msra.gmra.mxu0 %v3159_v46 }
 0x3ea   :  { %v3108_v56 = vpop.f32.mrf.mxu2 }
 0x3eb   :  { %v3109_v58 = vadd.f32 %v3108_v56, %v3035_v54  ;;  %v3121_v62 = vpop.f32.mrf.mxu3 }
 0x3ec   :  { %v3122_v63 = vadd.f32 %v3121_v62, %v3036_v49 }
 0x3ed   :  { %v3149_v0 = vadd.f32 %v3141_v55, %v3109_v58 }
 0x3ee   :  { %v3150_v1 = vadd.f32 %v3142_v57, %v3122_v63 }
 0x3ef   :  { %v3153_v2 = vmax.f32 %v3149_v0, 0.0 }
 0x3f0   :  { %v3154_v34 = vmax.f32 %v3150_v1, 0.0 }
 0x3f1   :  { %v3157_v3 = vpack.c.bf16 %v3153_v2, %v3153_v2 }
 0x3f2   :  { %v3158_v4 = vpack.c.bf16 %v3154_v34, %v3154_v34  ;;  %v3110_v5 = vpop.f32.mrf.mxu2 }
 0x3f3   :  { %v3123_v7 = vpop.f32.mrf.mxu3  ;;  %3441 = vmatmul.bf16.vlgmr.msrb.gmra.mxu2 %v3157_v3  ;;  %v5106_v5 = vsel %vm3541_vm10, 1.0, %v5553_v18 }
 0x3f4   :  { %3454 = vmatmul.bf16.vlgmr.msrb.gmra.mxu3 %v3158_v4  ;;  %v5107_v7 = vsel %vm3545_vm11, 1.0, %v5553_v18 }
 0x455   :  { %v3486_v42 = vpop.xlane.xlu0 %3485 }
 0x456   :  { %v3487_v36 = vsub.f32 %v2992_v25, %v3486_v42 }
 0x457   :  { %v3499_v30 = vpop.xlane.xlu1 %3498 }
 0x458   :  { %v3488_v43 = vmul.f32 1.442695, %v3487_v36 }
 0x45a   :  { %5500 = vpow2.f32 %v3488_v43 }
 0x460   :  { %v5501_v9 = vpop.eup %5500 }
 0x461   :  { %v3490_v10 = vsel %vm3483_vm4, %v5501_v9, 0.0 }
 0x462   :  { %3491 = vadd.xlane.f32.xlu0 %v3490_v10 }
 0x464   :  { %v3429_v11 = vpop.f32.mrf.mxu1 }
 0x465   :  { %v3468_v12 = vpop.f32.mrf.mxu0  ;;  %v3430_v13 = vadd.f32 %v5499_v15, %v3429_v11 }
 0x46c   :  { %v3431_v14 = vpop.f32.mrf.mxu1 }
 0x46d   :  { %v3470_v8 = vpop.f32.mrf.mxu0 }
 0x476   :  { %v3442_v16 = vpop.f32.mrf.mxu2 }
 0x477   :  { %v3443_v17 = vadd.f32 %v3442_v16, %v3430_v13  ;;  %v3455_v53 = vpop.f32.mrf.mxu3 }
 0x479   :  { %v3456_v35 = vadd.f32 %v3455_v53, %v3443_v17 }
 0x47b   :  { %v3469_v41 = vadd.f32 %v3468_v12, %v3456_v35 }
 0x47d   :  { %v3554_v19 = vsel %vm2434_vm0, %v3469_v41, %v3552_v38  ;;  %v3520_v20 = vsub.f32 %v3469_v41, %v3518_v61 }
 0x47e   :  { %v3556_v21 = vsel %vm3555_vm5, %v3554_v19, 0.0  ;;  %v3444_v22 = vpop.f32.mrf.mxu2 }
 0x47f   :  { %3557 = vst [vmem:[%s6297_s19] sm:$0x3] %v3556_v21  ;;  %v3457_v23 = vpop.f32.mrf.mxu3  ;;  %v3521_v24 = vmul.f32 %v3520_v20, %v3520_v20 }
 0x481   :  { %v3523_v25 = vsel %vm3522_vm6, %v3521_v24, 0.0 }
 0x482   :  { %3524 = vadd.xlane.f32.xlu1 %v3523_v25 }
 0x4d5   :  { %v3492_v26 = vpop.xlane.xlu0 %3491 }
 0x4d6   :  { %5502 = vlog2.f32 %v3492_v26 }
 0x4d7   :  { %5504 = vrcp.f32 %v5554_v59 }
 0x4d8   :  { %5506 = vrcp.f32 %v5555_v32 }
 0x4dc   :  { %v5503_v27 = vpop.eup %5502 }
 0x4dd   :  { %v3494_v28 = vmul.f32 0.6931472, %v5503_v27  ;;  %v5505_v33 = vpop.eup %5504 }
 0x4de   :  { %v5507_v37 = vpop.eup %5506  ;;  %v3510_v40 = vmul.f32 2.0, %v5505_v33  ;;  %vm3514_vm8 = vweird.f32 %v5505_v33 }
 0x4df   :  { %v3495_v29 = vadd.f32 %v3494_v28, %v3486_v42  ;;  %v3534_v44 = vmul.f32 64.0, %v5507_v37  ;;  %vm3538_vm9 = vweird.f32 %v5507_v37 }
 0x4e0   :  { %v3511_v47 = vsub.f32 1.0, %v3510_v40 }
 0x4e1   :  { %v3500_v31 = vsub.f32 %v3495_v29, %v3499_v30  ;;  %v3535_v48 = vsub.f32 1.0, %v3534_v44 }
 0x4e2   :  { %v3512_v51 = vmul.f32 %v5505_v33, %v3511_v47 }
 0x4e3   :  { %v3502_v61 = vsel %vm3501_vm7, %v3500_v31, 0.0  ;;  %v3536_v55 = vmul.f32 %v5507_v37, %v3535_v48 }
 0x4e4   :  { %v3503_v60 = vrot.slane %v3502_v61, 4  ;;  %v3513_v57 = vadd.f32 %v5505_v33, %v3512_v51 }
 0x4e5   :  { %v3537_v62 = vadd.f32 %v5507_v37, %v3536_v55 }
 0x4e6   :  { %v3504_v39 = vadd.f32 %v3503_v60, %v3502_v61  ;;  %v3515_v1 = vsel %vm3514_vm8, %v5505_v33, %v3513_v57 }
 0x4e7   :  { %v3539_v34 = vsel %vm3538_vm9, %v5507_v37, %v3537_v62 }
 0x4e8   :  { %v3505_v45 = vrot.slane %v3504_v39, 2 }
 0x4ea   :  { %v3506_v46 = vadd.f32 %v3505_v45, %v3504_v39 }
 0x4ec   :  { %v3507_v49 = vrot.slane %v3506_v46, 1 }
 0x4ee   :  { %v3508_v63 = vadd.f32 %v3507_v49, %v3506_v46 }
 0x4f0   :  { %v3516_v3 = vmul.f32 %v3515_v1, %v3508_v63 }
 0x4f2   :  { %v3544_v36 = vmul.f32 %v5106_v5, %v3516_v3 }
 0x4f5   :  { %v3525_v50 = vpop.xlane.xlu1 %3524 }
 0x4f6   :  { %v3526_v52 = vsel %vm3501_vm7, %v3525_v50, 0.0 }
 0x4f7   :  { %v3527_v54 = vrot.slane %v3526_v52, 4 }
 0x4f9   :  { %v3528_v56 = vadd.f32 %v3527_v54, %v3526_v52 }
 0x4fb   :  { %v3529_v58 = vrot.slane %v3528_v56, 2 }
 0x4fd   :  { %v3530_v0 = vadd.f32 %v3529_v58, %v3528_v56 }
 0x4ff   :  { %v3531_v2 = vrot.slane %v3530_v0, 1 }
 0x501   :  { %v3532_v4 = vadd.f32 %v3531_v2, %v3530_v0 }
 0x503   :  { %v3540_v42 = vmul.f32 %v3539_v34, %v3532_v4 }
 0x505   :  { %v3548_v43 = vmul.f32 %v5107_v7, %v3540_v42 }
 0x507   :  { %v3549_v9 = vadd.f32 %v3548_v43, %v3544_v36 }
 0x509   :  { %3550 = vst [vmem:[%s6296_s18] sm:$0x1] %v3549_v9 }
 0x50a   :  { %3566 = vsyncpa [#allocation3], 1 }
 0x50b   :  { %3567 = vsyncpa [#allocation4], 1 }

</bundles_post_ra>
